<compile_context>
chip_gen: v6e
topology: v6e:2x2x1
jax: 0.10.0
libtpu: 0.0.40
codegen_flags: <defaults>
</compile_context>

<pallas_src>
import functools

import jax
import jax.numpy as jnp
from jax import lax
from jax.experimental import pallas as pl
from jax.experimental.pallas import tpu as pltpu

EPS = 1e-5  # PyTorch GroupNorm default


# --------------------------------------------------------------------------
# Kernel
# --------------------------------------------------------------------------
def ema_kernel(x_ref, pool_ref, eh_ref, ew_ref, mask_ref,
               w1_ref, w3_ref, cols_ref, sel_ref, agg_ref, bcast_ref,
               o_ref, *, w, hw):
    """Processes G bg-groups at once in a lane-dense (G*cg, hw_pad) layout."""
    gc, hwp = x_ref.shape
    n_sel = sel_ref.shape[0]            # = cg (channels per group)
    inv_hw = 1.0 / hw                   # true spatial size (pre-padding)

    x = x_ref[...].astype(jnp.float32)                               # (GC, hwp)

    cols = cols_ref[...]                                             # (GC, 8)
    b1, b3 = cols[:, 0:1], cols[:, 1:2]
    gamma, beta = cols[:, 2:3], cols[:, 3:4]

    valid = mask_ref[4:5, :]            # center-tap mask == in-image lane mask

    # ---- directional pooling (mean over W | mean over H) as one matmul ----
    cat = jnp.dot(x, pool_ref[...], preferred_element_type=jnp.float32)  # (GC, h+w)

    # ---- per-group 1x1 conv (block-diagonal weight) + sigmoid gates ----
    sig = jax.nn.sigmoid(
        jnp.dot(w1_ref[...], cat, preferred_element_type=jnp.float32) + b1)

    # ---- expand h-gate / w-gate back to the flat spatial layout, gate x ----
    gate = (jnp.dot(sig, eh_ref[...], preferred_element_type=jnp.float32) *
            jnp.dot(sig, ew_ref[...], preferred_element_type=jnp.float32))
    gated = x * gate                                                 # 0 at pads

    # ---- per-channel GroupNorm over the valid spatial positions ----
    mean = jnp.sum(gated, axis=1, keepdims=True) * inv_hw
    cen = (gated - mean) * valid
    var = jnp.sum(cen * cen, axis=1, keepdims=True) * inv_hw
    x1 = cen * lax.rsqrt(var + EPS) * gamma + beta

    # ---- 3x3 conv (padding=1): tap-accumulated roll(XLU)+mask, 9 matmuls ----
    x2 = None
    for ky in range(3):
        for kx in range(3):
            t = ky * 3 + kx
            s = (ky - 1) * w + (kx - 1)          # flat offset of this tap
            shifted = x if s == 0 else pltpu.roll(x, shift=(-s) % hwp, axis=1)
            tap = shifted * mask_ref[t:t + 1, :]
            contrib = jnp.dot(w3_ref[t], tap, preferred_element_type=jnp.float32)
            x2 = contrib if x2 is None else x2 + contrib
    x2 = x2 + b3                                                     # (GC, hwp)

    # ---- cross-channel attention: per-group softmax of the pooled maps ----
    agg = agg_ref[...]       # (G, GC): sums the cg channels of each group
    bcast = bcast_ref[...]   # (GC, G): broadcasts a per-group row back
    a1 = jnp.sum(x1 * valid, axis=1, keepdims=True) * inv_hw         # (GC, 1)
    a2 = jnp.sum(x2 * valid, axis=1, keepdims=True) * inv_hw

    def group_max(a):
        # per-group max via channel-selection matmuls (no reshape relayouts)
        m = jnp.dot(sel_ref[0], a, preferred_element_type=jnp.float32)     # (G, 1)
        for j in range(1, n_sel):
            m = jnp.maximum(
                m, jnp.dot(sel_ref[j], a, preferred_element_type=jnp.float32))
        return jnp.dot(bcast, m, preferred_element_type=jnp.float32)       # (GC, 1)

    e1 = jnp.exp(a1 - group_max(a1))
    e2 = jnp.exp(a2 - group_max(a2))
    n1 = jnp.dot(agg, e1 * x2, preferred_element_type=jnp.float32)   # (G, hwp)
    n2 = jnp.dot(agg, e2 * x1, preferred_element_type=jnp.float32)
    d1 = jnp.dot(agg, e1, preferred_element_type=jnp.float32)        # (G, 1)
    d2 = jnp.dot(agg, e2, preferred_element_type=jnp.float32)
    weights = n1 / d1 + n2 / d2                                      # (G, hwp)
    out = x * jnp.dot(bcast, jax.nn.sigmoid(weights),
                      preferred_element_type=jnp.float32)            # (GC, hwp)
    o_ref[...] = out.astype(o_ref.dtype)


# --------------------------------------------------------------------------
# Generation-aware sizing helpers
# --------------------------------------------------------------------------
def _vmem_capacity_bytes():
    try:
        info = pltpu.get_tpu_info()
        cap = getattr(info, "vmem_capacity_bytes", None)
        if cap:
            return int(cap)
    except Exception:
        pass
    return 64 << 20     # conservative default (v7x physical per-TC VMEM)


def _num_tensorcores():
    try:
        kind = jax.devices()[0].device_kind.lower()
    except Exception:
        return 1
    # v5e / v6e have one TensorCore per chip, v7x has two.
    return 2 if ("v7" in kind or "7x" in kind) else 1


def _pick_groups_per_block(bg, cg, need_fn, budget, num_tc):
    """How many bg-groups to process per grid step."""
    cands = []
    for g in range(1, bg + 1):
        if bg % g:
            continue
        gc_rows = g * cg
        if gc_rows % 8 != 0 and g != bg:
            continue                      # keep the block's sublane dim aligned
        if need_fn(gc_rows) > budget and g != 1:
            continue                      # VMEM budget (always keep g=1 legal)
        cands.append(g)
    if not cands:
        return bg
    if num_tc >= 2:
        # dual-TC (v7x): even number of >=2 parallel steps, then largest block
        key = lambda g: ((bg // g) >= 2 and (bg // g) % 2 == 0, g)
    else:
        # single-TC (v5e/v6e): one big block beats many 0.35us pipeline steps
        key = lambda g: g
    return max(cands, key=key)


# --------------------------------------------------------------------------
# Wrapper
# --------------------------------------------------------------------------
def ema_forward(x, params, group):
    """x: (b, c, h, w) float32, NCHW. Returns (b, c, h, w)."""
    b, c, h, w = x.shape
    assert c % group == 0
    cg = c // group
    bg = b * group
    hw = h * w
    hwp = ((hw + 127) // 128) * 128      # lane-dense spatial axis
    f32 = jnp.float32
    w1, b1, w3, b3, gamma, beta = params

    # ---- generation-aware block sizing / VMEM budget ----
    vmem_cap = _vmem_capacity_bytes()
    num_tc = _num_tensorcores()
    vmem_limit = max(min(vmem_cap, 128 << 20) * 3 // 4, 32 << 20)
    block_budget = int(vmem_limit * 0.8)

    def vmem_need(gc_rows):
        blk = gc_rows * hwp * 4
        # double-buffered in + out (4x) plus ~7 live intermediates in the body
        tensors = 11 * blk
        consts = ((3 * (h + w) + 9) * hwp + 12 * gc_rows * gc_rows
                  + 16 * gc_rows) * 4
        return tensors + consts

    G = _pick_groups_per_block(bg, cg, vmem_need, block_budget, num_tc)
    GC = G * cg
    n_steps = bg // G

    # ---- per-group-shared weights packed as block-diagonal operators ----
    eye_g = jnp.eye(G, dtype=f32)
    w1_blk = jnp.kron(eye_g, jnp.asarray(w1, f32).reshape(cg, cg))          # (GC, GC)
    w3f = jnp.asarray(w3, f32).reshape(cg, cg, 3, 3)
    w3_taps = jnp.stack([jnp.kron(eye_g, w3f[:, :, ky, kx])
                         for ky in range(3) for kx in range(3)], axis=0)    # (9, GC, GC)

    def tile_col(v):
        return jnp.tile(jnp.asarray(v, f32).reshape(cg, 1), (G, 1))         # (GC, 1)
    cols = jnp.concatenate(
        [tile_col(b1), tile_col(b3), tile_col(gamma), tile_col(beta),
         jnp.zeros((GC, 4), f32)], axis=1)                                   # (GC, 8)

    # ---- constant spatial operators for the lane-dense (row, hw_pad) layout ----
    n_idx = jnp.arange(hwp)
    yy, xx = n_idx // w, n_idx % w
    in_img = n_idx < hw
    ph = ((yy[:, None] == jnp.arange(h)[None, :]) &
          in_img[:, None]).astype(f32) / w                                  # mean over W
    pw = ((xx[:, None] == jnp.arange(w)[None, :]) &
          in_img[:, None]).astype(f32) / h                                  # mean over H
    pool = jnp.concatenate([ph, pw], axis=1)                                # (hwp, h+w)
    eh = jnp.concatenate([ph.T * w, jnp.zeros((w, hwp), f32)], axis=0)      # (h+w, hwp)
    ew = jnp.concatenate([jnp.zeros((h, hwp), f32), pw.T * h], axis=0)      # (h+w, hwp)
    masks = jnp.stack(
        [(in_img & (yy + ky - 1 >= 0) & (yy + ky - 1 < h) &
          (xx + kx - 1 >= 0) & (xx + kx - 1 < w)).astype(f32)
         for ky in range(3) for kx in range(3)], axis=0)                    # (9, hwp)

    # ---- per-group channel aggregation / broadcast / selection operators ----
    agg = jnp.kron(eye_g, jnp.ones((1, cg), f32))                           # (G, GC)
    bcast = agg.T                                                           # (GC, G)
    sel = jnp.stack(
        [jnp.kron(eye_g, (jnp.arange(cg) == j).astype(f32)[None, :])
         for j in range(cg)], axis=0)                                       # (cg, G, GC)

    gx = x.reshape(bg * cg, hw)                                             # lane-dense
    if hwp != hw:
        gx = jnp.pad(gx, ((0, 0), (0, hwp - hw)))

    total_rows = bg * cg
    const_elems = (3 * (h + w) + 9) * hwp + 12 * GC * GC + 16 * GC
    cost = pl.CostEstimate(
        flops=int(2 * total_rows * hwp * (h + w)        # pooling
                  + 2 * total_rows * GC * (h + w)       # grouped 1x1 conv
                  + 4 * total_rows * (h + w) * hwp      # gate expansion
                  + 18 * total_rows * GC * hwp          # 3x3 conv (9 taps)
                  + 4 * bg * GC * hwp                   # attention numerators
                  + 25 * total_rows * hwp),             # elementwise
        transcendentals=int(total_rows * (h + w) + bg * hwp + 4 * total_rows),
        bytes_accessed=int(4 * (2 * total_rows * hwp + const_elems)),
    )

    def run(single_buffer_consts):
        if single_buffer_consts:
            def const_spec(shape):
                nd = len(shape)
                return pl.BlockSpec(shape, lambda i: (0,) * nd,
                                    pipeline_mode=pl.Buffered(1))
        else:
            def const_spec(shape):
                nd = len(shape)
                return pl.BlockSpec(shape, lambda i: (0,) * nd)

        return pl.pallas_call(
            functools.partial(ema_kernel, w=w, hw=hw),
            out_shape=jax.ShapeDtypeStruct((bg * cg, hwp), x.dtype),
            grid_spec=pltpu.PrefetchScalarGridSpec(
                num_scalar_prefetch=0,
                grid=(n_steps,),
                in_specs=[
                    pl.BlockSpec((GC, hwp), lambda i: (i, 0)),  # x block
                    const_spec((hwp, h + w)),                   # pooling matrix
                    const_spec((h + w, hwp)),                   # h-gate expansion
                    const_spec((h + w, hwp)),                   # w-gate expansion
                    const_spec((9, hwp)),                       # conv/valid masks
                    const_spec((GC, GC)),                       # block-diag 1x1 weight
                    const_spec((9, GC, GC)),                    # per-tap 3x3 weights
                    const_spec((GC, 8)),                        # packed b1/b3/gamma/beta
                    const_spec((cg, G, GC)),                    # channel selectors
                    const_spec((G, GC)),                        # group-sum matrix
                    const_spec((GC, G)),                        # group-broadcast matrix
                ],
                out_specs=pl.BlockSpec((GC, hwp), lambda i: (i, 0)),
            ),
            compiler_params=pltpu.CompilerParams(
                dimension_semantics=("parallel",),
                vmem_limit_bytes=int(vmem_limit)),
            cost_estimate=cost,
        )(gx, pool, eh, ew, masks, w1_blk, w3_taps, cols, sel, agg, bcast)

    try:
        out = run(True)
    except Exception:
        # Fall back to default (double) buffering if single-buffered constant
        # blocks are not supported by this JAX/Pallas version.
        out = run(False)

    return out[:, :hw].reshape(b, c, h, w)


# --------------------------------------------------------------------------
# Pure-JAX reference mirroring the PyTorch forward
# --------------------------------------------------------------------------
def ema_reference(x, params, group):
    w1, b1, w3, b3, gamma, beta = params        # w3: OIHW (cg, cg, 3, 3)
    b, c, h, w = x.shape
    cg = c // group
    bg = b * group
    gx = x.reshape(bg, cg, h, w)

    x_h = gx.mean(axis=3, keepdims=True)                         # (bg,cg,h,1)
    x_w = gx.mean(axis=2, keepdims=True)                         # (bg,cg,1,w)
    cat = jnp.concatenate([x_h, jnp.transpose(x_w, (0, 1, 3, 2))], axis=2)
    hw_ = jnp.einsum('oc,bchw->bohw', w1, cat) + b1.reshape(1, cg, 1, 1)
    xh, xw = hw_[:, :, :h], hw_[:, :, h:]
    gated = (gx * jax.nn.sigmoid(xh) *
             jax.nn.sigmoid(jnp.transpose(xw, (0, 1, 3, 2))))
    mean = gated.mean(axis=(2, 3), keepdims=True)
    var = ((gated - mean) ** 2).mean(axis=(2, 3), keepdims=True)
    x1 = ((gated - mean) * lax.rsqrt(var + EPS) *
          gamma.reshape(1, cg, 1, 1) + beta.reshape(1, cg, 1, 1))
    x2 = lax.conv_general_dilated(
        gx, w3, window_strides=(1, 1), padding=((1, 1), (1, 1)),
        dimension_numbers=('NCHW', 'OIHW', 'NCHW')) + b3.reshape(1, cg, 1, 1)
    x11 = jax.nn.softmax(x1.mean(axis=(2, 3)), axis=-1)          # (bg, cg)
    x21 = jax.nn.softmax(x2.mean(axis=(2, 3)), axis=-1)          # (bg, cg)
    x12 = x1.reshape(bg, cg, h * w)
    x22 = x2.reshape(bg, cg, h * w)
    weights = (jnp.einsum('bc,bcn->bn', x11, x22) +
               jnp.einsum('bc,bcn->bn', x21, x12)).reshape(bg, 1, h, w)
    return (gx * jax.nn.sigmoid(weights)).reshape(b, c, h, w)


# --------------------------------------------------------------------------
# Test
# --------------------------------------------------------------------------
def _make_params(key, cg):
    k1, k2, k3, k4, k5, k6 = jax.random.split(key, 6)
    w1 = 0.2 * jax.random.normal(k1, (cg, cg), jnp.float32)          # conv1x1 (O,I)
    b1 = 0.1 * jax.random.normal(k2, (cg,), jnp.float32)
    w3 = 0.1 * jax.random.normal(k3, (cg, cg, 3, 3), jnp.float32)    # conv3x3 OIHW
    b3 = 0.1 * jax.random.normal(k4, (cg,), jnp.float32)
    gamma = 1.0 + 0.1 * jax.random.normal(k5, (cg,), jnp.float32)    # GroupNorm weight
    beta = 0.1 * jax.random.normal(k6, (cg,), jnp.float32)           # GroupNorm bias
    return (w1, b1, w3, b3, gamma, beta)


def _check(b, c, h, w, factor, key, tol=2e-3):
    kx, kp = jax.random.split(key)
    x = jax.random.normal(kx, (b, c, h, w), jnp.float32)
    params = _make_params(kp, c // factor)
    out = jax.block_until_ready(ema_forward(x, params, factor))
    ref = jax.block_until_ready(ema_reference(x, params, factor))
    assert out.shape == (b, c, h, w)
    err = float(jnp.max(jnp.abs(out - ref)))
    assert err < tol, f"max abs err {err} at shape {(b, c, h, w)}"


if __name__ == "__main__":
    key = jax.random.PRNGKey(0)
    k_a, k_b = jax.random.split(key)

    # Primary shape: factor=4, channels=16 -> cg=4, bg=8; hw=256 (lane-dense).
    _check(b=2, c=16, h=16, w=16, factor=4, key=k_a)

    # Secondary shape exercises the lane-padding path (hw=100 -> padded to 128).
    _check(b=2, c=8, h=10, w=10, factor=4, key=k_b)

    print("KERNEL_OK")
</pallas_src>

<mosaic_0001>
module attributes {stable_mosaic.version = 11 : i64} {
  func.func @ema_kernel(%arg0: i32, %arg1: memref<32x256xf32, #tpu.memory_space<vmem>>, %arg2: memref<256x32xf32, #tpu.memory_space<vmem>>, %arg3: memref<32x256xf32, #tpu.memory_space<vmem>>, %arg4: memref<32x256xf32, #tpu.memory_space<vmem>>, %arg5: memref<9x256xf32, #tpu.memory_space<vmem>>, %arg6: memref<32x32xf32, #tpu.memory_space<vmem>>, %arg7: memref<9x32x32xf32, #tpu.memory_space<vmem>>, %arg8: memref<32x8xf32, #tpu.memory_space<vmem>>, %arg9: memref<4x8x32xf32, #tpu.memory_space<vmem>>, %arg10: memref<8x32xf32, #tpu.memory_space<vmem>>, %arg11: memref<32x8xf32, #tpu.memory_space<vmem>>, %arg12: memref<32x256xf32, #tpu.memory_space<vmem>>) attributes {dimension_semantics = [#tpu.dimension_semantics<parallel>], iteration_bounds = array<i64: 1>, scalar_prefetch = 0 : i64, scratch_operands = 0 : i64, tpu.core_type = #tpu.core_type<tc>, window_params = [{transform_indices = @transform_0, window_bounds = array<i64: 32, 256>}, {pipeline_mode = #tpu.pipeline_mode<synchronous>, transform_indices = @transform_1, window_bounds = array<i64: 256, 32>}, {pipeline_mode = #tpu.pipeline_mode<synchronous>, transform_indices = @transform_2, window_bounds = array<i64: 32, 256>}, {pipeline_mode = #tpu.pipeline_mode<synchronous>, transform_indices = @transform_3, window_bounds = array<i64: 32, 256>}, {pipeline_mode = #tpu.pipeline_mode<synchronous>, transform_indices = @transform_4, window_bounds = array<i64: 9, 256>}, {pipeline_mode = #tpu.pipeline_mode<synchronous>, transform_indices = @transform_5, window_bounds = array<i64: 32, 32>}, {pipeline_mode = #tpu.pipeline_mode<synchronous>, transform_indices = @transform_6, window_bounds = array<i64: 9, 32, 32>}, {pipeline_mode = #tpu.pipeline_mode<synchronous>, transform_indices = @transform_7, window_bounds = array<i64: 32, 8>}, {pipeline_mode = #tpu.pipeline_mode<synchronous>, transform_indices = @transform_8, window_bounds = array<i64: 4, 8, 32>}, {pipeline_mode = #tpu.pipeline_mode<synchronous>, transform_indices = @transform_9, window_bounds = array<i64: 8, 32>}, {pipeline_mode = #tpu.pipeline_mode<synchronous>, transform_indices = @transform_10, window_bounds = array<i64: 32, 8>}, {transform_indices = @transform_11, window_bounds = array<i64: 32, 256>}]} {
    %c0 = arith.constant 0 : index
    %c0_0 = arith.constant 0 : index
    %0 = vector.load %arg1[%c0, %c0_0] : memref<32x256xf32, #tpu.memory_space<vmem>>, vector<32x256xf32>
    %c0_1 = arith.constant 0 : index
    %c0_2 = arith.constant 0 : index
    %1 = vector.load %arg8[%c0_1, %c0_2] : memref<32x8xf32, #tpu.memory_space<vmem>>, vector<32x8xf32>
    %2 = vector.extract_strided_slice %1 {offsets = [0, 0], sizes = [32, 1], strides = [1, 1]} : vector<32x8xf32> to vector<32x1xf32>
    %3 = vector.extract_strided_slice %1 {offsets = [0, 1], sizes = [32, 1], strides = [1, 1]} : vector<32x8xf32> to vector<32x1xf32>
    %4 = vector.extract_strided_slice %1 {offsets = [0, 2], sizes = [32, 1], strides = [1, 1]} : vector<32x8xf32> to vector<32x1xf32>
    %5 = vector.extract_strided_slice %1 {offsets = [0, 3], sizes = [32, 1], strides = [1, 1]} : vector<32x8xf32> to vector<32x1xf32>
    %c4 = arith.constant 4 : index
    %c0_3 = arith.constant 0 : index
    %6 = vector.load %arg5[%c4, %c0_3] : memref<9x256xf32, #tpu.memory_space<vmem>>, vector<1x256xf32>
    %c0_4 = arith.constant 0 : index
    %c0_5 = arith.constant 0 : index
    %7 = vector.load %arg2[%c0_4, %c0_5] : memref<256x32xf32, #tpu.memory_space<vmem>>, vector<256x32xf32>
    %cst = arith.constant dense<0.000000e+00> : vector<32x32xf32>
    %8 = tpu.matmul %0, %7, %cst {dimension_numbers = #tpu.dot_dimension_numbers<[1], [0], [0], [1], [0, 0, 1, 1], [], []>} : vector<32x256xf32>, vector<256x32xf32>, vector<32x32xf32> -> vector<32x32xf32>
    %c0_6 = arith.constant 0 : index
    %c0_7 = arith.constant 0 : index
    %9 = vector.load %arg6[%c0_6, %c0_7] : memref<32x32xf32, #tpu.memory_space<vmem>>, vector<32x32xf32>
    %cst_8 = arith.constant dense<0.000000e+00> : vector<32x32xf32>
    %10 = tpu.matmul %9, %8, %cst_8 {dimension_numbers = #tpu.dot_dimension_numbers<[1], [0], [0], [1], [0, 0, 1, 1], [], []>} : vector<32x32xf32>, vector<32x32xf32>, vector<32x32xf32> -> vector<32x32xf32>
    %11 = vector.broadcast %2 : vector<32x1xf32> to vector<32x32xf32>
    %12 = arith.addf %10, %11 : vector<32x32xf32>
    %13 = arith.negf %12 : vector<32x32xf32>
    %14 = math.exp %13 : vector<32x32xf32>
    %cst_9 = arith.constant 1.000000e+00 : f32
    %15 = vector.broadcast %cst_9 : f32 to vector<32x32xf32>
    %16 = arith.addf %15, %14 : vector<32x32xf32>
    %17 = arith.divf %15, %16 : vector<32x32xf32>
    %c0_10 = arith.constant 0 : index
    %c0_11 = arith.constant 0 : index
    %18 = vector.load %arg3[%c0_10, %c0_11] : memref<32x256xf32, #tpu.memory_space<vmem>>, vector<32x256xf32>
    %cst_12 = arith.constant dense<0.000000e+00> : vector<32x256xf32>
    %19 = tpu.matmul %17, %18, %cst_12 {dimension_numbers = #tpu.dot_dimension_numbers<[1], [0], [0], [1], [0, 0, 1, 1], [], []>} : vector<32x32xf32>, vector<32x256xf32>, vector<32x256xf32> -> vector<32x256xf32>
    %c0_13 = arith.constant 0 : index
    %c0_14 = arith.constant 0 : index
    %20 = vector.load %arg4[%c0_13, %c0_14] : memref<32x256xf32, #tpu.memory_space<vmem>>, vector<32x256xf32>
    %cst_15 = arith.constant dense<0.000000e+00> : vector<32x256xf32>
    %21 = tpu.matmul %17, %20, %cst_15 {dimension_numbers = #tpu.dot_dimension_numbers<[1], [0], [0], [1], [0, 0, 1, 1], [], []>} : vector<32x32xf32>, vector<32x256xf32>, vector<32x256xf32> -> vector<32x256xf32>
    %22 = arith.mulf %19, %21 : vector<32x256xf32>
    %23 = arith.mulf %0, %22 : vector<32x256xf32>
    %cst_16 = arith.constant dense<0.000000e+00> : vector<32xf32>
    %24 = vector.multi_reduction <add>, %23, %cst_16 [1] : vector<32x256xf32> to vector<32xf32>
    %25 = vector.shape_cast %24 : vector<32xf32> to vector<32x1xf32>
    %cst_17 = arith.constant 3.906250e-03 : f32
    %26 = vector.broadcast %cst_17 : f32 to vector<32x1xf32>
    %27 = arith.mulf %25, %26 : vector<32x1xf32>
    %28 = vector.broadcast %27 : vector<32x1xf32> to vector<32x256xf32>
    %29 = arith.subf %23, %28 : vector<32x256xf32>
    %30 = vector.broadcast %6 : vector<1x256xf32> to vector<32x256xf32>
    %31 = arith.mulf %29, %30 : vector<32x256xf32>
    %32 = arith.mulf %31, %31 : vector<32x256xf32>
    %cst_18 = arith.constant dense<0.000000e+00> : vector<32xf32>
    %33 = vector.multi_reduction <add>, %32, %cst_18 [1] : vector<32x256xf32> to vector<32xf32>
    %34 = vector.shape_cast %33 : vector<32xf32> to vector<32x1xf32>
    %cst_19 = arith.constant 3.906250e-03 : f32
    %35 = vector.broadcast %cst_19 : f32 to vector<32x1xf32>
    %36 = arith.mulf %34, %35 : vector<32x1xf32>
    %cst_20 = arith.constant 9.99999974E-6 : f32
    %37 = vector.broadcast %cst_20 : f32 to vector<32x1xf32>
    %38 = arith.addf %36, %37 : vector<32x1xf32>
    %39 = math.rsqrt %38 : vector<32x1xf32>
    %40 = vector.broadcast %39 : vector<32x1xf32> to vector<32x256xf32>
    %41 = arith.mulf %31, %40 : vector<32x256xf32>
    %42 = vector.broadcast %4 : vector<32x1xf32> to vector<32x256xf32>
    %43 = arith.mulf %41, %42 : vector<32x256xf32>
    %44 = vector.broadcast %5 : vector<32x1xf32> to vector<32x256xf32>
    %45 = arith.addf %43, %44 : vector<32x256xf32>
    %c17_i32 = arith.constant 17 : i32
    %46 = tpu.dynamic_rotate %0 by %c17_i32 dim 1 : vector<32x256xf32>, i32 -> vector<32x256xf32>
    %c0_21 = arith.constant 0 : index
    %c0_22 = arith.constant 0 : index
    %47 = vector.load %arg5[%c0_21, %c0_22] : memref<9x256xf32, #tpu.memory_space<vmem>>, vector<1x256xf32>
    %48 = vector.broadcast %47 : vector<1x256xf32> to vector<32x256xf32>
    %49 = arith.mulf %46, %48 : vector<32x256xf32>
    %c0_23 = arith.constant 0 : index
    %c0_24 = arith.constant 0 : index
    %c0_25 = arith.constant 0 : index
    %50 = vector.load %arg7[%c0_23, %c0_24, %c0_25] : memref<9x32x32xf32, #tpu.memory_space<vmem>>, vector<1x32x32xf32>
    %51 = vector.shape_cast %50 : vector<1x32x32xf32> to vector<32x32xf32>
    %cst_26 = arith.constant dense<0.000000e+00> : vector<32x256xf32>
    %52 = tpu.matmul %51, %49, %cst_26 {dimension_numbers = #tpu.dot_dimension_numbers<[1], [0], [0], [1], [0, 0, 1, 1], [], []>} : vector<32x32xf32>, vector<32x256xf32>, vector<32x256xf32> -> vector<32x256xf32>
    %c16_i32 = arith.constant 16 : i32
    %53 = tpu.dynamic_rotate %0 by %c16_i32 dim 1 : vector<32x256xf32>, i32 -> vector<32x256xf32>
    %c1 = arith.constant 1 : index
    %c0_27 = arith.constant 0 : index
    %54 = vector.load %arg5[%c1, %c0_27] : memref<9x256xf32, #tpu.memory_space<vmem>>, vector<1x256xf32>
    %55 = vector.broadcast %54 : vector<1x256xf32> to vector<32x256xf32>
    %56 = arith.mulf %53, %55 : vector<32x256xf32>
    %c1_28 = arith.constant 1 : index
    %c0_29 = arith.constant 0 : index
    %c0_30 = arith.constant 0 : index
    %57 = vector.load %arg7[%c1_28, %c0_29, %c0_30] : memref<9x32x32xf32, #tpu.memory_space<vmem>>, vector<1x32x32xf32>
    %58 = vector.shape_cast %57 : vector<1x32x32xf32> to vector<32x32xf32>
    %cst_31 = arith.constant dense<0.000000e+00> : vector<32x256xf32>
    %59 = tpu.matmul %58, %56, %cst_31 {dimension_numbers = #tpu.dot_dimension_numbers<[1], [0], [0], [1], [0, 0, 1, 1], [], []>} : vector<32x32xf32>, vector<32x256xf32>, vector<32x256xf32> -> vector<32x256xf32>
    %60 = arith.addf %52, %59 : vector<32x256xf32>
    %c15_i32 = arith.constant 15 : i32
    %61 = tpu.dynamic_rotate %0 by %c15_i32 dim 1 : vector<32x256xf32>, i32 -> vector<32x256xf32>
    %c2 = arith.constant 2 : index
    %c0_32 = arith.constant 0 : index
    %62 = vector.load %arg5[%c2, %c0_32] : memref<9x256xf32, #tpu.memory_space<vmem>>, vector<1x256xf32>
    %63 = vector.broadcast %62 : vector<1x256xf32> to vector<32x256xf32>
    %64 = arith.mulf %61, %63 : vector<32x256xf32>
    %c2_33 = arith.constant 2 : index
    %c0_34 = arith.constant 0 : index
    %c0_35 = arith.constant 0 : index
    %65 = vector.load %arg7[%c2_33, %c0_34, %c0_35] : memref<9x32x32xf32, #tpu.memory_space<vmem>>, vector<1x32x32xf32>
    %66 = vector.shape_cast %65 : vector<1x32x32xf32> to vector<32x32xf32>
    %cst_36 = arith.constant dense<0.000000e+00> : vector<32x256xf32>
    %67 = tpu.matmul %66, %64, %cst_36 {dimension_numbers = #tpu.dot_dimension_numbers<[1], [0], [0], [1], [0, 0, 1, 1], [], []>} : vector<32x32xf32>, vector<32x256xf32>, vector<32x256xf32> -> vector<32x256xf32>
    %68 = arith.addf %60, %67 : vector<32x256xf32>
    %c1_i32 = arith.constant 1 : i32
    %69 = tpu.dynamic_rotate %0 by %c1_i32 dim 1 : vector<32x256xf32>, i32 -> vector<32x256xf32>
    %c3 = arith.constant 3 : index
    %c0_37 = arith.constant 0 : index
    %70 = vector.load %arg5[%c3, %c0_37] : memref<9x256xf32, #tpu.memory_space<vmem>>, vector<1x256xf32>
    %71 = vector.broadcast %70 : vector<1x256xf32> to vector<32x256xf32>
    %72 = arith.mulf %69, %71 : vector<32x256xf32>
    %c3_38 = arith.constant 3 : index
    %c0_39 = arith.constant 0 : index
    %c0_40 = arith.constant 0 : index
    %73 = vector.load %arg7[%c3_38, %c0_39, %c0_40] : memref<9x32x32xf32, #tpu.memory_space<vmem>>, vector<1x32x32xf32>
    %74 = vector.shape_cast %73 : vector<1x32x32xf32> to vector<32x32xf32>
    %cst_41 = arith.constant dense<0.000000e+00> : vector<32x256xf32>
    %75 = tpu.matmul %74, %72, %cst_41 {dimension_numbers = #tpu.dot_dimension_numbers<[1], [0], [0], [1], [0, 0, 1, 1], [], []>} : vector<32x32xf32>, vector<32x256xf32>, vector<32x256xf32> -> vector<32x256xf32>
    %76 = arith.addf %68, %75 : vector<32x256xf32>
    %c4_42 = arith.constant 4 : index
    %c0_43 = arith.constant 0 : index
    %77 = vector.load %arg5[%c4_42, %c0_43] : memref<9x256xf32, #tpu.memory_space<vmem>>, vector<1x256xf32>
    %78 = vector.broadcast %77 : vector<1x256xf32> to vector<32x256xf32>
    %79 = arith.mulf %0, %78 : vector<32x256xf32>
    %c4_44 = arith.constant 4 : index
    %c0_45 = arith.constant 0 : index
    %c0_46 = arith.constant 0 : index
    %80 = vector.load %arg7[%c4_44, %c0_45, %c0_46] : memref<9x32x32xf32, #tpu.memory_space<vmem>>, vector<1x32x32xf32>
    %81 = vector.shape_cast %80 : vector<1x32x32xf32> to vector<32x32xf32>
    %cst_47 = arith.constant dense<0.000000e+00> : vector<32x256xf32>
    %82 = tpu.matmul %81, %79, %cst_47 {dimension_numbers = #tpu.dot_dimension_numbers<[1], [0], [0], [1], [0, 0, 1, 1], [], []>} : vector<32x32xf32>, vector<32x256xf32>, vector<32x256xf32> -> vector<32x256xf32>
    %83 = arith.addf %76, %82 : vector<32x256xf32>
    %c255_i32 = arith.constant 255 : i32
    %84 = tpu.dynamic_rotate %0 by %c255_i32 dim 1 : vector<32x256xf32>, i32 -> vector<32x256xf32>
    %c5 = arith.constant 5 : index
    %c0_48 = arith.constant 0 : index
    %85 = vector.load %arg5[%c5, %c0_48] : memref<9x256xf32, #tpu.memory_space<vmem>>, vector<1x256xf32>
    %86 = vector.broadcast %85 : vector<1x256xf32> to vector<32x256xf32>
    %87 = arith.mulf %84, %86 : vector<32x256xf32>
    %c5_49 = arith.constant 5 : index
    %c0_50 = arith.constant 0 : index
    %c0_51 = arith.constant 0 : index
    %88 = vector.load %arg7[%c5_49, %c0_50, %c0_51] : memref<9x32x32xf32, #tpu.memory_space<vmem>>, vector<1x32x32xf32>
    %89 = vector.shape_cast %88 : vector<1x32x32xf32> to vector<32x32xf32>
    %cst_52 = arith.constant dense<0.000000e+00> : vector<32x256xf32>
    %90 = tpu.matmul %89, %87, %cst_52 {dimension_numbers = #tpu.dot_dimension_numbers<[1], [0], [0], [1], [0, 0, 1, 1], [], []>} : vector<32x32xf32>, vector<32x256xf32>, vector<32x256xf32> -> vector<32x256xf32>
    %91 = arith.addf %83, %90 : vector<32x256xf32>
    %c241_i32 = arith.constant 241 : i32
    %92 = tpu.dynamic_rotate %0 by %c241_i32 dim 1 : vector<32x256xf32>, i32 -> vector<32x256xf32>
    %c6 = arith.constant 6 : index
    %c0_53 = arith.constant 0 : index
    %93 = vector.load %arg5[%c6, %c0_53] : memref<9x256xf32, #tpu.memory_space<vmem>>, vector<1x256xf32>
    %94 = vector.broadcast %93 : vector<1x256xf32> to vector<32x256xf32>
    %95 = arith.mulf %92, %94 : vector<32x256xf32>
    %c6_54 = arith.constant 6 : index
    %c0_55 = arith.constant 0 : index
    %c0_56 = arith.constant 0 : index
    %96 = vector.load %arg7[%c6_54, %c0_55, %c0_56] : memref<9x32x32xf32, #tpu.memory_space<vmem>>, vector<1x32x32xf32>
    %97 = vector.shape_cast %96 : vector<1x32x32xf32> to vector<32x32xf32>
    %cst_57 = arith.constant dense<0.000000e+00> : vector<32x256xf32>
    %98 = tpu.matmul %97, %95, %cst_57 {dimension_numbers = #tpu.dot_dimension_numbers<[1], [0], [0], [1], [0, 0, 1, 1], [], []>} : vector<32x32xf32>, vector<32x256xf32>, vector<32x256xf32> -> vector<32x256xf32>
    %99 = arith.addf %91, %98 : vector<32x256xf32>
    %c240_i32 = arith.constant 240 : i32
    %100 = tpu.dynamic_rotate %0 by %c240_i32 dim 1 : vector<32x256xf32>, i32 -> vector<32x256xf32>
    %c7 = arith.constant 7 : index
    %c0_58 = arith.constant 0 : index
    %101 = vector.load %arg5[%c7, %c0_58] : memref<9x256xf32, #tpu.memory_space<vmem>>, vector<1x256xf32>
    %102 = vector.broadcast %101 : vector<1x256xf32> to vector<32x256xf32>
    %103 = arith.mulf %100, %102 : vector<32x256xf32>
    %c7_59 = arith.constant 7 : index
    %c0_60 = arith.constant 0 : index
    %c0_61 = arith.constant 0 : index
    %104 = vector.load %arg7[%c7_59, %c0_60, %c0_61] : memref<9x32x32xf32, #tpu.memory_space<vmem>>, vector<1x32x32xf32>
    %105 = vector.shape_cast %104 : vector<1x32x32xf32> to vector<32x32xf32>
    %cst_62 = arith.constant dense<0.000000e+00> : vector<32x256xf32>
    %106 = tpu.matmul %105, %103, %cst_62 {dimension_numbers = #tpu.dot_dimension_numbers<[1], [0], [0], [1], [0, 0, 1, 1], [], []>} : vector<32x32xf32>, vector<32x256xf32>, vector<32x256xf32> -> vector<32x256xf32>
    %107 = arith.addf %99, %106 : vector<32x256xf32>
    %c239_i32 = arith.constant 239 : i32
    %108 = tpu.dynamic_rotate %0 by %c239_i32 dim 1 : vector<32x256xf32>, i32 -> vector<32x256xf32>
    %c8 = arith.constant 8 : index
    %c0_63 = arith.constant 0 : index
    %109 = vector.load %arg5[%c8, %c0_63] : memref<9x256xf32, #tpu.memory_space<vmem>>, vector<1x256xf32>
    %110 = vector.broadcast %109 : vector<1x256xf32> to vector<32x256xf32>
    %111 = arith.mulf %108, %110 : vector<32x256xf32>
    %c8_64 = arith.constant 8 : index
    %c0_65 = arith.constant 0 : index
    %c0_66 = arith.constant 0 : index
    %112 = vector.load %arg7[%c8_64, %c0_65, %c0_66] : memref<9x32x32xf32, #tpu.memory_space<vmem>>, vector<1x32x32xf32>
    %113 = vector.shape_cast %112 : vector<1x32x32xf32> to vector<32x32xf32>
    %cst_67 = arith.constant dense<0.000000e+00> : vector<32x256xf32>
    %114 = tpu.matmul %113, %111, %cst_67 {dimension_numbers = #tpu.dot_dimension_numbers<[1], [0], [0], [1], [0, 0, 1, 1], [], []>} : vector<32x32xf32>, vector<32x256xf32>, vector<32x256xf32> -> vector<32x256xf32>
    %115 = arith.addf %107, %114 : vector<32x256xf32>
    %116 = vector.broadcast %3 : vector<32x1xf32> to vector<32x256xf32>
    %117 = arith.addf %115, %116 : vector<32x256xf32>
    %c0_68 = arith.constant 0 : index
    %c0_69 = arith.constant 0 : index
    %118 = vector.load %arg10[%c0_68, %c0_69] : memref<8x32xf32, #tpu.memory_space<vmem>>, vector<8x32xf32>
    %c0_70 = arith.constant 0 : index
    %c0_71 = arith.constant 0 : index
    %119 = vector.load %arg11[%c0_70, %c0_71] : memref<32x8xf32, #tpu.memory_space<vmem>>, vector<32x8xf32>
    %120 = vector.broadcast %6 : vector<1x256xf32> to vector<32x256xf32>
    %121 = arith.mulf %45, %120 : vector<32x256xf32>
    %cst_72 = arith.constant dense<0.000000e+00> : vector<32xf32>
    %122 = vector.multi_reduction <add>, %121, %cst_72 [1] : vector<32x256xf32> to vector<32xf32>
    %123 = vector.shape_cast %122 : vector<32xf32> to vector<32x1xf32>
    %cst_73 = arith.constant 3.906250e-03 : f32
    %124 = vector.broadcast %cst_73 : f32 to vector<32x1xf32>
    %125 = arith.mulf %123, %124 : vector<32x1xf32>
    %126 = vector.broadcast %6 : vector<1x256xf32> to vector<32x256xf32>
    %127 = arith.mulf %117, %126 : vector<32x256xf32>
    %cst_74 = arith.constant dense<0.000000e+00> : vector<32xf32>
    %128 = vector.multi_reduction <add>, %127, %cst_74 [1] : vector<32x256xf32> to vector<32xf32>
    %129 = vector.shape_cast %128 : vector<32xf32> to vector<32x1xf32>
    %cst_75 = arith.constant 3.906250e-03 : f32
    %130 = vector.broadcast %cst_75 : f32 to vector<32x1xf32>
    %131 = arith.mulf %129, %130 : vector<32x1xf32>
    %c0_76 = arith.constant 0 : index
    %c0_77 = arith.constant 0 : index
    %c0_78 = arith.constant 0 : index
    %132 = vector.load %arg9[%c0_76, %c0_77, %c0_78] : memref<4x8x32xf32, #tpu.memory_space<vmem>>, vector<1x8x32xf32>
    %133 = vector.shape_cast %132 : vector<1x8x32xf32> to vector<8x32xf32>
    %cst_79 = arith.constant dense<0.000000e+00> : vector<8x1xf32>
    %134 = tpu.matmul %133, %125, %cst_79 {dimension_numbers = #tpu.dot_dimension_numbers<[1], [0], [0], [1], [0, 0, 1, 1], [], []>} : vector<8x32xf32>, vector<32x1xf32>, vector<8x1xf32> -> vector<8x1xf32>
    %c1_80 = arith.constant 1 : index
    %c0_81 = arith.constant 0 : index
    %c0_82 = arith.constant 0 : index
    %135 = vector.load %arg9[%c1_80, %c0_81, %c0_82] : memref<4x8x32xf32, #tpu.memory_space<vmem>>, vector<1x8x32xf32>
    %136 = vector.shape_cast %135 : vector<1x8x32xf32> to vector<8x32xf32>
    %cst_83 = arith.constant dense<0.000000e+00> : vector<8x1xf32>
    %137 = tpu.matmul %136, %125, %cst_83 {dimension_numbers = #tpu.dot_dimension_numbers<[1], [0], [0], [1], [0, 0, 1, 1], [], []>} : vector<8x32xf32>, vector<32x1xf32>, vector<8x1xf32> -> vector<8x1xf32>
    %138 = arith.maximumf %134, %137 : vector<8x1xf32>
    %c2_84 = arith.constant 2 : index
    %c0_85 = arith.constant 0 : index
    %c0_86 = arith.constant 0 : index
    %139 = vector.load %arg9[%c2_84, %c0_85, %c0_86] : memref<4x8x32xf32, #tpu.memory_space<vmem>>, vector<1x8x32xf32>
    %140 = vector.shape_cast %139 : vector<1x8x32xf32> to vector<8x32xf32>
    %cst_87 = arith.constant dense<0.000000e+00> : vector<8x1xf32>
    %141 = tpu.matmul %140, %125, %cst_87 {dimension_numbers = #tpu.dot_dimension_numbers<[1], [0], [0], [1], [0, 0, 1, 1], [], []>} : vector<8x32xf32>, vector<32x1xf32>, vector<8x1xf32> -> vector<8x1xf32>
    %142 = arith.maximumf %138, %141 : vector<8x1xf32>
    %c3_88 = arith.constant 3 : index
    %c0_89 = arith.constant 0 : index
    %c0_90 = arith.constant 0 : index
    %143 = vector.load %arg9[%c3_88, %c0_89, %c0_90] : memref<4x8x32xf32, #tpu.memory_space<vmem>>, vector<1x8x32xf32>
    %144 = vector.shape_cast %143 : vector<1x8x32xf32> to vector<8x32xf32>
    %cst_91 = arith.constant dense<0.000000e+00> : vector<8x1xf32>
    %145 = tpu.matmul %144, %125, %cst_91 {dimension_numbers = #tpu.dot_dimension_numbers<[1], [0], [0], [1], [0, 0, 1, 1], [], []>} : vector<8x32xf32>, vector<32x1xf32>, vector<8x1xf32> -> vector<8x1xf32>
    %146 = arith.maximumf %142, %145 : vector<8x1xf32>
    %cst_92 = arith.constant dense<0.000000e+00> : vector<32x1xf32>
    %147 = tpu.matmul %119, %146, %cst_92 {dimension_numbers = #tpu.dot_dimension_numbers<[1], [0], [0], [1], [0, 0, 1, 1], [], []>} : vector<32x8xf32>, vector<8x1xf32>, vector<32x1xf32> -> vector<32x1xf32>
    %148 = arith.subf %125, %147 : vector<32x1xf32>
    %149 = math.exp %148 : vector<32x1xf32>
    %c0_93 = arith.constant 0 : index
    %c0_94 = arith.constant 0 : index
    %c0_95 = arith.constant 0 : index
    %150 = vector.load %arg9[%c0_93, %c0_94, %c0_95] : memref<4x8x32xf32, #tpu.memory_space<vmem>>, vector<1x8x32xf32>
    %151 = vector.shape_cast %150 : vector<1x8x32xf32> to vector<8x32xf32>
    %cst_96 = arith.constant dense<0.000000e+00> : vector<8x1xf32>
    %152 = tpu.matmul %151, %131, %cst_96 {dimension_numbers = #tpu.dot_dimension_numbers<[1], [0], [0], [1], [0, 0, 1, 1], [], []>} : vector<8x32xf32>, vector<32x1xf32>, vector<8x1xf32> -> vector<8x1xf32>
    %c1_97 = arith.constant 1 : index
    %c0_98 = arith.constant 0 : index
    %c0_99 = arith.constant 0 : index
    %153 = vector.load %arg9[%c1_97, %c0_98, %c0_99] : memref<4x8x32xf32, #tpu.memory_space<vmem>>, vector<1x8x32xf32>
    %154 = vector.shape_cast %153 : vector<1x8x32xf32> to vector<8x32xf32>
    %cst_100 = arith.constant dense<0.000000e+00> : vector<8x1xf32>
    %155 = tpu.matmul %154, %131, %cst_100 {dimension_numbers = #tpu.dot_dimension_numbers<[1], [0], [0], [1], [0, 0, 1, 1], [], []>} : vector<8x32xf32>, vector<32x1xf32>, vector<8x1xf32> -> vector<8x1xf32>
    %156 = arith.maximumf %152, %155 : vector<8x1xf32>
    %c2_101 = arith.constant 2 : index
    %c0_102 = arith.constant 0 : index
    %c0_103 = arith.constant 0 : index
    %157 = vector.load %arg9[%c2_101, %c0_102, %c0_103] : memref<4x8x32xf32, #tpu.memory_space<vmem>>, vector<1x8x32xf32>
    %158 = vector.shape_cast %157 : vector<1x8x32xf32> to vector<8x32xf32>
    %cst_104 = arith.constant dense<0.000000e+00> : vector<8x1xf32>
    %159 = tpu.matmul %158, %131, %cst_104 {dimension_numbers = #tpu.dot_dimension_numbers<[1], [0], [0], [1], [0, 0, 1, 1], [], []>} : vector<8x32xf32>, vector<32x1xf32>, vector<8x1xf32> -> vector<8x1xf32>
    %160 = arith.maximumf %156, %159 : vector<8x1xf32>
    %c3_105 = arith.constant 3 : index
    %c0_106 = arith.constant 0 : index
    %c0_107 = arith.constant 0 : index
    %161 = vector.load %arg9[%c3_105, %c0_106, %c0_107] : memref<4x8x32xf32, #tpu.memory_space<vmem>>, vector<1x8x32xf32>
    %162 = vector.shape_cast %161 : vector<1x8x32xf32> to vector<8x32xf32>
    %cst_108 = arith.constant dense<0.000000e+00> : vector<8x1xf32>
    %163 = tpu.matmul %162, %131, %cst_108 {dimension_numbers = #tpu.dot_dimension_numbers<[1], [0], [0], [1], [0, 0, 1, 1], [], []>} : vector<8x32xf32>, vector<32x1xf32>, vector<8x1xf32> -> vector<8x1xf32>
    %164 = arith.maximumf %160, %163 : vector<8x1xf32>
    %cst_109 = arith.constant dense<0.000000e+00> : vector<32x1xf32>
    %165 = tpu.matmul %119, %164, %cst_109 {dimension_numbers = #tpu.dot_dimension_numbers<[1], [0], [0], [1], [0, 0, 1, 1], [], []>} : vector<32x8xf32>, vector<8x1xf32>, vector<32x1xf32> -> vector<32x1xf32>
    %166 = arith.subf %131, %165 : vector<32x1xf32>
    %167 = math.exp %166 : vector<32x1xf32>
    %168 = vector.broadcast %149 : vector<32x1xf32> to vector<32x256xf32>
    %169 = arith.mulf %168, %117 : vector<32x256xf32>
    %cst_110 = arith.constant dense<0.000000e+00> : vector<8x256xf32>
    %170 = tpu.matmul %118, %169, %cst_110 {dimension_numbers = #tpu.dot_dimension_numbers<[1], [0], [0], [1], [0, 0, 1, 1], [], []>} : vector<8x32xf32>, vector<32x256xf32>, vector<8x256xf32> -> vector<8x256xf32>
    %171 = vector.broadcast %167 : vector<32x1xf32> to vector<32x256xf32>
    %172 = arith.mulf %171, %45 : vector<32x256xf32>
    %cst_111 = arith.constant dense<0.000000e+00> : vector<8x256xf32>
    %173 = tpu.matmul %118, %172, %cst_111 {dimension_numbers = #tpu.dot_dimension_numbers<[1], [0], [0], [1], [0, 0, 1, 1], [], []>} : vector<8x32xf32>, vector<32x256xf32>, vector<8x256xf32> -> vector<8x256xf32>
    %cst_112 = arith.constant dense<0.000000e+00> : vector<8x1xf32>
    %174 = tpu.matmul %118, %149, %cst_112 {dimension_numbers = #tpu.dot_dimension_numbers<[1], [0], [0], [1], [0, 0, 1, 1], [], []>} : vector<8x32xf32>, vector<32x1xf32>, vector<8x1xf32> -> vector<8x1xf32>
    %cst_113 = arith.constant dense<0.000000e+00> : vector<8x1xf32>
    %175 = tpu.matmul %118, %167, %cst_113 {dimension_numbers = #tpu.dot_dimension_numbers<[1], [0], [0], [1], [0, 0, 1, 1], [], []>} : vector<8x32xf32>, vector<32x1xf32>, vector<8x1xf32> -> vector<8x1xf32>
    %176 = vector.broadcast %174 : vector<8x1xf32> to vector<8x256xf32>
    %177 = arith.divf %170, %176 : vector<8x256xf32>
    %178 = vector.broadcast %175 : vector<8x1xf32> to vector<8x256xf32>
    %179 = arith.divf %173, %178 : vector<8x256xf32>
    %180 = arith.addf %177, %179 : vector<8x256xf32>
    %181 = arith.negf %180 : vector<8x256xf32>
    %182 = math.exp %181 : vector<8x256xf32>
    %cst_114 = arith.constant 1.000000e+00 : f32
    %183 = vector.broadcast %cst_114 : f32 to vector<8x256xf32>
    %184 = arith.addf %183, %182 : vector<8x256xf32>
    %185 = arith.divf %183, %184 : vector<8x256xf32>
    %cst_115 = arith.constant dense<0.000000e+00> : vector<32x256xf32>
    %186 = tpu.matmul %119, %185, %cst_115 {dimension_numbers = #tpu.dot_dimension_numbers<[1], [0], [0], [1], [0, 0, 1, 1], [], []>} : vector<32x8xf32>, vector<8x256xf32>, vector<32x256xf32> -> vector<32x256xf32>
    %187 = arith.mulf %0, %186 : vector<32x256xf32>
    %c0_116 = arith.constant 0 : index
    %c0_117 = arith.constant 0 : index
    %188 = vector.load %arg12[%c0_116, %c0_117] : memref<32x256xf32, #tpu.memory_space<vmem>>, vector<32x256xf32>
    tpu.vector_store %arg12[%c0_116, %c0_117], %187 {strides = array<i32>} : memref<32x256xf32, #tpu.memory_space<vmem>>, vector<32x256xf32>,
    return
  }
  func.func @transform_0(%arg0: i32) -> (i32, i32) {
    %c0_i32 = arith.constant 0 : i32
    %c0_i32_0 = arith.constant 0 : i32
    return %arg0, %c0_i32 : i32, i32
  }
  func.func @transform_1(%arg0: i32) -> (i32, i32) {
    %c0_i32 = arith.constant 0 : i32
    %c0_i32_0 = arith.constant 0 : i32
    %c0_i32_1 = arith.constant 0 : i32
    return %c0_i32, %c0_i32_0 : i32, i32
  }
  func.func @transform_2(%arg0: i32) -> (i32, i32) {
    %c0_i32 = arith.constant 0 : i32
    %c0_i32_0 = arith.constant 0 : i32
    %c0_i32_1 = arith.constant 0 : i32
    return %c0_i32, %c0_i32_0 : i32, i32
  }
  func.func @transform_3(%arg0: i32) -> (i32, i32) {
    %c0_i32 = arith.constant 0 : i32
    %c0_i32_0 = arith.constant 0 : i32
    %c0_i32_1 = arith.constant 0 : i32
    return %c0_i32, %c0_i32_0 : i32, i32
  }
  func.func @transform_4(%arg0: i32) -> (i32, i32) {
    %c0_i32 = arith.constant 0 : i32
    %c0_i32_0 = arith.constant 0 : i32
    %c0_i32_1 = arith.constant 0 : i32
    return %c0_i32, %c0_i32_0 : i32, i32
  }
  func.func @transform_5(%arg0: i32) -> (i32, i32) {
    %c0_i32 = arith.constant 0 : i32
    %c0_i32_0 = arith.constant 0 : i32
    %c0_i32_1 = arith.constant 0 : i32
    return %c0_i32, %c0_i32_0 : i32, i32
  }
  func.func @transform_6(%arg0: i32) -> (i32, i32, i32) {
    %c0_i32 = arith.constant 0 : i32
    %c0_i32_0 = arith.constant 0 : i32
    %c0_i32_1 = arith.constant 0 : i32
    %c0_i32_2 = arith.constant 0 : i32
    return %c0_i32, %c0_i32_0, %c0_i32_1 : i32, i32, i32
  }
  func.func @transform_7(%arg0: i32) -> (i32, i32) {
    %c0_i32 = arith.constant 0 : i32
    %c0_i32_0 = arith.constant 0 : i32
    %c0_i32_1 = arith.constant 0 : i32
    return %c0_i32, %c0_i32_0 : i32, i32
  }
  func.func @transform_8(%arg0: i32) -> (i32, i32, i32) {
    %c0_i32 = arith.constant 0 : i32
    %c0_i32_0 = arith.constant 0 : i32
    %c0_i32_1 = arith.constant 0 : i32
    %c0_i32_2 = arith.constant 0 : i32
    return %c0_i32, %c0_i32_0, %c0_i32_1 : i32, i32, i32
  }
  func.func @transform_9(%arg0: i32) -> (i32, i32) {
    %c0_i32 = arith.constant 0 : i32
    %c0_i32_0 = arith.constant 0 : i32
    %c0_i32_1 = arith.constant 0 : i32
    return %c0_i32, %c0_i32_0 : i32, i32
  }
  func.func @transform_10(%arg0: i32) -> (i32, i32) {
    %c0_i32 = arith.constant 0 : i32
    %c0_i32_0 = arith.constant 0 : i32
    %c0_i32_1 = arith.constant 0 : i32
    return %c0_i32, %c0_i32_0 : i32, i32
  }
  func.func @transform_11(%arg0: i32) -> (i32, i32) {
    %c0_i32 = arith.constant 0 : i32
    %c0_i32_0 = arith.constant 0 : i32
    return %arg0, %c0_i32 : i32, i32
  }
}

module attributes {stable_mosaic.version = 11 : i64} {
  func.func @ema_kernel(%arg0: i32, %arg1: memref<32x256xf32, #tpu.memory_space<vmem>>, %arg2: memref<256x32xf32, #tpu.memory_space<vmem>>, %arg3: memref<32x256xf32, #tpu.memory_space<vmem>>, %arg4: memref<32x256xf32, #tpu.memory_space<vmem>>, %arg5: memref<9x256xf32, #tpu.memory_space<vmem>>, %arg6: memref<32x32xf32, #tpu.memory_space<vmem>>, %arg7: memref<9x32x32xf32, #tpu.memory_space<vmem>>, %arg8: memref<32x8xf32, #tpu.memory_space<vmem>>, %arg9: memref<4x8x32xf32, #tpu.memory_space<vmem>>, %arg10: memref<8x32xf32, #tpu.memory_space<vmem>>, %arg11: memref<32x8xf32, #tpu.memory_space<vmem>>, %arg12: memref<32x256xf32, #tpu.memory_space<vmem>>) attributes {dimension_semantics = [#tpu.dimension_semantics<parallel>], iteration_bounds = array<i64: 1>, scalar_prefetch = 0 : i64, scratch_operands = 0 : i64, tpu.core_type = #tpu.core_type<tc>, window_params = [{transform_indices = @transform_0, window_bounds = array<i64: 32, 256>}, {pipeline_mode = #tpu.pipeline_mode<synchronous>, transform_indices = @transform_1, window_bounds = array<i64: 256, 32>}, {pipeline_mode = #tpu.pipeline_mode<synchronous>, transform_indices = @transform_2, window_bounds = array<i64: 32, 256>}, {pipeline_mode = #tpu.pipeline_mode<synchronous>, transform_indices = @transform_3, window_bounds = array<i64: 32, 256>}, {pipeline_mode = #tpu.pipeline_mode<synchronous>, transform_indices = @transform_4, window_bounds = array<i64: 9, 256>}, {pipeline_mode = #tpu.pipeline_mode<synchronous>, transform_indices = @transform_5, window_bounds = array<i64: 32, 32>}, {pipeline_mode = #tpu.pipeline_mode<synchronous>, transform_indices = @transform_6, window_bounds = array<i64: 9, 32, 32>}, {pipeline_mode = #tpu.pipeline_mode<synchronous>, transform_indices = @transform_7, window_bounds = array<i64: 32, 8>}, {pipeline_mode = #tpu.pipeline_mode<synchronous>, transform_indices = @transform_8, window_bounds = array<i64: 4, 8, 32>}, {pipeline_mode = #tpu.pipeline_mode<synchronous>, transform_indices = @transform_9, window_bounds = array<i64: 8, 32>}, {pipeline_mode = #tpu.pipeline_mode<synchronous>, transform_indices = @transform_10, window_bounds = array<i64: 32, 8>}, {transform_indices = @transform_11, window_bounds = array<i64: 32, 256>}]} {
    %c0 = arith.constant 0 : index
    %c0_0 = arith.constant 0 : index
    %0 = vector.load %arg1[%c0, %c0_0] : memref<32x256xf32, #tpu.memory_space<vmem>>, vector<32x256xf32>
    %c0_1 = arith.constant 0 : index
    %c0_2 = arith.constant 0 : index
    %1 = vector.load %arg8[%c0_1, %c0_2] : memref<32x8xf32, #tpu.memory_space<vmem>>, vector<32x8xf32>
    %2 = vector.extract_strided_slice %1 {offsets = [0, 0], sizes = [32, 1], strides = [1, 1]} : vector<32x8xf32> to vector<32x1xf32>
    %3 = vector.extract_strided_slice %1 {offsets = [0, 1], sizes = [32, 1], strides = [1, 1]} : vector<32x8xf32> to vector<32x1xf32>
    %4 = vector.extract_strided_slice %1 {offsets = [0, 2], sizes = [32, 1], strides = [1, 1]} : vector<32x8xf32> to vector<32x1xf32>
    %5 = vector.extract_strided_slice %1 {offsets = [0, 3], sizes = [32, 1], strides = [1, 1]} : vector<32x8xf32> to vector<32x1xf32>
    %c4 = arith.constant 4 : index
    %c0_3 = arith.constant 0 : index
    %6 = vector.load %arg5[%c4, %c0_3] : memref<9x256xf32, #tpu.memory_space<vmem>>, vector<1x256xf32>
    %c0_4 = arith.constant 0 : index
    %c0_5 = arith.constant 0 : index
    %7 = vector.load %arg2[%c0_4, %c0_5] : memref<256x32xf32, #tpu.memory_space<vmem>>, vector<256x32xf32>
    %cst = arith.constant dense<0.000000e+00> : vector<32x32xf32>
    %8 = tpu.matmul %0, %7, %cst {dimension_numbers = #tpu.dot_dimension_numbers<[1], [0], [0], [1], [0, 0, 1, 1], [], []>} : vector<32x256xf32>, vector<256x32xf32>, vector<32x32xf32> -> vector<32x32xf32>
    %c0_6 = arith.constant 0 : index
    %c0_7 = arith.constant 0 : index
    %9 = vector.load %arg6[%c0_6, %c0_7] : memref<32x32xf32, #tpu.memory_space<vmem>>, vector<32x32xf32>
    %cst_8 = arith.constant dense<0.000000e+00> : vector<32x32xf32>
    %10 = tpu.matmul %9, %8, %cst_8 {dimension_numbers = #tpu.dot_dimension_numbers<[1], [0], [0], [1], [0, 0, 1, 1], [], []>} : vector<32x32xf32>, vector<32x32xf32>, vector<32x32xf32> -> vector<32x32xf32>
    %11 = vector.broadcast %2 : vector<32x1xf32> to vector<32x32xf32>
    %12 = arith.addf %10, %11 : vector<32x32xf32>
    %13 = arith.negf %12 : vector<32x32xf32>
    %14 = math.exp %13 : vector<32x32xf32>
    %cst_9 = arith.constant 1.000000e+00 : f32
    %15 = vector.broadcast %cst_9 : f32 to vector<32x32xf32>
    %16 = arith.addf %15, %14 : vector<32x32xf32>
    %17 = arith.divf %15, %16 : vector<32x32xf32>
    %c0_10 = arith.constant 0 : index
    %c0_11 = arith.constant 0 : index
    %18 = vector.load %arg3[%c0_10, %c0_11] : memref<32x256xf32, #tpu.memory_space<vmem>>, vector<32x256xf32>
    %cst_12 = arith.constant dense<0.000000e+00> : vector<32x256xf32>
    %19 = tpu.matmul %17, %18, %cst_12 {dimension_numbers = #tpu.dot_dimension_numbers<[1], [0], [0], [1], [0, 0, 1, 1], [], []>} : vector<32x32xf32>, vector<32x256xf32>, vector<32x256xf32> -> vector<32x256xf32>
    %c0_13 = arith.constant 0 : index
    %c0_14 = arith.constant 0 : index
    %20 = vector.load %arg4[%c0_13, %c0_14] : memref<32x256xf32, #tpu.memory_space<vmem>>, vector<32x256xf32>
    %cst_15 = arith.constant dense<0.000000e+00> : vector<32x256xf32>
    %21 = tpu.matmul %17, %20, %cst_15 {dimension_numbers = #tpu.dot_dimension_numbers<[1], [0], [0], [1], [0, 0, 1, 1], [], []>} : vector<32x32xf32>, vector<32x256xf32>, vector<32x256xf32> -> vector<32x256xf32>
    %22 = arith.mulf %19, %21 : vector<32x256xf32>
    %23 = arith.mulf %0, %22 : vector<32x256xf32>
    %cst_16 = arith.constant dense<0.000000e+00> : vector<32xf32>
    %24 = vector.multi_reduction <add>, %23, %cst_16 [1] : vector<32x256xf32> to vector<32xf32>
    %25 = vector.shape_cast %24 : vector<32xf32> to vector<32x1xf32>
    %cst_17 = arith.constant 3.906250e-03 : f32
    %26 = vector.broadcast %cst_17 : f32 to vector<32x1xf32>
    %27 = arith.mulf %25, %26 : vector<32x1xf32>
    %28 = vector.broadcast %27 : vector<32x1xf32> to vector<32x256xf32>
    %29 = arith.subf %23, %28 : vector<32x256xf32>
    %30 = vector.broadcast %6 : vector<1x256xf32> to vector<32x256xf32>
    %31 = arith.mulf %29, %30 : vector<32x256xf32>
    %32 = arith.mulf %31, %31 : vector<32x256xf32>
    %cst_18 = arith.constant dense<0.000000e+00> : vector<32xf32>
    %33 = vector.multi_reduction <add>, %32, %cst_18 [1] : vector<32x256xf32> to vector<32xf32>
    %34 = vector.shape_cast %33 : vector<32xf32> to vector<32x1xf32>
    %cst_19 = arith.constant 3.906250e-03 : f32
    %35 = vector.broadcast %cst_19 : f32 to vector<32x1xf32>
    %36 = arith.mulf %34, %35 : vector<32x1xf32>
    %cst_20 = arith.constant 9.99999974E-6 : f32
    %37 = vector.broadcast %cst_20 : f32 to vector<32x1xf32>
    %38 = arith.addf %36, %37 : vector<32x1xf32>
    %39 = math.rsqrt %38 : vector<32x1xf32>
    %40 = vector.broadcast %39 : vector<32x1xf32> to vector<32x256xf32>
    %41 = arith.mulf %31, %40 : vector<32x256xf32>
    %42 = vector.broadcast %4 : vector<32x1xf32> to vector<32x256xf32>
    %43 = arith.mulf %41, %42 : vector<32x256xf32>
    %44 = vector.broadcast %5 : vector<32x1xf32> to vector<32x256xf32>
    %45 = arith.addf %43, %44 : vector<32x256xf32>
    %c17_i32 = arith.constant 17 : i32
    %46 = tpu.dynamic_rotate %0 by %c17_i32 dim 1 : vector<32x256xf32>, i32 -> vector<32x256xf32>
    %c0_21 = arith.constant 0 : index
    %c0_22 = arith.constant 0 : index
    %47 = vector.load %arg5[%c0_21, %c0_22] : memref<9x256xf32, #tpu.memory_space<vmem>>, vector<1x256xf32>
    %48 = vector.broadcast %47 : vector<1x256xf32> to vector<32x256xf32>
    %49 = arith.mulf %46, %48 : vector<32x256xf32>
    %c0_23 = arith.constant 0 : index
    %c0_24 = arith.constant 0 : index
    %c0_25 = arith.constant 0 : index
    %50 = vector.load %arg7[%c0_23, %c0_24, %c0_25] : memref<9x32x32xf32, #tpu.memory_space<vmem>>, vector<1x32x32xf32>
    %51 = vector.shape_cast %50 : vector<1x32x32xf32> to vector<32x32xf32>
    %cst_26 = arith.constant dense<0.000000e+00> : vector<32x256xf32>
    %52 = tpu.matmul %51, %49, %cst_26 {dimension_numbers = #tpu.dot_dimension_numbers<[1], [0], [0], [1], [0, 0, 1, 1], [], []>} : vector<32x32xf32>, vector<32x256xf32>, vector<32x256xf32> -> vector<32x256xf32>
    %c16_i32 = arith.constant 16 : i32
    %53 = tpu.dynamic_rotate %0 by %c16_i32 dim 1 : vector<32x256xf32>, i32 -> vector<32x256xf32>
    %c1 = arith.constant 1 : index
    %c0_27 = arith.constant 0 : index
    %54 = vector.load %arg5[%c1, %c0_27] : memref<9x256xf32, #tpu.memory_space<vmem>>, vector<1x256xf32>
    %55 = vector.broadcast %54 : vector<1x256xf32> to vector<32x256xf32>
    %56 = arith.mulf %53, %55 : vector<32x256xf32>
    %c1_28 = arith.constant 1 : index
    %c0_29 = arith.constant 0 : index
    %c0_30 = arith.constant 0 : index
    %57 = vector.load %arg7[%c1_28, %c0_29, %c0_30] : memref<9x32x32xf32, #tpu.memory_space<vmem>>, vector<1x32x32xf32>
    %58 = vector.shape_cast %57 : vector<1x32x32xf32> to vector<32x32xf32>
    %cst_31 = arith.constant dense<0.000000e+00> : vector<32x256xf32>
    %59 = tpu.matmul %58, %56, %cst_31 {dimension_numbers = #tpu.dot_dimension_numbers<[1], [0], [0], [1], [0, 0, 1, 1], [], []>} : vector<32x32xf32>, vector<32x256xf32>, vector<32x256xf32> -> vector<32x256xf32>
    %60 = arith.addf %52, %59 : vector<32x256xf32>
    %c15_i32 = arith.constant 15 : i32
    %61 = tpu.dynamic_rotate %0 by %c15_i32 dim 1 : vector<32x256xf32>, i32 -> vector<32x256xf32>
    %c2 = arith.constant 2 : index
    %c0_32 = arith.constant 0 : index
    %62 = vector.load %arg5[%c2, %c0_32] : memref<9x256xf32, #tpu.memory_space<vmem>>, vector<1x256xf32>
    %63 = vector.broadcast %62 : vector<1x256xf32> to vector<32x256xf32>
    %64 = arith.mulf %61, %63 : vector<32x256xf32>
    %c2_33 = arith.constant 2 : index
    %c0_34 = arith.constant 0 : index
    %c0_35 = arith.constant 0 : index
    %65 = vector.load %arg7[%c2_33, %c0_34, %c0_35] : memref<9x32x32xf32, #tpu.memory_space<vmem>>, vector<1x32x32xf32>
    %66 = vector.shape_cast %65 : vector<1x32x32xf32> to vector<32x32xf32>
    %cst_36 = arith.constant dense<0.000000e+00> : vector<32x256xf32>
    %67 = tpu.matmul %66, %64, %cst_36 {dimension_numbers = #tpu.dot_dimension_numbers<[1], [0], [0], [1], [0, 0, 1, 1], [], []>} : vector<32x32xf32>, vector<32x256xf32>, vector<32x256xf32> -> vector<32x256xf32>
    %68 = arith.addf %60, %67 : vector<32x256xf32>
    %c1_i32 = arith.constant 1 : i32
    %69 = tpu.dynamic_rotate %0 by %c1_i32 dim 1 : vector<32x256xf32>, i32 -> vector<32x256xf32>
    %c3 = arith.constant 3 : index
    %c0_37 = arith.constant 0 : index
    %70 = vector.load %arg5[%c3, %c0_37] : memref<9x256xf32, #tpu.memory_space<vmem>>, vector<1x256xf32>
    %71 = vector.broadcast %70 : vector<1x256xf32> to vector<32x256xf32>
    %72 = arith.mulf %69, %71 : vector<32x256xf32>
    %c3_38 = arith.constant 3 : index
    %c0_39 = arith.constant 0 : index
    %c0_40 = arith.constant 0 : index
    %73 = vector.load %arg7[%c3_38, %c0_39, %c0_40] : memref<9x32x32xf32, #tpu.memory_space<vmem>>, vector<1x32x32xf32>
    %74 = vector.shape_cast %73 : vector<1x32x32xf32> to vector<32x32xf32>
    %cst_41 = arith.constant dense<0.000000e+00> : vector<32x256xf32>
    %75 = tpu.matmul %74, %72, %cst_41 {dimension_numbers = #tpu.dot_dimension_numbers<[1], [0], [0], [1], [0, 0, 1, 1], [], []>} : vector<32x32xf32>, vector<32x256xf32>, vector<32x256xf32> -> vector<32x256xf32>
    %76 = arith.addf %68, %75 : vector<32x256xf32>
    %c4_42 = arith.constant 4 : index
    %c0_43 = arith.constant 0 : index
    %77 = vector.load %arg5[%c4_42, %c0_43] : memref<9x256xf32, #tpu.memory_space<vmem>>, vector<1x256xf32>
    %78 = vector.broadcast %77 : vector<1x256xf32> to vector<32x256xf32>
    %79 = arith.mulf %0, %78 : vector<32x256xf32>
    %c4_44 = arith.constant 4 : index
    %c0_45 = arith.constant 0 : index
    %c0_46 = arith.constant 0 : index
    %80 = vector.load %arg7[%c4_44, %c0_45, %c0_46] : memref<9x32x32xf32, #tpu.memory_space<vmem>>, vector<1x32x32xf32>
    %81 = vector.shape_cast %80 : vector<1x32x32xf32> to vector<32x32xf32>
    %cst_47 = arith.constant dense<0.000000e+00> : vector<32x256xf32>
    %82 = tpu.matmul %81, %79, %cst_47 {dimension_numbers = #tpu.dot_dimension_numbers<[1], [0], [0], [1], [0, 0, 1, 1], [], []>} : vector<32x32xf32>, vector<32x256xf32>, vector<32x256xf32> -> vector<32x256xf32>
    %83 = arith.addf %76, %82 : vector<32x256xf32>
    %c255_i32 = arith.constant 255 : i32
    %84 = tpu.dynamic_rotate %0 by %c255_i32 dim 1 : vector<32x256xf32>, i32 -> vector<32x256xf32>
    %c5 = arith.constant 5 : index
    %c0_48 = arith.constant 0 : index
    %85 = vector.load %arg5[%c5, %c0_48] : memref<9x256xf32, #tpu.memory_space<vmem>>, vector<1x256xf32>
    %86 = vector.broadcast %85 : vector<1x256xf32> to vector<32x256xf32>
    %87 = arith.mulf %84, %86 : vector<32x256xf32>
    %c5_49 = arith.constant 5 : index
    %c0_50 = arith.constant 0 : index
    %c0_51 = arith.constant 0 : index
    %88 = vector.load %arg7[%c5_49, %c0_50, %c0_51] : memref<9x32x32xf32, #tpu.memory_space<vmem>>, vector<1x32x32xf32>
    %89 = vector.shape_cast %88 : vector<1x32x32xf32> to vector<32x32xf32>
    %cst_52 = arith.constant dense<0.000000e+00> : vector<32x256xf32>
    %90 = tpu.matmul %89, %87, %cst_52 {dimension_numbers = #tpu.dot_dimension_numbers<[1], [0], [0], [1], [0, 0, 1, 1], [], []>} : vector<32x32xf32>, vector<32x256xf32>, vector<32x256xf32> -> vector<32x256xf32>
    %91 = arith.addf %83, %90 : vector<32x256xf32>
    %c241_i32 = arith.constant 241 : i32
    %92 = tpu.dynamic_rotate %0 by %c241_i32 dim 1 : vector<32x256xf32>, i32 -> vector<32x256xf32>
    %c6 = arith.constant 6 : index
    %c0_53 = arith.constant 0 : index
    %93 = vector.load %arg5[%c6, %c0_53] : memref<9x256xf32, #tpu.memory_space<vmem>>, vector<1x256xf32>
    %94 = vector.broadcast %93 : vector<1x256xf32> to vector<32x256xf32>
    %95 = arith.mulf %92, %94 : vector<32x256xf32>
    %c6_54 = arith.constant 6 : index
    %c0_55 = arith.constant 0 : index
    %c0_56 = arith.constant 0 : index
    %96 = vector.load %arg7[%c6_54, %c0_55, %c0_56] : memref<9x32x32xf32, #tpu.memory_space<vmem>>, vector<1x32x32xf32>
    %97 = vector.shape_cast %96 : vector<1x32x32xf32> to vector<32x32xf32>
    %cst_57 = arith.constant dense<0.000000e+00> : vector<32x256xf32>
    %98 = tpu.matmul %97, %95, %cst_57 {dimension_numbers = #tpu.dot_dimension_numbers<[1], [0], [0], [1], [0, 0, 1, 1], [], []>} : vector<32x32xf32>, vector<32x256xf32>, vector<32x256xf32> -> vector<32x256xf32>
    %99 = arith.addf %91, %98 : vector<32x256xf32>
    %c240_i32 = arith.constant 240 : i32
    %100 = tpu.dynamic_rotate %0 by %c240_i32 dim 1 : vector<32x256xf32>, i32 -> vector<32x256xf32>
    %c7 = arith.constant 7 : index
    %c0_58 = arith.constant 0 : index
    %101 = vector.load %arg5[%c7, %c0_58] : memref<9x256xf32, #tpu.memory_space<vmem>>, vector<1x256xf32>
    %102 = vector.broadcast %101 : vector<1x256xf32> to vector<32x256xf32>
    %103 = arith.mulf %100, %102 : vector<32x256xf32>
    %c7_59 = arith.constant 7 : index
    %c0_60 = arith.constant 0 : index
    %c0_61 = arith.constant 0 : index
    %104 = vector.load %arg7[%c7_59, %c0_60, %c0_61] : memref<9x32x32xf32, #tpu.memory_space<vmem>>, vector<1x32x32xf32>
    %105 = vector.shape_cast %104 : vector<1x32x32xf32> to vector<32x32xf32>
    %cst_62 = arith.constant dense<0.000000e+00> : vector<32x256xf32>
    %106 = tpu.matmul %105, %103, %cst_62 {dimension_numbers = #tpu.dot_dimension_numbers<[1], [0], [0], [1], [0, 0, 1, 1], [], []>} : vector<32x32xf32>, vector<32x256xf32>, vector<32x256xf32> -> vector<32x256xf32>
    %107 = arith.addf %99, %106 : vector<32x256xf32>
    %c239_i32 = arith.constant 239 : i32
    %108 = tpu.dynamic_rotate %0 by %c239_i32 dim 1 : vector<32x256xf32>, i32 -> vector<32x256xf32>
    %c8 = arith.constant 8 : index
    %c0_63 = arith.constant 0 : index
    %109 = vector.load %arg5[%c8, %c0_63] : memref<9x256xf32, #tpu.memory_space<vmem>>, vector<1x256xf32>
    %110 = vector.broadcast %109 : vector<1x256xf32> to vector<32x256xf32>
    %111 = arith.mulf %108, %110 : vector<32x256xf32>
    %c8_64 = arith.constant 8 : index
    %c0_65 = arith.constant 0 : index
    %c0_66 = arith.constant 0 : index
    %112 = vector.load %arg7[%c8_64, %c0_65, %c0_66] : memref<9x32x32xf32, #tpu.memory_space<vmem>>, vector<1x32x32xf32>
    %113 = vector.shape_cast %112 : vector<1x32x32xf32> to vector<32x32xf32>
    %cst_67 = arith.constant dense<0.000000e+00> : vector<32x256xf32>
    %114 = tpu.matmul %113, %111, %cst_67 {dimension_numbers = #tpu.dot_dimension_numbers<[1], [0], [0], [1], [0, 0, 1, 1], [], []>} : vector<32x32xf32>, vector<32x256xf32>, vector<32x256xf32> -> vector<32x256xf32>
    %115 = arith.addf %107, %114 : vector<32x256xf32>
    %116 = vector.broadcast %3 : vector<32x1xf32> to vector<32x256xf32>
    %117 = arith.addf %115, %116 : vector<32x256xf32>
    %c0_68 = arith.constant 0 : index
    %c0_69 = arith.constant 0 : index
    %118 = vector.load %arg10[%c0_68, %c0_69] : memref<8x32xf32, #tpu.memory_space<vmem>>, vector<8x32xf32>
    %c0_70 = arith.constant 0 : index
    %c0_71 = arith.constant 0 : index
    %119 = vector.load %arg11[%c0_70, %c0_71] : memref<32x8xf32, #tpu.memory_space<vmem>>, vector<32x8xf32>
    %120 = vector.broadcast %6 : vector<1x256xf32> to vector<32x256xf32>
    %121 = arith.mulf %45, %120 : vector<32x256xf32>
    %cst_72 = arith.constant dense<0.000000e+00> : vector<32xf32>
    %122 = vector.multi_reduction <add>, %121, %cst_72 [1] : vector<32x256xf32> to vector<32xf32>
    %123 = vector.shape_cast %122 : vector<32xf32> to vector<32x1xf32>
    %cst_73 = arith.constant 3.906250e-03 : f32
    %124 = vector.broadcast %cst_73 : f32 to vector<32x1xf32>
    %125 = arith.mulf %123, %124 : vector<32x1xf32>
    %126 = vector.broadcast %6 : vector<1x256xf32> to vector<32x256xf32>
    %127 = arith.mulf %117, %126 : vector<32x256xf32>
    %cst_74 = arith.constant dense<0.000000e+00> : vector<32xf32>
    %128 = vector.multi_reduction <add>, %127, %cst_74 [1] : vector<32x256xf32> to vector<32xf32>
    %129 = vector.shape_cast %128 : vector<32xf32> to vector<32x1xf32>
    %cst_75 = arith.constant 3.906250e-03 : f32
    %130 = vector.broadcast %cst_75 : f32 to vector<32x1xf32>
    %131 = arith.mulf %129, %130 : vector<32x1xf32>
    %c0_76 = arith.constant 0 : index
    %c0_77 = arith.constant 0 : index
    %c0_78 = arith.constant 0 : index
    %132 = vector.load %arg9[%c0_76, %c0_77, %c0_78] : memref<4x8x32xf32, #tpu.memory_space<vmem>>, vector<1x8x32xf32>
    %133 = vector.shape_cast %132 : vector<1x8x32xf32> to vector<8x32xf32>
    %cst_79 = arith.constant dense<0.000000e+00> : vector<8x1xf32>
    %134 = tpu.matmul %133, %125, %cst_79 {dimension_numbers = #tpu.dot_dimension_numbers<[1], [0], [0], [1], [0, 0, 1, 1], [], []>} : vector<8x32xf32>, vector<32x1xf32>, vector<8x1xf32> -> vector<8x1xf32>
    %c1_80 = arith.constant 1 : index
    %c0_81 = arith.constant 0 : index
    %c0_82 = arith.constant 0 : index
    %135 = vector.load %arg9[%c1_80, %c0_81, %c0_82] : memref<4x8x32xf32, #tpu.memory_space<vmem>>, vector<1x8x32xf32>
    %136 = vector.shape_cast %135 : vector<1x8x32xf32> to vector<8x32xf32>
    %cst_83 = arith.constant dense<0.000000e+00> : vector<8x1xf32>
    %137 = tpu.matmul %136, %125, %cst_83 {dimension_numbers = #tpu.dot_dimension_numbers<[1], [0], [0], [1], [0, 0, 1, 1], [], []>} : vector<8x32xf32>, vector<32x1xf32>, vector<8x1xf32> -> vector<8x1xf32>
    %138 = arith.maximumf %134, %137 : vector<8x1xf32>
    %c2_84 = arith.constant 2 : index
    %c0_85 = arith.constant 0 : index
    %c0_86 = arith.constant 0 : index
    %139 = vector.load %arg9[%c2_84, %c0_85, %c0_86] : memref<4x8x32xf32, #tpu.memory_space<vmem>>, vector<1x8x32xf32>
    %140 = vector.shape_cast %139 : vector<1x8x32xf32> to vector<8x32xf32>
    %cst_87 = arith.constant dense<0.000000e+00> : vector<8x1xf32>
    %141 = tpu.matmul %140, %125, %cst_87 {dimension_numbers = #tpu.dot_dimension_numbers<[1], [0], [0], [1], [0, 0, 1, 1], [], []>} : vector<8x32xf32>, vector<32x1xf32>, vector<8x1xf32> -> vector<8x1xf32>
    %142 = arith.maximumf %138, %141 : vector<8x1xf32>
    %c3_88 = arith.constant 3 : index
    %c0_89 = arith.constant 0 : index
    %c0_90 = arith.constant 0 : index
    %143 = vector.load %arg9[%c3_88, %c0_89, %c0_90] : memref<4x8x32xf32, #tpu.memory_space<vmem>>, vector<1x8x32xf32>
    %144 = vector.shape_cast %143 : vector<1x8x32xf32> to vector<8x32xf32>
    %cst_91 = arith.constant dense<0.000000e+00> : vector<8x1xf32>
    %145 = tpu.matmul %144, %125, %cst_91 {dimension_numbers = #tpu.dot_dimension_numbers<[1], [0], [0], [1], [0, 0, 1, 1], [], []>} : vector<8x32xf32>, vector<32x1xf32>, vector<8x1xf32> -> vector<8x1xf32>
    %146 = arith.maximumf %142, %145 : vector<8x1xf32>
    %cst_92 = arith.constant dense<0.000000e+00> : vector<32x1xf32>
    %147 = tpu.matmul %119, %146, %cst_92 {dimension_numbers = #tpu.dot_dimension_numbers<[1], [0], [0], [1], [0, 0, 1, 1], [], []>} : vector<32x8xf32>, vector<8x1xf32>, vector<32x1xf32> -> vector<32x1xf32>
    %148 = arith.subf %125, %147 : vector<32x1xf32>
    %149 = math.exp %148 : vector<32x1xf32>
    %c0_93 = arith.constant 0 : index
    %c0_94 = arith.constant 0 : index
    %c0_95 = arith.constant 0 : index
    %150 = vector.load %arg9[%c0_93, %c0_94, %c0_95] : memref<4x8x32xf32, #tpu.memory_space<vmem>>, vector<1x8x32xf32>
    %151 = vector.shape_cast %150 : vector<1x8x32xf32> to vector<8x32xf32>
    %cst_96 = arith.constant dense<0.000000e+00> : vector<8x1xf32>
    %152 = tpu.matmul %151, %131, %cst_96 {dimension_numbers = #tpu.dot_dimension_numbers<[1], [0], [0], [1], [0, 0, 1, 1], [], []>} : vector<8x32xf32>, vector<32x1xf32>, vector<8x1xf32> -> vector<8x1xf32>
    %c1_97 = arith.constant 1 : index
    %c0_98 = arith.constant 0 : index
    %c0_99 = arith.constant 0 : index
    %153 = vector.load %arg9[%c1_97, %c0_98, %c0_99] : memref<4x8x32xf32, #tpu.memory_space<vmem>>, vector<1x8x32xf32>
    %154 = vector.shape_cast %153 : vector<1x8x32xf32> to vector<8x32xf32>
    %cst_100 = arith.constant dense<0.000000e+00> : vector<8x1xf32>
    %155 = tpu.matmul %154, %131, %cst_100 {dimension_numbers = #tpu.dot_dimension_numbers<[1], [0], [0], [1], [0, 0, 1, 1], [], []>} : vector<8x32xf32>, vector<32x1xf32>, vector<8x1xf32> -> vector<8x1xf32>
    %156 = arith.maximumf %152, %155 : vector<8x1xf32>
    %c2_101 = arith.constant 2 : index
    %c0_102 = arith.constant 0 : index
    %c0_103 = arith.constant 0 : index
    %157 = vector.load %arg9[%c2_101, %c0_102, %c0_103] : memref<4x8x32xf32, #tpu.memory_space<vmem>>, vector<1x8x32xf32>
    %158 = vector.shape_cast %157 : vector<1x8x32xf32> to vector<8x32xf32>
    %cst_104 = arith.constant dense<0.000000e+00> : vector<8x1xf32>
    %159 = tpu.matmul %158, %131, %cst_104 {dimension_numbers = #tpu.dot_dimension_numbers<[1], [0], [0], [1], [0, 0, 1, 1], [], []>} : vector<8x32xf32>, vector<32x1xf32>, vector<8x1xf32> -> vector<8x1xf32>
    %160 = arith.maximumf %156, %159 : vector<8x1xf32>
    %c3_105 = arith.constant 3 : index
    %c0_106 = arith.constant 0 : index
    %c0_107 = arith.constant 0 : index
    %161 = vector.load %arg9[%c3_105, %c0_106, %c0_107] : memref<4x8x32xf32, #tpu.memory_space<vmem>>, vector<1x8x32xf32>
    %162 = vector.shape_cast %161 : vector<1x8x32xf32> to vector<8x32xf32>
    %cst_108 = arith.constant dense<0.000000e+00> : vector<8x1xf32>
    %163 = tpu.matmul %162, %131, %cst_108 {dimension_numbers = #tpu.dot_dimension_numbers<[1], [0], [0], [1], [0, 0, 1, 1], [], []>} : vector<8x32xf32>, vector<32x1xf32>, vector<8x1xf32> -> vector<8x1xf32>
    %164 = arith.maximumf %160, %163 : vector<8x1xf32>
    %cst_109 = arith.constant dense<0.000000e+00> : vector<32x1xf32>
    %165 = tpu.matmul %119, %164, %cst_109 {dimension_numbers = #tpu.dot_dimension_numbers<[1], [0], [0], [1], [0, 0, 1, 1], [], []>} : vector<32x8xf32>, vector<8x1xf32>, vector<32x1xf32> -> vector<32x1xf32>
    %166 = arith.subf %131, %165 : vector<32x1xf32>
    %167 = math.exp %166 : vector<32x1xf32>
    %168 = vector.broadcast %149 : vector<32x1xf32> to vector<32x256xf32>
    %169 = arith.mulf %168, %117 : vector<32x256xf32>
    %cst_110 = arith.constant dense<0.000000e+00> : vector<8x256xf32>
    %170 = tpu.matmul %118, %169, %cst_110 {dimension_numbers = #tpu.dot_dimension_numbers<[1], [0], [0], [1], [0, 0, 1, 1], [], []>} : vector<8x32xf32>, vector<32x256xf32>, vector<8x256xf32> -> vector<8x256xf32>
    %171 = vector.broadcast %167 : vector<32x1xf32> to vector<32x256xf32>
    %172 = arith.mulf %171, %45 : vector<32x256xf32>
    %cst_111 = arith.constant dense<0.000000e+00> : vector<8x256xf32>
    %173 = tpu.matmul %118, %172, %cst_111 {dimension_numbers = #tpu.dot_dimension_numbers<[1], [0], [0], [1], [0, 0, 1, 1], [], []>} : vector<8x32xf32>, vector<32x256xf32>, vector<8x256xf32> -> vector<8x256xf32>
    %cst_112 = arith.constant dense<0.000000e+00> : vector<8x1xf32>
    %174 = tpu.matmul %118, %149, %cst_112 {dimension_numbers = #tpu.dot_dimension_numbers<[1], [0], [0], [1], [0, 0, 1, 1], [], []>} : vector<8x32xf32>, vector<32x1xf32>, vector<8x1xf32> -> vector<8x1xf32>
    %cst_113 = arith.constant dense<0.000000e+00> : vector<8x1xf32>
    %175 = tpu.matmul %118, %167, %cst_113 {dimension_numbers = #tpu.dot_dimension_numbers<[1], [0], [0], [1], [0, 0, 1, 1], [], []>} : vector<8x32xf32>, vector<32x1xf32>, vector<8x1xf32> -> vector<8x1xf32>
    %176 = vector.broadcast %174 : vector<8x1xf32> to vector<8x256xf32>
    %177 = arith.divf %170, %176 : vector<8x256xf32>
    %178 = vector.broadcast %175 : vector<8x1xf32> to vector<8x256xf32>
    %179 = arith.divf %173, %178 : vector<8x256xf32>
    %180 = arith.addf %177, %179 : vector<8x256xf32>
    %181 = arith.negf %180 : vector<8x256xf32>
    %182 = math.exp %181 : vector<8x256xf32>
    %cst_114 = arith.constant 1.000000e+00 : f32
    %183 = vector.broadcast %cst_114 : f32 to vector<8x256xf32>
    %184 = arith.addf %183, %182 : vector<8x256xf32>
    %185 = arith.divf %183, %184 : vector<8x256xf32>
    %cst_115 = arith.constant dense<0.000000e+00> : vector<32x256xf32>
    %186 = tpu.matmul %119, %185, %cst_115 {dimension_numbers = #tpu.dot_dimension_numbers<[1], [0], [0], [1], [0, 0, 1, 1], [], []>} : vector<32x8xf32>, vector<8x256xf32>, vector<32x256xf32> -> vector<32x256xf32>
    %187 = arith.mulf %0, %186 : vector<32x256xf32>
    %c0_116 = arith.constant 0 : index
    %c0_117 = arith.constant 0 : index
    %188 = vector.load %arg12[%c0_116, %c0_117] : memref<32x256xf32, #tpu.memory_space<vmem>>, vector<32x256xf32>
    tpu.vector_store %arg12[%c0_116, %c0_117], %187 {strides = array<i32>} : memref<32x256xf32, #tpu.memory_space<vmem>>, vector<32x256xf32>,
    return
  }
  func.func @transform_0(%arg0: i32) -> (i32, i32) {
    %c0_i32 = arith.constant 0 : i32
    %c0_i32_0 = arith.constant 0 : i32
    return %arg0, %c0_i32 : i32, i32
  }
  func.func @transform_1(%arg0: i32) -> (i32, i32) {
    %c0_i32 = arith.constant 0 : i32
    %c0_i32_0 = arith.constant 0 : i32
    %c0_i32_1 = arith.constant 0 : i32
    return %c0_i32, %c0_i32_0 : i32, i32
  }
  func.func @transform_2(%arg0: i32) -> (i32, i32) {
    %c0_i32 = arith.constant 0 : i32
    %c0_i32_0 = arith.constant 0 : i32
    %c0_i32_1 = arith.constant 0 : i32
    return %c0_i32, %c0_i32_0 : i32, i32
  }
  func.func @transform_3(%arg0: i32) -> (i32, i32) {
    %c0_i32 = arith.constant 0 : i32
    %c0_i32_0 = arith.constant 0 : i32
    %c0_i32_1 = arith.constant 0 : i32
    return %c0_i32, %c0_i32_0 : i32, i32
  }
  func.func @transform_4(%arg0: i32) -> (i32, i32) {
    %c0_i32 = arith.constant 0 : i32
    %c0_i32_0 = arith.constant 0 : i32
    %c0_i32_1 = arith.constant 0 : i32
    return %c0_i32, %c0_i32_0 : i32, i32
  }
  func.func @transform_5(%arg0: i32) -> (i32, i32) {
    %c0_i32 = arith.constant 0 : i32
    %c0_i32_0 = arith.constant 0 : i32
    %c0_i32_1 = arith.constant 0 : i32
    return %c0_i32, %c0_i32_0 : i32, i32
  }
  func.func @transform_6(%arg0: i32) -> (i32, i32, i32) {
    %c0_i32 = arith.constant 0 : i32
    %c0_i32_0 = arith.constant 0 : i32
    %c0_i32_1 = arith.constant 0 : i32
    %c0_i32_2 = arith.constant 0 : i32
    return %c0_i32, %c0_i32_0, %c0_i32_1 : i32, i32, i32
  }
  func.func @transform_7(%arg0: i32) -> (i32, i32) {
    %c0_i32 = arith.constant 0 : i32
    %c0_i32_0 = arith.constant 0 : i32
    %c0_i32_1 = arith.constant 0 : i32
    return %c0_i32, %c0_i32_0 : i32, i32
  }
  func.func @transform_8(%arg0: i32) -> (i32, i32, i32) {
    %c0_i32 = arith.constant 0 : i32
    %c0_i32_0 = arith.constant 0 : i32
    %c0_i32_1 = arith.constant 0 : i32
    %c0_i32_2 = arith.constant 0 : i32
    return %c0_i32, %c0_i32_0, %c0_i32_1 : i32, i32, i32
  }
  func.func @transform_9(%arg0: i32) -> (i32, i32) {
    %c0_i32 = arith.constant 0 : i32
    %c0_i32_0 = arith.constant 0 : i32
    %c0_i32_1 = arith.constant 0 : i32
    return %c0_i32, %c0_i32_0 : i32, i32
  }
  func.func @transform_10(%arg0: i32) -> (i32, i32) {
    %c0_i32 = arith.constant 0 : i32
    %c0_i32_0 = arith.constant 0 : i32
    %c0_i32_1 = arith.constant 0 : i32
    return %c0_i32, %c0_i32_0 : i32, i32
  }
  func.func @transform_11(%arg0: i32) -> (i32, i32) {
    %c0_i32 = arith.constant 0 : i32
    %c0_i32_0 = arith.constant 0 : i32
    return %arg0, %c0_i32 : i32, i32
  }
}

</mosaic_0001>

<bundles_post_ra>
// kernel: tpu_custom_call.1
= control target key start
LH: loop header
LB: loop body
LE: loop exit
PB: predicated region body
PF: predicated region fallthrough
CT: control target
= control target key end

     0   :  { %16 = vsyncpa [#allocation3], 0  ;;  %s5520_s0 = inlined_call_operand.vmem [shape: f32[32,256], index: 0, kind: input, shape index: {}]   ;;  %s5521_s1 = inlined_call_operand.vmem [shape: f32[256,32], index: 1, kind: input, shape index: {}]   ;;  %s5522_s2 = inlined_call_operand.hbm [shape: f32[32,256], index: 2, kind: input, shape index: {}]   ;;  %s5523_s3 = inlined_call_operand.hbm [shape: f32[32,256], index: 3, kind: input, shape index: {}]   ;;  %s5524_s4 = inlined_call_operand.vmem [shape: f32[9,256], index: 4, kind: input, shape index: {}]   ;;  %s5525_s5 = inlined_call_operand.hbm [shape: f32[32,32], index: 5, kind: input, shape index: {}]   ;;  %s5526_s6 = inlined_call_operand.vmem [shape: f32[9,32,32], index: 6, kind: input, shape index: {}]   ;;  %s5527_s7 = inlined_call_operand.vmem [shape: f32[32,8], index: 7, kind: input, shape index: {}]   ;;  %s5528_s8 = inlined_call_operand.hbm [shape: f32[4,8,32], index: 8, kind: input, shape index: {}]   ;;  %s5529_s9 = inlined_call_operand.vmem [shape: f32[8,32], index: 9, kind: input, shape index: {}]   ;;  %s5530_s10 = inlined_call_operand.vmem [shape: f32[32,8], index: 10, kind: input, shape index: {}]   ;;  %s5531_s11 = inlined_call_operand.hbm [shape: f32[32,256], index: 11, kind: output, shape index: {}]  }
   0x1   :  { %17 = vsyncpa [#allocation6], 0 }
   0x2   :  { %18 = vsyncpa [#allocation9], 0 }
   0x3   :  { %19 = vsyncpa [#allocation4], 0  ;;  %s4064_s17 = smov [#allocation5]   ;;  %s4065_s19 = smov [#allocation2]  }
   0x4   :  { %s41_s18 = sshll.u32 %s4064_s17, 4  ;;  %s29_s20 = sshll.u32 %s4065_s19, 4  ;;  %s42_s18 = int_to_ptr.vmem [resolvable:$true] %s41_s18  ;;  %s30_s20 = int_to_ptr.vmem [resolvable:$true] %s29_s20 }
   0x5   :  { %s3964_s21 = scalar_lea.vmem %s42_s18, 1024  ;;  %p3969_p1 = scmp.lt.s32.totalorder %s42_s18, %s42_s18 }
   0x6   :  { %p3965_p0 = scmp.ne.s32.totalorder %s42_s18, %s3964_s21  ;;  %p3970_p2 = scmp.lt.s32.totalorder %s3964_s21, %s3964_s21 }
   0x8   :  { %p3971_p3 = por %p3970_p2, %p3969_p1 }
   0xa   :  { %p3972_p4 = pnand %p3971_p3, %p3965_p0 }
   0xc   :  { %3975 = shalt.err (!%p3972_p4)
}
   0xd   :  { %s4066_s22 = smov 256   ;;  %s4067_s23 = smov 16  }
   0xe   :  { %47 = dma.hbm_to_vmem [thread:$0]  %s5523_s3, 1024, %s42_s18, [#allocation6], %s4066_s22, %s4066_s22, %s4067_s23  }
   0xf   :  { %s3984_s26 = scalar_lea.vmem %s30_s20, 1024  ;;  %p3989_p6 = scmp.lt.s32.totalorder %s30_s20, %s30_s20 }
  0x10   :  { %p3985_p5 = scmp.ne.s32.totalorder %s30_s20, %s3984_s26  ;;  %p3990_p7 = scmp.lt.s32.totalorder %s3984_s26, %s3984_s26 }
  0x12   :  { %p3991_p8 = por %p3990_p7, %p3989_p6 }
  0x14   :  { %p3992_p9 = pnand %p3991_p8, %p3985_p5 }
  0x16   :  { %3995 = shalt.err (!%p3992_p9)
}
  0x17   :  { %35 = dma.hbm_to_vmem [thread:$0]  %s5522_s2, 1024, %s30_s20, [#allocation3], %s4066_s22, %s4066_s22, %s4067_s23  }
  0x18   :  { %s4068_s29 = smov [#allocation7]  }
  0x19   :  { %s55_s30 = sshll.u32 %s4068_s29, 4  ;;  %s56_s30 = int_to_ptr.vmem [resolvable:$true] %s55_s30 }
  0x1a   :  { %s4004_s12 = scalar_lea.vmem %s56_s30, 512  ;;  %p4009_p11 = scmp.lt.s32.totalorder %s56_s30, %s56_s30 }
  0x1b   :  { %p4005_p10 = scmp.ne.s32.totalorder %s56_s30, %s4004_s12  ;;  %p4010_p12 = scmp.lt.s32.totalorder %s4004_s12, %s4004_s12 }
  0x1d   :  { %p4011_p13 = por %p4010_p12, %p4009_p11 }
  0x1f   :  { %p4012_p0 = pnand %p4011_p13, %p4005_p10 }
  0x21   :  { %4015 = shalt.err (!%p4012_p0)
}
  0x22   :  { %s4069_s3 = smov 128   ;;  %s4070_s13 = smov 8  }
  0x23   :  { %61 = dma.hbm_to_vmem [thread:$0]  %s5525_s5, 512, %s56_s30, [#allocation6], %s4069_s3, %s4069_s3, %s4070_s13  }
  0x24   :  { %s4071_s16 = smov [#allocation8]  }
  0x25   :  { %s71_s17 = sshll.u32 %s4071_s16, 4  ;;  %s72_s17 = int_to_ptr.vmem [resolvable:$true] %s71_s17 }
  0x26   :  { %s4024_s2 = scalar_lea.vmem %s72_s17, 512  ;;  %p4029_p2 = scmp.lt.s32.totalorder %s72_s17, %s72_s17 }
  0x27   :  { %p4025_p1 = scmp.ne.s32.totalorder %s72_s17, %s4024_s2  ;;  %p4030_p3 = scmp.lt.s32.totalorder %s4024_s2, %s4024_s2 }
  0x29   :  { %p4031_p4 = por %p4030_p3, %p4029_p2 }
  0x2b   :  { %p4032_p5 = pnand %p4031_p4, %p4025_p1 }
  0x2d   :  { %4035 = shalt.err (!%p4032_p5)
}
  0x2e   :  { %77 = dma.hbm_to_vmem [thread:$0]  %s5528_s8, 512, %s72_s17, [#allocation9], %s4069_s3, %s4069_s3, %s4070_s13  }
  0x2f   :  { %4056 = dma.done.wait [#allocation3], 1024  }
  0x30   :  { %4057 = vsyncadd [#allocation3], 4294966272 }
  0x31   :  { %4058 = dma.done.wait [#allocation6], 1536  }
  0x32   :  { %4059 = vsyncadd [#allocation6], 4294965760 }
  0x33   :  { %4060 = dma.done.wait [#allocation9], 512  }
  0x34   :  { %4061 = vsyncadd [#allocation9], 4294966784  ;;  %v139_v0 = vld [vmem:[%s5521_s1 + $0xf8] sm:$0xff]  ;;  %v138_v2 = vld [vmem:[%s5521_s1 + $0xf0] sm:$0xff]  ;;  %vm249_vm0 = vcmask 261120   ;;  %v4072_v43 = vmov 0  }
  0x35   :  { %v123_v1 = vld [vmem:[%s5521_s1 + $0x78] sm:$0xff]  ;;  %3592 = vmatprep.subr.mxu0 %v139_v0  ;;  %v122_v3 = vld [vmem:[%s5521_s1 + $0x70] sm:$0xff]  ;;  %v137_v4 = vld [vmem:[%s5521_s1 + $0xe8] sm:$0xff]  ;;  %3874 = vset.pattern.permute.xlu0 %v4072_v43  ;;  %s4074_s24 = smov 17   ;;  %s4076_s25 = smov 15   ;;  %vm4084_vm9 = vmmov 0  }
  0x36   :  { %3593 = vmatpush3.msra.mxu0 %v123_v1  ;;  %v121_v5 = vld [vmem:[%s5521_s1 + $0x68] sm:$0xff]  ;;  %v136_v6 = vld [vmem:[%s5521_s1 + $0xe0] sm:$0xff]  ;;  %v135_v8 = vld [vmem:[%s5521_s1 + $0xd8] sm:$0xff]  ;;  %3875 = vset.pattern.permute.xlu1 %v4072_v43  ;;  %v5546_v1 = vmov 0.0   ;;  %s4077_s26 = smov 1   ;;  %s4078_s8 = smov 127  }
  0x37   :  { %3594 = vmatprep.subr.mxu0 %v138_v2  ;;  %v120_v7 = vld [vmem:[%s5521_s1 + $0x60] sm:$0xff]  ;;  %v119_v9 = vld [vmem:[%s5521_s1 + $0x58] sm:$0xff]  ;;  %v134_v10 = vld [vmem:[%s5521_s1 + $0xd0] sm:$0xff]  ;;  %s4079_s27 = smov 113   ;;  %s4081_s28 = smov 112   ;;  %vm2489_vm10 = vcmask 64512  }
  0x38   :  { %3595 = vmatpush3.msra.mxu0 %v122_v3  ;;  %v118_v11 = vld [vmem:[%s5521_s1 + $0x50] sm:$0xff]  ;;  %v133_v12 = vld [vmem:[%s5521_s1 + $0xc8] sm:$0xff]  ;;  %v132_v15 = vld [vmem:[%s5521_s1 + $0xc0] sm:$0xff]  ;;  %s4082_s15 = smov 111   ;;  %s4085_s12 = smov [#allocation10]  }
  0x39   :  { %3596 = vmatprep.subr.mxu0 %v137_v4  ;;  %v4206_v13 = vld [vmem:[%s5520_s0 + $0x8] sm:$0xff]  ;;  %v116_v16 = vld [vmem:[%s5521_s1 + $0x40] sm:$0xff]  ;;  %v131_v17 = vld [vmem:[%s5521_s1 + $0xb8] sm:$0xff] }
  0x3a   :  { %3597 = vmatpush3.msra.mxu0 %v121_v5  ;;  %v117_v14 = vld [vmem:[%s5521_s1 + $0x48] sm:$0xff]  ;;  %204 = vmatprep.mubr.f32.mxu0 %v4206_v13  ;;  %v115_v18 = vld [vmem:[%s5521_s1 + $0x38] sm:$0xff]  ;;  %v130_v19 = vld [vmem:[%s5521_s1 + $0xb0] sm:$0xff] }
  0x3b   :  { %3598 = vmatprep.subr.mxu0 %v136_v6  ;;  %v114_v20 = vld [vmem:[%s5521_s1 + $0x30] sm:$0xff]  ;;  %v129_v21 = vld [vmem:[%s5521_s1 + $0xa8] sm:$0xff]  ;;  %v128_v23 = vld [vmem:[%s5521_s1 + $0xa0] sm:$0xff] }
  0x3c   :  { %3599 = vmatpush3.msra.mxu0 %v120_v7  ;;  %v113_v22 = vld [vmem:[%s5521_s1 + $0x28] sm:$0xff]  ;;  %v112_v24 = vld [vmem:[%s5521_s1 + $0x20] sm:$0xff]  ;;  %v127_v25 = vld [vmem:[%s5521_s1 + $0x98] sm:$0xff]  ;;  %v4075_v7 = vmov 2  }
  0x3d   :  { %3600 = vmatprep.subr.mxu0 %v135_v8  ;;  %v111_v26 = vld [vmem:[%s5521_s1 + $0x18] sm:$0xff]  ;;  %v126_v27 = vld [vmem:[%s5521_s1 + $0x90] sm:$0xff]  ;;  %v125_v29 = vld [vmem:[%s5521_s1 + $0x88] sm:$0xff] }
  0x3e   :  { %3601 = vmatpush3.msra.mxu0 %v119_v9  ;;  %v110_v28 = vld [vmem:[%s5521_s1 + $0x10] sm:$0xff]  ;;  %v109_v30 = vld [vmem:[%s5521_s1 + $0x8] sm:$0xff]  ;;  %v124_v31 = vld [vmem:[%s5521_s1 + $0x80] sm:$0xff] }
  0x3f   :  { %3602 = vmatprep.subr.mxu0 %v134_v10  ;;  %v108_v32 = vld [vmem:[%s5521_s1] sm:$0xff]  ;;  %v4274_v34 = vld [vmem:[%s5520_s0 + $0x18] sm:$0xff]  ;;  %v4281_v35 = vld [vmem:[%s5520_s0 + $0x10] sm:$0xff] }
  0x40   :  { %3603 = vmatpush3.msra.mxu0 %v118_v11  ;;  %v4269_v33 = vld [vmem:[%s5520_s0] sm:$0xff]  ;;  %v4286_v36 = vld [vmem:[%s5520_s0 + $0x28] sm:$0xff]  ;;  %v4298_v38 = vld [vmem:[%s5520_s0 + $0x38] sm:$0xff] }
  0x41   :  { %3604 = vmatprep.subr.mxu0 %v133_v12  ;;  %v4293_v37 = vld [vmem:[%s5520_s0 + $0x20] sm:$0xff]  ;;  %v4305_v39 = vld [vmem:[%s5520_s0 + $0x30] sm:$0xff]  ;;  %v4323_v44 = vld [vmem:[%s5527_s7 + $0x8] sm:$0xff] }
  0x42   :  { %3605 = vmatpush3.msra.mxu0 %v117_v14  ;;  %v225_v40 = vld [vmem:[#allocation7] sm:$0xff]  ;;  %v4315_v42 = vld [vmem:[%s5527_s7 + $0x10] sm:$0xff]  ;;  %v4328_v45 = vld [vmem:[%s5527_s7 + $0x18] sm:$0xff] }
  0x43   :  { %3606 = vmatprep.subr.mxu0 %v132_v15  ;;  %3712 = vmatprep.mubr.msk.f32.mxu1 %vm249_vm0, %v225_v40  ;;  %v102_v41 = vld [vmem:[%s5527_s7] sm:$0xff]  ;;  %v226_v58 = vld [vmem:[#allocation7 + $0x8] sm:$0xff]  ;;  %v227_v59 = vld [vmem:[#allocation7 + $0x10] sm:$0xff] }
  0x44   :  { %3607 = vmatpush3.msra.mxu0 %v116_v16  ;;  %231 = vperm.xlu0 %3874, %v102_v41   ;;  %v228_v60 = vld [vmem:[#allocation7 + $0x18] sm:$0xff]  ;;  %v377_v62 = vld [vmem:[#allocation2 + $0x30] sm:$0xff]  ;;  %v376_v63 = vld [vmem:[#allocation2 + $0x28] sm:$0xff] }
  0x45   :  { %3608 = vmatprep.subr.mxu0 %v131_v17  ;;  %241 = vperm.xlu1 %3875, %v4315_v42   ;;  %v378_v61 = vld [vmem:[#allocation2 + $0x38] sm:$0xff]  ;;  %v375_v0 = vld [vmem:[#allocation2 + $0x20] sm:$0xff]  ;;  %v373_v3 = vld [vmem:[#allocation2 + $0x10] sm:$0xff] }
  0x46   :  { %3609 = vmatpush3.msra.mxu0 %v115_v18  ;;  %v374_v2 = vld [vmem:[#allocation2 + $0x18] sm:$0xff]  ;;  %v372_v4 = vld [vmem:[#allocation2 + $0x8] sm:$0xff]  ;;  %v371_v5 = vld [vmem:[#allocation2] sm:$0xff] }
  0x47   :  { %3610 = vmatprep.subr.mxu0 %v130_v19  ;;  %v487_v6 = vld [vmem:[#allocation5 + $0x38] sm:$0xff]  ;;  %v486_v41 = vld [vmem:[#allocation5 + $0x30] sm:$0xff] }
  0x48   :  { %3611 = vmatpush3.msra.mxu0 %v114_v20  ;;  %236 = vperm.xlu0 %3874, %v4323_v44  }
  0x49   :  { %3612 = vmatprep.subr.mxu0 %v129_v21  ;;  %246 = vperm.xlu1 %3875, %v4328_v45  }
  0x4a   :  { %3613 = vmatpush3.msra.mxu0 %v113_v22 }
  0x4b   :  { %3614 = vmatprep.subr.mxu0 %v128_v23 }
  0x4c   :  { %3615 = vmatpush3.msra.mxu0 %v112_v24  ;;  %789 = vrot.lane.b32.xlu0 %v4298_v38, %s4067_s23 }
  0x4d   :  { %3616 = vmatprep.subr.mxu0 %v127_v25  ;;  %781 = vrot.lane.b32.xlu1 %v4305_v39, %s4067_s23 }
  0x4e   :  { %3617 = vmatpush3.msra.mxu0 %v111_v26  ;;  %3877 = vset.pattern.permute.xlu1 %v4075_v7 }
  0x4f   :  { %3618 = vmatprep.subr.mxu0 %v126_v27  ;;  %3876 = vset.pattern.permute.xlu0 %v4075_v7 }
  0x50   :  { %3619 = vmatpush3.msra.mxu0 %v110_v28  ;;  %777 = vrot.lane.b32.xlu0 %v4281_v35, %s4067_s23  ;;  %v4080_v28 = vmov 3  }
  0x51   :  { %3620 = vmatprep.subr.mxu0 %v125_v29  ;;  %779 = vrot.lane.b32.xlu1 %v4293_v37, %s4067_s23 }
  0x52   :  { %3621 = vmatpush3.msra.mxu0 %v109_v30 }
  0x53   :  { %3622 = vmatprep.subr.mxu0 %v124_v31 }
  0x54   :  { %3623 = vmatpush3.msra.mxu0 %v108_v32  ;;  %775 = vrot.lane.b32.xlu0 %v4269_v33, %s4067_s23 }
  0x55   :  { %205 = vmatmul.mubr.f32.vlgmr.msra.gmra.mxu0 %v4269_v33  ;;  %787 = vrot.lane.b32.xlu1 %v4286_v36, %s4067_s23 }
  0x56   :  { %209 = vmatprep.mubr.f32.mxu0 %v4274_v34 }
  0x58   :  { %730 = vrot.lane.b32.xlu0 %v4305_v39, %s4074_s24 }
  0x59   :  { %210 = vmatmul.mubr.f32.gmra.mxu0 %v4281_v35  ;;  %785 = vrot.lane.b32.xlu1 %v4274_v34, %s4067_s23 }
  0x5a   :  { %214 = vmatprep.mubr.f32.mxu0 %v4286_v36 }
  0x5c   :  { %728 = vrot.lane.b32.xlu0 %v4293_v37, %s4074_s24 }
  0x5d   :  { %215 = vmatmul.mubr.f32.gmra.mxu0 %v4293_v37  ;;  %783 = vrot.lane.b32.xlu1 %v4206_v13, %s4067_s23 }
  0x5e   :  { %219 = vmatprep.mubr.f32.mxu0 %v4298_v38 }
  0x60   :  { %1034 = vrot.lane.b32.xlu0 %v4305_v39, %s4076_s25 }
  0x61   :  { %220 = vmatmul.mubr.f32.gmra.mxu0 %v4305_v39  ;;  %738 = vrot.lane.b32.xlu1 %v4298_v38, %s4074_s24 }
  0x62   :  { %902 = vmatprep.mubr.f32.mxu0 %v5546_v1 }
  0x64   :  { %726 = vrot.lane.b32.xlu0 %v4281_v35, %s4074_s24 }
  0x65   :  { %736 = vrot.lane.b32.xlu1 %v4286_v36, %s4074_s24 }
  0x68   :  { %1032 = vrot.lane.b32.xlu0 %v4293_v37, %s4076_s25 }
  0x69   :  { %1042 = vrot.lane.b32.xlu1 %v4298_v38, %s4076_s25 }
  0x6c   :  { %724 = vrot.lane.b32.xlu0 %v4269_v33, %s4074_s24 }
  0x6d   :  { %734 = vrot.lane.b32.xlu1 %v4274_v34, %s4074_s24 }
  0x70   :  { %1030 = vrot.lane.b32.xlu0 %v4281_v35, %s4076_s25 }
  0x71   :  { %1040 = vrot.lane.b32.xlu1 %v4286_v36, %s4076_s25 }
  0x74   :  { %1028 = vrot.lane.b32.xlu0 %v4269_v33, %s4076_s25 }
  0x75   :  { %732 = vrot.lane.b32.xlu1 %v4206_v13, %s4074_s24 }
  0x78   :  { %1194 = vrot.lane.b32.xlu0 %v4305_v39, %s4077_s26 }
  0x79   :  { %1038 = vrot.lane.b32.xlu1 %v4274_v34, %s4076_s25 }
  0x7c   :  { %1190 = vrot.lane.b32.xlu0 %v4281_v35, %s4077_s26 }
  0x7d   :  { %1036 = vrot.lane.b32.xlu1 %v4206_v13, %s4076_s25 }
  0x80   :  { %1476 = vrot.lane.b32.xlu0 %v4305_v39, %s4078_s8 }
  0x81   :  { %1202 = vrot.lane.b32.xlu1 %v4298_v38, %s4077_s26 }
  0x84   :  { %1474 = vrot.lane.b32.xlu0 %v4293_v37, %s4078_s8 }
  0x85   :  { %1192 = vrot.lane.b32.xlu1 %v4293_v37, %s4077_s26 }
  0x88   :  { %1482 = vrot.lane.b32.xlu0 %v4286_v36, %s4078_s8 }
  0x89   :  { %1200 = vrot.lane.b32.xlu1 %v4286_v36, %s4077_s26 }
  0x8c   :  { %1636 = vrot.lane.b32.xlu0 %v4305_v39, %s4079_s27 }
  0x8d   :  { %1198 = vrot.lane.b32.xlu1 %v4274_v34, %s4077_s26 }
  0x90   :  { %1644 = vrot.lane.b32.xlu0 %v4298_v38, %s4079_s27 }
  0x91   :  { %1188 = vrot.lane.b32.xlu1 %v4269_v33, %s4077_s26 }
  0x94   :  { %1472 = vrot.lane.b32.xlu0 %v4281_v35, %s4078_s8 }
  0x95   :  { %1196 = vrot.lane.b32.xlu1 %v4206_v13, %s4077_s26 }
  0x98   :  { %1634 = vrot.lane.b32.xlu0 %v4293_v37, %s4079_s27 }
  0x99   :  { %1484 = vrot.lane.b32.xlu1 %v4298_v38, %s4078_s8 }
  0x9c   :  { %1470 = vrot.lane.b32.xlu0 %v4269_v33, %s4078_s8 }
  0x9d   :  { %1480 = vrot.lane.b32.xlu1 %v4274_v34, %s4078_s8 }
  0xa0   :  { %1632 = vrot.lane.b32.xlu0 %v4281_v35, %s4079_s27 }
  0xa1   :  { %1642 = vrot.lane.b32.xlu1 %v4286_v36, %s4079_s27 }
  0xa4   :  { %1630 = vrot.lane.b32.xlu0 %v4269_v33, %s4079_s27 }
  0xa5   :  { %1478 = vrot.lane.b32.xlu1 %v4206_v13, %s4078_s8 }
  0xa8   :  { %689 = vperm.xlu0 %3876, %v4328_v45  }
  0xa9   :  { %1640 = vrot.lane.b32.xlu1 %v4274_v34, %s4079_s27 }
  0xac   :  { %681 = vperm.xlu0 %3876, %v4323_v44  }
  0xad   :  { %1638 = vrot.lane.b32.xlu1 %v4206_v13, %s4079_s27 }
  0xb0   :  { %1796 = vrot.lane.b32.xlu0 %v4305_v39, %s4081_s28 }
  0xb1   :  { %685 = vperm.xlu1 %3877, %v4315_v42  }
  0xb5   :  { %3878 = vset.pattern.permute.xlu1 %v4080_v28 }
  0xb6   :  { %713 = vperm.xlu1 %3878, %v4328_v45   ;;  %v484_v45 = vld [vmem:[#allocation5 + $0x20] sm:$0xff] }
  0xba   :  { %709 = vperm.xlu1 %3878, %v4315_v42  }
  0xbe   :  { %1804 = vrot.lane.b32.xlu1 %v4298_v38, %s4081_s28 }
  0xbf   :  { %v232_v8 = vpop.permute.xlu0 %231 }
  0xc0   :  { %v242_v10 = vpop.permute.xlu1 %241 }
  0xc3   :  { %v237_v9 = vpop.permute.xlu0 %236 }
  0xc4   :  { %v247_v18 = vpop.permute.xlu1 %246 }
 0x115   :  { %v3624_v46 = vpop.f32.mrf.mxu0 }
 0x117   :  { %v3625_v47 = vpop.f32.mrf.mxu0 }
 0x118   :  { %v3626_v57 = vadd.f32 %v3625_v47, %v3624_v46  ;;  %v485_v46 = vld [vmem:[#allocation5 + $0x28] sm:$0xff]  ;;  %v483_v47 = vld [vmem:[#allocation5 + $0x18] sm:$0xff] }
 0x119   :  { %v3627_v48 = vpop.f32.mrf.mxu0 }
 0x11b   :  { %v3628_v49 = vpop.f32.mrf.mxu0 }
 0x11c   :  { %v3629_v56 = vadd.f32 %v3628_v49, %v3627_v48  ;;  %v482_v48 = vld [vmem:[#allocation5 + $0x10] sm:$0xff]  ;;  %v481_v49 = vld [vmem:[#allocation5 + $0x8] sm:$0xff] }
 0x11d   :  { %v3630_v50 = vpop.f32.mrf.mxu0 }
 0x11f   :  { %v3631_v51 = vpop.f32.mrf.mxu0 }
 0x120   :  { %v3632_v55 = vadd.f32 %v3631_v51, %v3630_v50  ;;  %v480_v50 = vld [vmem:[#allocation5] sm:$0xff] }
 0x121   :  { %v3633_v52 = vpop.f32.mrf.mxu0 }
 0x123   :  { %v3634_v53 = vpop.f32.mrf.mxu0 }
 0x124   :  { %v3635_v54 = vadd.f32 %v3634_v53, %v3633_v52  ;;  %v782_v53 = vpop.permute.xlu1 %781 }
 0x126   :  { %3704 = vmatprep.subr.mxu1 %v3635_v54 }
 0x127   :  { %3705 = vmatpush3.msra.mxu1 %v3635_v54 }
 0x128   :  { %3706 = vmatprep.subr.mxu1 %v3632_v55  ;;  %v780_v54 = vpop.permute.xlu1 %779 }
 0x129   :  { %3707 = vmatpush3.msra.mxu1 %v3632_v55 }
 0x12a   :  { %3708 = vmatprep.subr.mxu1 %v3629_v56 }
 0x12b   :  { %3709 = vmatpush3.msra.mxu1 %v3629_v56  ;;  %v618_v56 = vlaneseq }
 0x12c   :  { %3710 = vmatprep.subr.mxu1 %v3626_v57  ;;  %v788_v55 = vpop.permute.xlu1 %787 }
 0x12d   :  { %3711 = vmatpush3.msra.mxu1 %v3626_v57  ;;  %v619_v57 = vshrl.u32 %v618_v56, 7 }
 0x12e   :  { %3713 = vmatmul.mubr.msk.f32.vlgmr.msra.gmra.mxu1 %vm249_vm0, %v226_v58  ;;  %415 = vmatprep.subr.mxu1 %v378_v61  ;;  %v3491_v61 = vld [vmem:[%s5524_s4 + $0x1] ss:$8 sm:$0x3] }
 0x12f   :  { %3715 = vmatprep.mubr.msk.f32.mxu1 %vm249_vm0, %v227_v59  ;;  %416 = vmatpush1.msra.mxu1 %v377_v62  ;;  %v4427_v59 = vand.u32 127, %v618_v56 }
 0x130   :  { %417 = vmatprep.subr.mxu1 %v376_v63  ;;  %v786_v58 = vpop.permute.xlu1 %785 }
 0x131   :  { %418 = vmatpush1.msra.mxu1 %v375_v0  ;;  %vm791_vm1 = vcmp.lt.s32.totalorder %v4427_v59, 16  ;;  %v4436_v0 = vsub.s32 1, %v619_v57  ;;  %vm742_vm2 = vcmp.lt.s32.totalorder %v4427_v59, 17  ;;  %vm1044_vm3 = vcmp.lt.s32.totalorder %v4427_v59, 15 }
 0x132   :  { %3716 = vmatmul.mubr.msk.f32.gmra.mxu1 %vm249_vm0, %v228_v60  ;;  %419 = vmatprep.subr.mxu1 %v374_v2  ;;  %v4429_v60 = vsub.s32 0, %v619_v57  ;;  %v790_v2 = vpop.permute.xlu0 %789  ;;  %v798_v7 = vsel %vm791_vm1, %v788_v55, %v780_v54  ;;  %vm1204_vm4 = vcmp.lt.s32.totalorder %v4427_v59, 1  ;;  %vm1486_vm5 = vcmp.lt.s32.totalorder %v4427_v59, 127 }
 0x133   :  { %455 = vmatprep.mubr.f32.mxu1 %v5546_v1  ;;  %420 = vmatpush1.msra.mxu1 %v373_v3  ;;  %v810_v3 = vrot.slane %v3491_v61, %v4436_v0  ;;  %vm1646_vm6 = vcmp.lt.s32.totalorder %v4427_v59, 113  ;;  %vm1806_vm7 = vcmp.lt.s32.totalorder %v4427_v59, 112  ;;  %vm1966_vm8 = vcmp.lt.s32.totalorder %v4427_v59, 111  ;;  %v3558_v59 = vld [vmem:[%s5526_s6 + $0x100] sm:$0xff] }
 0x134   :  { %421 = vmatprep.subr.mxu1 %v372_v4  ;;  %v784_v62 = vpop.permute.xlu1 %783  ;;  %v806_v63 = vrot.slane %v3491_v61, %v4429_v60  ;;  %v795_v4 = vsel %vm791_vm1, %v782_v53, %v790_v2 }
 0x135   :  { %422 = vmatpush1.msra.mxu1 %v371_v5  ;;  %v799_v5 = vsel %vm791_vm1, %v790_v2, %v782_v53  ;;  %v3504_v53 = vld [vmem:[%s5524_s4 + $0x2] ss:$8 sm:$0x3] }
 0x136   :  { %512 = vmatprep.subr.mxu1 %v487_v6 }
 0x138   :  { %v739_v6 = vpop.permute.xlu1 %738 }
 0x1ee   :  { %v3714_v11 = vpop.f32.mrf.mxu1 }
 0x1ef   :  { %v334_v12 = vadd.f32 %v3714_v11, %v237_v9  ;;  %v820_v9 = vmul.f32 %v810_v3, %v795_v4  ;;  %v817_v11 = vmul.f32 %v806_v63, %v798_v7  ;;  %v3492_v4 = vld [vmem:[%s5526_s6 + $0x20] sm:$0xff] }
 0x1f0   :  { %v328_v14 = vpop.f32.mrf.mxu1 }
 0x1f1   :  { %v3480_v15 = vmul.f32 -1.442695, %v334_v12  ;;  %v329_v16 = vadd.f32 %v328_v14, %v232_v8  ;;  %v819_v8 = vmul.f32 %v806_v63, %v799_v5  ;;  %862 = vmatprep.subr.mxu0 %v820_v9  ;;  %v778_v12 = vpop.permute.xlu0 %777  ;;  %v737_v14 = vpop.permute.xlu1 %736 }
 0x1f2   :  { %v3717_v17 = vpop.f32.mrf.mxu1 }
 0x1f3   :  { %v3479_v19 = vmul.f32 -1.442695, %v329_v16  ;;  %3884 = vpow2.f32 %v3480_v15  ;;  %v344_v21 = vadd.f32 %v3717_v17, %v247_v18  ;;  %863 = vmatpush1.msra.mxu0 %v819_v8  ;;  %v793_v15 = vsel %vm791_vm1, %v778_v12, %v786_v58 }
 0x1f4   :  { %v338_v20 = vpop.f32.mrf.mxu1  ;;  %v797_v16 = vsel %vm791_vm1, %v786_v58, %v778_v12 }
 0x1f5   :  { %3886 = vpow2.f32 %v3479_v19  ;;  %v339_v22 = vadd.f32 %v338_v20, %v242_v10  ;;  %v3482_v24 = vmul.f32 -1.442695, %v344_v21  ;;  %v794_v10 = vsel %vm791_vm1, %v780_v54, %v788_v55  ;;  %v1043_v20 = vpop.permute.xlu1 %1042  ;;  %v776_v21 = vpop.permute.xlu0 %775 }
 0x1f6   :  { %v818_v17 = vmul.f32 %v810_v3, %v794_v10  ;;  %v815_v18 = vmul.f32 %v806_v63, %v797_v16  ;;  %v816_v19 = vmul.f32 %v810_v3, %v793_v15  ;;  %v1059_v54 = vrot.slane %v3504_v53, %v4429_v60 }
 0x1f7   :  { %v3481_v23 = vmul.f32 -1.442695, %v339_v22  ;;  %v792_v22 = vsel %vm791_vm1, %v776_v21, %v784_v62  ;;  %v1063_v55 = vrot.slane %v3504_v53, %v4436_v0  ;;  %v772_v53 = vld [vmem:[%s5526_s6 + $0x8] sm:$0xff] }
 0x1f8   :  { %864 = vmatprep.subr.mxu0 %v818_v17 }
 0x1f9   :  { %3888 = vpow2.f32 %v3481_v23  ;;  %865 = vmatpush1.msra.mxu0 %v817_v11  ;;  %v796_v23 = vsel %vm791_vm1, %v784_v62, %v776_v21 }
 0x1fa   :  { %3890 = vpow2.f32 %v3482_v24  ;;  %866 = vmatprep.subr.mxu0 %v816_v19  ;;  %v813_v24 = vmul.f32 %v806_v63, %v796_v23 }
 0x1fb   :  { %867 = vmatpush1.msra.mxu0 %v815_v18 }
 0x200   :  { %v3885_v25 = vpop.eup %3884 }
 0x201   :  { %v360_v29 = vadd.f32 1.0, %v3885_v25  ;;  %v814_v25 = vmul.f32 %v810_v3, %v792_v22 }
 0x202   :  { %v3887_v26 = vpop.eup %3886 }
 0x203   :  { %v359_v27 = vadd.f32 1.0, %v3887_v26  ;;  %868 = vmatprep.subr.mxu0 %v814_v25  ;;  %v735_v26 = vpop.permute.xlu1 %734 }
 0x204   :  { %869 = vmatpush1.msra.mxu0 %v813_v24 }
 0x205   :  { %3892 = vrcp.f32 %v359_v27  ;;  %v731_v27 = vpop.permute.xlu0 %730  ;;  %3496 = vmatmul.mubr.msk.f32.vlgmr.msra.gmra.mxu0 %vm249_vm0, %v3492_v4 }
 0x206   :  { %v3889_v30 = vpop.eup %3888  ;;  %3894 = vrcp.f32 %v360_v29  ;;  %v751_v29 = vld [vmem:[%s5524_s4] ss:$8 sm:$0x3]  ;;  %908 = vmatprep.mubr.f32.mxu0 %v5546_v1 }
 0x207   :  { %v361_v31 = vadd.f32 1.0, %v3889_v30  ;;  %v3891_v32 = vpop.eup %3890  ;;  %v756_v30 = vrot.slane %v751_v29, %v4429_v60 }
 0x208   :  { %v362_v40 = vadd.f32 1.0, %v3891_v32  ;;  %v746_v32 = vsel %vm742_vm2, %v731_v27, %v739_v6 }
 0x209   :  { %3896 = vrcp.f32 %v361_v31  ;;  %v760_v31 = vrot.slane %v751_v29, %v4436_v0 }
 0x20a   :  { %3898 = vrcp.f32 %v362_v40  ;;  %v750_v40 = vsel %vm742_vm2, %v739_v6, %v731_v27  ;;  %v3513_v27 = vld [vmem:[%s5524_s4 + $0x3] ss:$8 sm:$0x3] }
 0x212   :  { %v3893_v44 = vpop.eup %3892 }
 0x213   :  { %3483 = vmatmul.mubr.msk.f32.vlgmr.msra.gmra.mxu1 %vm249_vm0, %v3893_v44  ;;  %v3895_v42 = vpop.eup %3894 }
 0x214   :  { %461 = vmatprep.mubr.f32.mxu1 %v5546_v1  ;;  %513 = vmatpush1.msra.mxu1 %v486_v41  ;;  %v1041_v41 = vpop.permute.xlu1 %1040 }
 0x215   :  { %514 = vmatprep.subr.mxu1 %v485_v46  ;;  %v770_v46 = vmul.f32 %v760_v31, %v746_v32 }
 0x216   :  { %515 = vmatpush1.msra.mxu1 %v484_v45  ;;  %v3897_v51 = vpop.eup %3896  ;;  %v769_v45 = vmul.f32 %v756_v30, %v750_v40  ;;  %v1219_v40 = vrot.slane %v3513_v27, %v4429_v60 }
 0x217   :  { %3484 = vmatmul.mubr.msk.f32.gmra.mxu1 %vm249_vm0, %v3895_v42  ;;  %516 = vmatprep.subr.mxu1 %v483_v47  ;;  %v3899_v52 = vpop.eup %3898 }
 0x218   :  { %467 = vmatprep.mubr.f32.mxu1 %v5546_v1  ;;  %517 = vmatpush1.msra.mxu1 %v482_v48 }
 0x219   :  { %518 = vmatprep.subr.mxu1 %v481_v49 }
 0x21a   :  { %519 = vmatpush1.msra.mxu1 %v480_v50  ;;  %v733_v50 = vpop.permute.xlu1 %732 }
 0x21b   :  { %3485 = vmatmul.mubr.msk.f32.gmra.mxu1 %vm249_vm0, %v3897_v51  ;;  %3844 = vmatprep.subr.mxu1 %v820_v9 }
 0x21c   :  { %473 = vmatprep.mubr.f32.mxu1 %v5546_v1 }
 0x21e   :  { %v1039_v58 = vpop.permute.xlu1 %1038 }
 0x21f   :  { %3486 = vmatmul.mubr.msk.f32.gmra.mxu1 %vm249_vm0, %v3899_v52 }
 0x220   :  { %552 = vmatprep.mubr.f32.mxu1 %v5546_v1 }
 0x222   :  { %v1037_v7 = vpop.permute.xlu1 %1036 }
 0x223   :  { %3487 = vmatmul.mubr.msk.f32.vlgmr.msra.gmra.mxu1 %vm249_vm0, %v3893_v44  ;;  %v729_v44 = vpop.permute.xlu0 %728 }
 0x224   :  { %558 = vmatprep.mubr.f32.mxu1 %v5546_v1  ;;  %3848 = vmatpush1.msra.mxu1 %v819_v8  ;;  %v745_v47 = vsel %vm742_vm2, %v729_v44, %v737_v14  ;;  %v749_v48 = vsel %vm742_vm2, %v737_v14, %v729_v44  ;;  %v3495_v14 = vld [vmem:[%s5526_s6 + $0x38] sm:$0xff] }
 0x225   :  { %3845 = vmatprep.subr.mxu1 %v818_v17  ;;  %v767_v49 = vmul.f32 %v756_v30, %v749_v48 }
 0x226   :  { %3849 = vmatpush1.msra.mxu1 %v817_v11  ;;  %v1203_v15 = vpop.permute.xlu1 %1202 }
 0x227   :  { %3488 = vmatmul.mubr.msk.f32.gmra.mxu1 %vm249_vm0, %v3895_v42  ;;  %3846 = vmatprep.subr.mxu1 %v816_v19  ;;  %v768_v42 = vmul.f32 %v760_v31, %v745_v47  ;;  %v771_v47 = vld [vmem:[%s5526_s6] sm:$0xff] }
 0x228   :  { %564 = vmatprep.mubr.f32.mxu1 %v5546_v1  ;;  %3850 = vmatpush1.msra.mxu1 %v815_v18 }
 0x229   :  { %3847 = vmatprep.subr.mxu1 %v814_v25 }
 0x22a   :  { %3851 = vmatpush1.msra.mxu1 %v813_v24  ;;  %v1193_v21 = vpop.permute.xlu1 %1192 }
 0x22b   :  { %3489 = vmatmul.mubr.msk.f32.gmra.mxu1 %vm249_vm0, %v3897_v51  ;;  %963 = vmatprep.subr.mxu1 %v770_v46  ;;  %v1035_v51 = vpop.permute.xlu0 %1034 }
 0x22c   :  { %570 = vmatprep.mubr.f32.mxu1 %v5546_v1  ;;  %v1048_v56 = vsel %vm1044_vm3, %v1035_v51, %v1043_v20  ;;  %v1052_v57 = vsel %vm1044_vm3, %v1043_v20, %v1035_v51 }
 0x22d   :  { %v1072_v62 = vmul.f32 %v1059_v54, %v1052_v57  ;;  %v1073_v63 = vmul.f32 %v1063_v55, %v1048_v56 }
 0x22e   :  { %v1201_v29 = vpop.permute.xlu1 %1200 }
 0x22f   :  { %3490 = vmatmul.mubr.msk.f32.gmra.mxu1 %vm249_vm0, %v3899_v52  ;;  %v3494_v52 = vld [vmem:[%s5526_s6 + $0x30] sm:$0xff]  ;;  %v727_v61 = vpop.permute.xlu0 %726  ;;  %1115 = vmatprep.subr.mxu0 %v1073_v63  ;;  %v1211_v48 = vsel %vm1204_vm4, %v1201_v29, %v1193_v21 }
 0x230   :  { %914 = vmatprep.mubr.f32.mxu1 %v5546_v1  ;;  %v744_v2 = vsel %vm742_vm2, %v727_v61, %v735_v26  ;;  %v748_v3 = vsel %vm742_vm2, %v735_v26, %v727_v61  ;;  %1116 = vmatpush1.msra.mxu0 %v1072_v62  ;;  %v1230_v57 = vmul.f32 %v1219_v40, %v1211_v48 }
 0x231   :  { %v765_v5 = vmul.f32 %v756_v30, %v748_v3  ;;  %v766_v6 = vmul.f32 %v760_v31, %v744_v2 }
 0x233   :  { %3498 = vmatmul.mubr.msk.f32.vlgmr.msra.gmra.mxu1 %vm249_vm0, %v3494_v52  ;;  %v1033_v8 = vpop.permute.xlu0 %1032 }
 0x234   :  { %964 = vmatpush1.msra.mxu1 %v769_v45  ;;  %920 = vmatprep.mubr.f32.mxu1 %v5546_v1  ;;  %v1047_v9 = vsel %vm1044_vm3, %v1033_v8, %v1041_v41  ;;  %v1051_v10 = vsel %vm1044_vm3, %v1041_v41, %v1033_v8  ;;  %v1223_v41 = vrot.slane %v3513_v27, %v4436_v0  ;;  %v3493_v8 = vld [vmem:[%s5526_s6 + $0x28] sm:$0xff]  ;;  %v3514_v27 = vld [vmem:[%s5526_s6 + $0x60] sm:$0xff] }
 0x235   :  { %965 = vmatprep.subr.mxu1 %v768_v42  ;;  %v1070_v11 = vmul.f32 %v1059_v54, %v1051_v10  ;;  %v1071_v12 = vmul.f32 %v1063_v55, %v1047_v9  ;;  %v1207_v45 = vsel %vm1204_vm4, %v1193_v21, %v1201_v29  ;;  %v1199_v42 = vpop.permute.xlu1 %1198  ;;  %v773_v9 = vld [vmem:[%s5526_s6 + $0x10] sm:$0xff]  ;;  %v3530_v10 = vld [vmem:[%s5524_s4 + $0x5] ss:$8 sm:$0x3]  ;;  %3497 = vmatmul.mubr.msk.f32.gmra.mxu0 %vm249_vm0, %v3493_v8 }
 0x236   :  { %966 = vmatpush1.msra.mxu1 %v767_v49  ;;  %1155 = vmatprep.mubr.f32.mxu0 %v5546_v1 }
 0x237   :  { %967 = vmatprep.subr.mxu1 %v766_v6  ;;  %3499 = vmatmul.mubr.msk.f32.gmra.mxu1 %vm249_vm0, %v3495_v14  ;;  %v725_v16 = vpop.permute.xlu0 %724 }
 0x238   :  { %968 = vmatpush1.msra.mxu1 %v765_v5  ;;  %1117 = vmatprep.subr.mxu0 %v1071_v12  ;;  %v743_v17 = vsel %vm742_vm2, %v725_v16, %v733_v50  ;;  %v747_v18 = vsel %vm742_vm2, %v733_v50, %v725_v16  ;;  %v3474_v50 = vld [vmem:[%s5524_s4 + $0x4] ss:$8 sm:$0x3] }
 0x239   :  { %1003 = vmatprep.mubr.f32.mxu1 %v5546_v1  ;;  %1118 = vmatpush1.msra.mxu0 %v1070_v11  ;;  %v763_v19 = vmul.f32 %v756_v30, %v747_v18  ;;  %v764_v20 = vmul.f32 %v760_v31, %v743_v17  ;;  %v1189_v61 = vpop.permute.xlu1 %1188  ;;  %v4549_v4 = vrot.slane %v3474_v50, %v4429_v60 }
 0x23a   :  { %v4573_v18 = vrot.slane %v3530_v10, %v4436_v0 }
 0x23b   :  { %v1031_v22 = vpop.permute.xlu0 %1030  ;;  %969 = vmatprep.subr.mxu1 %v764_v20  ;;  %v1354_v20 = vmul.f32 %v4549_v4, %v4305_v39  ;;  %v1352_v29 = vmul.f32 %v4549_v4, %v4293_v37 }
 0x23c   :  { %v1046_v23 = vsel %vm1044_vm3, %v1031_v22, %v1039_v58  ;;  %v1050_v24 = vsel %vm1044_vm3, %v1039_v58, %v1031_v22  ;;  %970 = vmatpush1.msra.mxu1 %v763_v19  ;;  %v4540_v58 = vrot.slane %v3474_v50, %v4436_v0  ;;  %v3505_v19 = vld [vmem:[%s5526_s6 + $0x40] sm:$0xff] }
 0x23d   :  { %v1068_v25 = vmul.f32 %v1059_v54, %v1050_v24  ;;  %v1069_v26 = vmul.f32 %v1063_v55, %v1046_v23  ;;  %3500 = vmatmul.mubr.msk.f32.vlgmr.msra.gmra.mxu1 %vm249_vm0, %v771_v47  ;;  %v1197_v6 = vpop.permute.xlu1 %1196 }
 0x23e   :  { %1009 = vmatprep.mubr.f32.mxu1 %v5546_v1  ;;  %v1355_v11 = vmul.f32 %v4540_v58, %v4298_v38  ;;  %v1205_v12 = vsel %vm1204_vm4, %v1189_v61, %v1197_v6  ;;  %v1209_v14 = vsel %vm1204_vm4, %v1197_v6, %v1189_v61  ;;  %v774_v38 = vld [vmem:[%s5526_s6 + $0x18] sm:$0xff]  ;;  %v1353_v23 = vmul.f32 %v4540_v58, %v4286_v36  ;;  %v3506_v36 = vld [vmem:[%s5526_s6 + $0x48] sm:$0xff]  ;;  %v3522_v61 = vld [vmem:[%s5526_s6 + $0x80] sm:$0xff] }
 0x23f   :  { %v1029_v32 = vpop.permute.xlu0 %1028  ;;  %1119 = vmatprep.subr.mxu0 %v1069_v26  ;;  %v1226_v16 = vmul.f32 %v1219_v40, %v1209_v14  ;;  %v1227_v17 = vmul.f32 %v1223_v41, %v1205_v12  ;;  %v1349_v47 = vmul.f32 %v4540_v58, %v4206_v13 }
 0x240   :  { %v1045_v30 = vsel %vm1044_vm3, %v1029_v32, %v1037_v7  ;;  %v1049_v31 = vsel %vm1044_vm3, %v1037_v7, %v1029_v32  ;;  %1120 = vmatpush1.msra.mxu0 %v1068_v25 }
 0x241   :  { %v1066_v44 = vmul.f32 %v1059_v54, %v1049_v31  ;;  %v1067_v46 = vmul.f32 %v1063_v55, %v1045_v30  ;;  %v1231_v54 = vmul.f32 %v1223_v41, %v1207_v45  ;;  %3501 = vmatmul.mubr.msk.f32.gmra.mxu1 %vm249_vm0, %v772_v53  ;;  %v1485_v21 = vpop.permute.xlu1 %1484  ;;  %v1351_v30 = vmul.f32 %v4540_v58, %v4274_v34  ;;  %v3507_v34 = vld [vmem:[%s5526_s6 + $0x50] sm:$0xff]  ;;  %v3539_v45 = vld [vmem:[%s5524_s4 + $0x6] ss:$8 sm:$0x3] }
 0x242   :  { %1015 = vmatprep.mubr.f32.mxu1 %v5546_v1  ;;  %v4635_v13 = vrot.slane %v3539_v45, %v4429_v60  ;;  %v4638_v50 = vrot.slane %v3539_v45, %v4436_v0  ;;  %v3516_v53 = vld [vmem:[%s5526_s6 + $0x70] sm:$0xff] }
 0x243   :  { %v1195_v49 = vpop.permute.xlu0 %1194  ;;  %1121 = vmatprep.subr.mxu0 %v1067_v46  ;;  %v1350_v46 = vmul.f32 %v4549_v4, %v4281_v35  ;;  %v3515_v35 = vld [vmem:[%s5526_s6 + $0x68] sm:$0xff] }
 0x244   :  { %v1208_v51 = vsel %vm1204_vm4, %v1195_v49, %v1203_v15  ;;  %v1212_v52 = vsel %vm1204_vm4, %v1203_v15, %v1195_v49  ;;  %1122 = vmatpush1.msra.mxu0 %v1066_v44  ;;  %v4569_v15 = vrot.slane %v3530_v10, %v4429_v60 }
 0x245   :  { %v1232_v55 = vmul.f32 %v1219_v40, %v1212_v52  ;;  %v1233_v56 = vmul.f32 %v1223_v41, %v1208_v51  ;;  %3502 = vmatmul.mubr.msk.f32.gmra.mxu1 %vm249_vm0, %v773_v9  ;;  %1397 = vmatprep.subr.mxu0 %v1355_v11  ;;  %v1481_v31 = vpop.permute.xlu1 %1480 }
 0x246   :  { %1021 = vmatprep.mubr.f32.mxu1 %v5546_v1  ;;  %3509 = vmatmul.mubr.msk.f32.vlgmr.msra.gmra.mxu0 %vm249_vm0, %v3505_v19 }
 0x247   :  { %v1191_v62 = vpop.permute.xlu0 %1190  ;;  %1275 = vmatprep.subr.mxu1 %v1233_v56  ;;  %1161 = vmatprep.mubr.f32.mxu0 %v5546_v1 }
 0x248   :  { %v1206_v63 = vsel %vm1204_vm4, %v1191_v62, %v1199_v42  ;;  %v1210_v2 = vsel %vm1204_vm4, %v1199_v42, %v1191_v62  ;;  %1276 = vmatpush1.msra.mxu1 %v1232_v55  ;;  %1398 = vmatpush1.msra.mxu0 %v1354_v20  ;;  %v1348_v42 = vmul.f32 %v4549_v4, %v4269_v33  ;;  %v3508_v33 = vld [vmem:[%s5526_s6 + $0x58] sm:$0xff] }
 0x249   :  { %v1229_v3 = vmul.f32 %v1223_v41, %v1206_v63  ;;  %1277 = vmatprep.subr.mxu1 %v1231_v54  ;;  %v1228_v5 = vmul.f32 %v1219_v40, %v1210_v2  ;;  %3503 = vmatmul.mubr.msk.f32.gmra.mxu1 %vm249_vm0, %v774_v38  ;;  %v1643_v49 = vpop.permute.xlu1 %1642  ;;  %v3517_v2 = vld [vmem:[%s5526_s6 + $0x78] sm:$0xff] }
 0x24a   :  { %1278 = vmatpush1.msra.mxu1 %v1230_v57  ;;  %1315 = vmatprep.mubr.f32.mxu1 %v5546_v1 }
 0x24b   :  { %v1477_v7 = vpop.permute.xlu0 %1476  ;;  %1279 = vmatprep.subr.mxu1 %v1229_v3  ;;  %1399 = vmatprep.subr.mxu0 %v1353_v23 }
 0x24c   :  { %1280 = vmatpush1.msra.mxu1 %v1228_v5  ;;  %v1490_v24 = vsel %vm1486_vm5, %v1477_v7, %v1485_v21  ;;  %v1494_v25 = vsel %vm1486_vm5, %v1485_v21, %v1477_v7  ;;  %3510 = vmatmul.mubr.msk.f32.gmra.mxu0 %vm249_vm0, %v3506_v36 }
 0x24d   :  { %1281 = vmatprep.subr.mxu1 %v1227_v17  ;;  %v1514_v26 = vmul.f32 %v4569_v15, %v1490_v24  ;;  %v1515_v39 = vmul.f32 %v4573_v18, %v1494_v25  ;;  %1167 = vmatprep.mubr.f32.mxu0 %v5546_v1  ;;  %v1479_v52 = vpop.permute.xlu1 %1478 }
 0x24e   :  { %1282 = vmatpush1.msra.mxu1 %v1226_v16  ;;  %1400 = vmatpush1.msra.mxu0 %v1352_v29 }
 0x24f   :  { %v1475_v22 = vpop.permute.xlu0 %1474  ;;  %1557 = vmatprep.subr.mxu1 %v1515_v39  ;;  %3518 = vmatmul.mubr.msk.f32.vlgmr.msra.gmra.mxu1 %vm249_vm0, %v3514_v27 }
 0x250   :  { %1558 = vmatpush1.msra.mxu1 %v1514_v26  ;;  %1321 = vmatprep.mubr.f32.mxu1 %v5546_v1 }
 0x251   :  { %1401 = vmatprep.subr.mxu0 %v1351_v30  ;;  %3511 = vmatmul.mubr.msk.f32.gmra.mxu0 %vm249_vm0, %v3507_v34  ;;  %v1641_v63 = vpop.permute.xlu1 %1640 }
 0x252   :  { %1173 = vmatprep.mubr.f32.mxu0 %v5546_v1  ;;  %1402 = vmatpush1.msra.mxu0 %v1350_v46 }
 0x253   :  { %v1483_v32 = vpop.permute.xlu0 %1482  ;;  %1403 = vmatprep.subr.mxu0 %v1349_v47  ;;  %3519 = vmatmul.mubr.msk.f32.gmra.mxu1 %vm249_vm0, %v3515_v35 }
 0x254   :  { %v1489_v40 = vsel %vm1486_vm5, %v1475_v22, %v1483_v32  ;;  %v1493_v41 = vsel %vm1486_vm5, %v1483_v32, %v1475_v22  ;;  %1404 = vmatpush1.msra.mxu0 %v1348_v42  ;;  %1327 = vmatprep.mubr.f32.mxu1 %v5546_v1  ;;  %v3531_v22 = vld [vmem:[%s5526_s6 + $0xa0] sm:$0xff] }
 0x255   :  { %v1512_v44 = vmul.f32 %v4569_v15, %v1489_v40  ;;  %v1513_v37 = vmul.f32 %v4573_v18, %v1493_v41  ;;  %3512 = vmatmul.mubr.msk.f32.gmra.mxu0 %vm249_vm0, %v3508_v33  ;;  %v1639_v9 = vpop.permute.xlu1 %1638  ;;  %v3548_v40 = vld [vmem:[%s5524_s4 + $0x7] ss:$8 sm:$0x3] }
 0x256   :  { %1437 = vmatprep.mubr.f32.mxu0 %v5546_v1  ;;  %v4722_v34 = vrot.slane %v3548_v40, %v4436_v0 }
 0x257   :  { %v1637_v48 = vpop.permute.xlu0 %1636  ;;  %1559 = vmatprep.subr.mxu1 %v1513_v37  ;;  %3520 = vmatmul.mubr.msk.f32.gmra.mxu1 %vm249_vm0, %v3516_v53  ;;  %v4719_v37 = vrot.slane %v3548_v40, %v4429_v60 }
 0x258   :  { %1560 = vmatpush1.msra.mxu1 %v1512_v44  ;;  %1333 = vmatprep.mubr.f32.mxu1 %v5546_v1 }
 0x259   :  { %3526 = vmatmul.mubr.msk.f32.vlgmr.msra.gmra.mxu0 %vm249_vm0, %v3522_v61  ;;  %v4681_v17 = vpop.permute.xlu1 %685 }
 0x25a   :  { %1443 = vmatprep.mubr.f32.mxu0 %v5546_v1 }
 0x25b   :  { %v1645_v51 = vpop.permute.xlu0 %1644  ;;  %3521 = vmatmul.mubr.msk.f32.gmra.mxu1 %vm249_vm0, %v3517_v2  ;;  %v4741_v2 = vld [vmem:[%s5520_s0 + $0x8] sm:$0xff] }
 0x25c   :  { %v1650_v54 = vsel %vm1646_vm6, %v1637_v48, %v1645_v51  ;;  %v1654_v55 = vsel %vm1646_vm6, %v1645_v51, %v1637_v48  ;;  %1597 = vmatprep.mubr.f32.mxu1 %v5546_v1 }
 0x25d   :  { %v1674_v56 = vmul.f32 %v4635_v13, %v1650_v54  ;;  %v1675_v57 = vmul.f32 %v4638_v50, %v1654_v55 }
 0x25f   :  { %1717 = vmatprep.subr.mxu0 %v1675_v57  ;;  %v1473_v62 = vpop.permute.xlu0 %1472 }
 0x260   :  { %v1488_v3 = vsel %vm1486_vm5, %v1473_v62, %v1481_v31  ;;  %v1492_v5 = vsel %vm1486_vm5, %v1481_v31, %v1473_v62  ;;  %1718 = vmatpush1.msra.mxu0 %v1674_v56  ;;  %v4733_v62 = vld [vmem:[%s5520_s0] sm:$0xff] }
 0x261   :  { %v1510_v6 = vmul.f32 %v4569_v15, %v1488_v3  ;;  %v1511_v7 = vmul.f32 %v4573_v18, %v1492_v5 }
 0x263   :  { %v1635_v8 = vpop.permute.xlu0 %1634  ;;  %1561 = vmatprep.subr.mxu1 %v1511_v7 }
 0x264   :  { %v1649_v10 = vsel %vm1646_vm6, %v1635_v8, %v1643_v49  ;;  %v1653_v11 = vsel %vm1646_vm6, %v1643_v49, %v1635_v8  ;;  %1562 = vmatpush1.msra.mxu1 %v1510_v6 }
 0x265   :  { %v1672_v12 = vmul.f32 %v4635_v13, %v1649_v10  ;;  %v1673_v14 = vmul.f32 %v4638_v50, %v1653_v11  ;;  %v4751_v10 = vld [vmem:[%s5520_s0 + $0x10] sm:$0xff] }
 0x267   :  { %v1471_v16 = vpop.permute.xlu0 %1470  ;;  %1719 = vmatprep.subr.mxu0 %v1673_v14 }
 0x268   :  { %v1487_v38 = vsel %vm1486_vm5, %v1471_v16, %v1479_v52  ;;  %v1491_v19 = vsel %vm1486_vm5, %v1479_v52, %v1471_v16  ;;  %1720 = vmatpush1.msra.mxu0 %v1672_v12  ;;  %v4759_v12 = vld [vmem:[%s5520_s0 + $0x18] sm:$0xff] }
 0x269   :  { %v1508_v20 = vmul.f32 %v4569_v15, %v1487_v38  ;;  %v1509_v21 = vmul.f32 %v4573_v18, %v1491_v19  ;;  %v4698_v15 = vpop.permute.xlu1 %713 }
 0x26b   :  { %v1633_v23 = vpop.permute.xlu0 %1632  ;;  %1563 = vmatprep.subr.mxu1 %v1509_v21 }
 0x26c   :  { %v1648_v24 = vsel %vm1646_vm6, %v1633_v23, %v1641_v63  ;;  %v1652_v25 = vsel %vm1646_vm6, %v1641_v63, %v1633_v23  ;;  %1564 = vmatpush1.msra.mxu1 %v1508_v20 }
 0x26d   :  { %v1670_v26 = vmul.f32 %v4635_v13, %v1648_v24  ;;  %v1671_v39 = vmul.f32 %v4638_v50, %v1652_v25  ;;  %3535 = vmatmul.mubr.msk.f32.vlgmr.msra.gmra.mxu1 %vm249_vm0, %v3531_v22  ;;  %v4710_v31 = vpop.permute.xlu1 %709  ;;  %v3940_v22 = vld [vmem:[%s5520_s0 + $0x20] sm:$0xff]  ;;  %v3941_v24 = vld [vmem:[%s5520_s0 + $0x28] sm:$0xff] }
 0x26e   :  { %1603 = vmatprep.mubr.f32.mxu1 %v5546_v1 }
 0x26f   :  { %v1631_v18 = vpop.permute.xlu0 %1630  ;;  %1721 = vmatprep.subr.mxu0 %v1671_v39 }
 0x270   :  { %v1647_v36 = vsel %vm1646_vm6, %v1631_v18, %v1639_v9  ;;  %v1651_v27 = vsel %vm1646_vm6, %v1639_v9, %v1631_v18  ;;  %1722 = vmatpush1.msra.mxu0 %v1670_v26 }
 0x271   :  { %v1668_v29 = vmul.f32 %v4635_v13, %v1647_v36  ;;  %v1669_v32 = vmul.f32 %v4638_v50, %v1651_v27  ;;  %v1805_v44 = vpop.permute.xlu1 %1804  ;;  %v3942_v27 = vld [vmem:[%s5520_s0 + $0x30] sm:$0xff] }
 0x273   :  { %v4708_v30 = vpop.permute.xlu0 %689  ;;  %1723 = vmatprep.subr.mxu0 %v1669_v32  ;;  %v3943_v32 = vld [vmem:[%s5520_s0 + $0x38] sm:$0xff] }
 0x274   :  { %1724 = vmatpush1.msra.mxu0 %v1668_v29 }
 0x277   :  { %v4715_v41 = vpop.permute.xlu0 %681 }
 0x27b   :  { %v1797_v46 = vpop.permute.xlu0 %1796 }
 0x27c   :  { %v1810_v45 = vsel %vm1806_vm7, %v1797_v46, %v1805_v44  ;;  %v1814_v47 = vsel %vm1806_vm7, %v1805_v44, %v1797_v46  ;;  %v4793_v46 = vld [vmem:[%s5527_s7 + $0x8] sm:$0xff] }
 0x27d   :  { %v1834_v48 = vmul.f32 %v4719_v37, %v1810_v45  ;;  %v1835_v42 = vmul.f32 %v4722_v34, %v1814_v47  ;;  %v4801_v45 = vld [vmem:[%s5527_s7] sm:$0xff]  ;;  %v3523_v47 = vld [vmem:[%s5526_s6 + $0x88] sm:$0xff] }
 0x27e   :  { %3527 = vmatmul.mubr.msk.f32.gmra.mxu0 %vm249_vm0, %v3523_v47 }
 0x27f   :  { %1877 = vmatprep.subr.mxu1 %v1835_v42  ;;  %1449 = vmatprep.mubr.f32.mxu0 %v5546_v1  ;;  %v3533_v42 = vld [vmem:[%s5526_s6 + $0xb0] sm:$0xff] }
 0x280   :  { %1878 = vmatpush1.msra.mxu1 %v1834_v48  ;;  %v3524_v48 = vld [vmem:[%s5526_s6 + $0x90] sm:$0xff] }
 0x282   :  { %3528 = vmatmul.mubr.msk.f32.gmra.mxu0 %vm249_vm0, %v3524_v48 }
 0x283   :  { %1455 = vmatprep.mubr.f32.mxu0 %v5546_v1 }
 0x2d3   :  { %v457_v49 = vpop.f32.mrf.mxu1 }
 0x2d5   :  { %v459_v35 = vpop.f32.mrf.mxu1 }
 0x2d7   :  { %v463_v13 = vpop.f32.mrf.mxu1 }
 0x2d9   :  { %v465_v50 = vpop.f32.mrf.mxu1 }
 0x2db   :  { %v469_v33 = vpop.f32.mrf.mxu1 }
 0x2dd   :  { %v471_v51 = vpop.f32.mrf.mxu1 }
 0x2df   :  { %v475_v52 = vpop.f32.mrf.mxu1 }
 0x2e1   :  { %v477_v53 = vpop.f32.mrf.mxu1 }
 0x2e3   :  { %v554_v54 = vpop.f32.mrf.mxu1 }
 0x2e4   :  { %v577_v55 = vmul.f32 %v554_v54, %v457_v49  ;;  %v3525_v49 = vld [vmem:[%s5526_s6 + $0x98] sm:$0xff] }
 0x2e5   :  { %v556_v56 = vpop.f32.mrf.mxu1  ;;  %3529 = vmatmul.mubr.msk.f32.gmra.mxu0 %vm249_vm0, %v3525_v49 }
 0x2e6   :  { %v578_v57 = vmul.f32 %v556_v56, %v459_v35  ;;  %v4736_v63 = vmul.f32 %v4733_v62, %v577_v55  ;;  %v3534_v35 = vld [vmem:[%s5526_s6 + $0xb8] sm:$0xff]  ;;  %1757 = vmatprep.mubr.f32.mxu0 %v5546_v1 }
 0x2e7   :  { %v560_v61 = vpop.f32.mrf.mxu1 }
 0x2e8   :  { %v4744_v3 = vmul.f32 %v4741_v2, %v578_v57  ;;  %v579_v5 = vmul.f32 %v560_v61, %v463_v13  ;;  %v3540_v13 = vld [vmem:[%s5526_s6 + $0xc0] sm:$0xff] }
 0x2e9   :  { %v562_v6 = vpop.f32.mrf.mxu1  ;;  %3544 = vmatmul.mubr.msk.f32.vlgmr.msra.gmra.mxu0 %vm249_vm0, %v3540_v13  ;;  %v3557_v13 = vld [vmem:[%s5524_s4 + $0x10] ss:$8 sm:$0x3] }
 0x2ea   :  { %v580_v7 = vmul.f32 %v562_v6, %v465_v50  ;;  %v593_v8 = vadd.f32 %v4744_v3, %v4736_v63  ;;  %v4754_v11 = vmul.f32 %v4751_v10, %v579_v5  ;;  %1763 = vmatprep.mubr.f32.mxu0 %v5546_v1  ;;  %v3541_v50 = vld [vmem:[%s5526_s6 + $0xc8] sm:$0xff] }
 0x2eb   :  { %v566_v9 = vpop.f32.mrf.mxu1 }
 0x2ec   :  { %v4762_v14 = vmul.f32 %v4759_v12, %v580_v7  ;;  %v581_v16 = vmul.f32 %v566_v9, %v469_v33  ;;  %594 = vadd.xlane.f32.xlu0 %v593_v8  ;;  %v3542_v33 = vld [vmem:[%s5526_s6 + $0xd0] sm:$0xff] }
 0x2ed   :  { %v568_v38 = vpop.f32.mrf.mxu1  ;;  %3545 = vmatmul.mubr.msk.f32.gmra.mxu0 %vm249_vm0, %v3541_v50 }
 0x2ee   :  { %v582_v19 = vmul.f32 %v568_v38, %v471_v51  ;;  %v596_v20 = vadd.f32 %v4762_v14, %v4754_v11  ;;  %v4769_v23 = vmul.f32 %v3940_v22, %v581_v16  ;;  %1769 = vmatprep.mubr.f32.mxu0 %v5546_v1 }
 0x2ef   :  { %v572_v21 = vpop.f32.mrf.mxu1 }
 0x2f0   :  { %v4774_v25 = vmul.f32 %v3941_v24, %v582_v19  ;;  %v583_v26 = vmul.f32 %v572_v21, %v475_v52  ;;  %597 = vadd.xlane.f32.xlu0 %v596_v20 }
 0x2f1   :  { %v574_v39 = vpop.f32.mrf.mxu1  ;;  %3546 = vmatmul.mubr.msk.f32.gmra.mxu0 %vm249_vm0, %v3542_v33 }
 0x2f2   :  { %v584_v18 = vmul.f32 %v574_v39, %v477_v53  ;;  %v599_v36 = vadd.f32 %v4774_v25, %v4769_v23  ;;  %v4781_v29 = vmul.f32 %v3942_v27, %v583_v26  ;;  %1775 = vmatprep.mubr.f32.mxu0 %v5546_v1 }
 0x2f4   :  { %v4786_v40 = vmul.f32 %v3943_v32, %v584_v18  ;;  %600 = vadd.xlane.f32.xlu1 %v599_v36 }
 0x2f6   :  { %v602_v44 = vadd.f32 %v4786_v40, %v4781_v29 }
 0x2f8   :  { %603 = vadd.xlane.f32.xlu0 %v602_v44 }
 0x305   :  { %705 = vperm.xlu1 %3878, %v4793_v46  }
 0x309   :  { %1802 = vrot.lane.b32.xlu1 %v3941_v24, %s4081_s28 }
 0x30d   :  { %1964 = vrot.lane.b32.xlu1 %v3943_v32, %s4082_s15 }
 0x30e   :  { %677 = vperm.xlu0 %3876, %v4801_v45  }
 0x311   :  { %1792 = vrot.lane.b32.xlu1 %v4751_v10, %s4081_s28 }
 0x312   :  { %1794 = vrot.lane.b32.xlu0 %v3940_v22, %s4081_s28 }
 0x313   :  { %3879 = vset.pattern.permute.xlu0 %v4080_v28  ;;  %v3532_v28 = vld [vmem:[%s5526_s6 + $0xa8] sm:$0xff] }
 0x314   :  { %3536 = vmatmul.mubr.msk.f32.gmra.mxu1 %vm249_vm0, %v3532_v28 }
 0x315   :  { %1800 = vrot.lane.b32.xlu1 %v4759_v12, %s4081_s28  ;;  %1609 = vmatprep.mubr.f32.mxu1 %v5546_v1 }
 0x316   :  { %1956 = vrot.lane.b32.xlu0 %v3942_v27, %s4082_s15 }
 0x318   :  { %3537 = vmatmul.mubr.msk.f32.gmra.mxu1 %vm249_vm0, %v3533_v42 }
 0x319   :  { %1962 = vrot.lane.b32.xlu1 %v3941_v24, %s4082_s15  ;;  %1615 = vmatprep.mubr.f32.mxu1 %v5546_v1 }
 0x31a   :  { %701 = vperm.xlu0 %3879, %v4801_v45  }
 0x31c   :  { %3538 = vmatmul.mubr.msk.f32.gmra.mxu1 %vm249_vm0, %v3534_v35 }
 0x31d   :  { %1917 = vmatprep.mubr.f32.mxu1 %v5546_v1 }
 0x31e   :  { %1954 = vrot.lane.b32.xlu0 %v3940_v22, %s4082_s15 }
 0x375   :  { %v595_v51 = vpop.xlane.xlu0 %594 }
 0x376   :  { %v605_v52 = vmul.f32 0.00390625, %v595_v51 }
 0x378   :  { %v609_v53 = vsub.f32 %v4736_v63, %v605_v52  ;;  %v610_v54 = vsub.f32 %v4744_v3, %v605_v52 }
 0x379   :  { %v598_v55 = vpop.xlane.xlu0 %597 }
 0x37a   :  { %v4862_v56 = vmul.f32 %v4549_v4, %v609_v53  ;;  %v4865_v57 = vmul.f32 %v4540_v58, %v610_v54  ;;  %v606_v61 = vmul.f32 0.00390625, %v598_v55  ;;  %v4927_v55 = vrot.slane %v3557_v13, %v4429_v60 }
 0x37c   :  { %v611_v5 = vsub.f32 %v4754_v11, %v606_v61  ;;  %v612_v6 = vsub.f32 %v4762_v14, %v606_v61  ;;  %v636_v7 = vmul.f32 %v4862_v56, %v4862_v56  ;;  %v637_v63 = vmul.f32 %v4865_v57, %v4865_v57 }
 0x37d   :  { %v601_v8 = vpop.xlane.xlu1 %600  ;;  %v4930_v61 = vrot.slane %v3557_v13, %v4436_v0 }
 0x37e   :  { %v4874_v3 = vmul.f32 %v4549_v4, %v611_v5  ;;  %v4877_v9 = vmul.f32 %v4540_v58, %v612_v6  ;;  %v607_v16 = vmul.f32 0.00390625, %v601_v8  ;;  %v644_v38 = vadd.f32 %v637_v63, %v636_v7 }
 0x380   :  { %v613_v19 = vsub.f32 %v4769_v23, %v607_v16  ;;  %v614_v11 = vsub.f32 %v4774_v25, %v607_v16  ;;  %645 = vadd.xlane.f32.xlu1 %v644_v38  ;;  %v638_v14 = vmul.f32 %v4874_v3, %v4874_v3  ;;  %v639_v20 = vmul.f32 %v4877_v9, %v4877_v9 }
 0x381   :  { %v4885_v21 = vpop.permute.xlu1 %705  ;;  %v604_v22 = vpop.xlane.xlu0 %603 }
 0x382   :  { %v4888_v24 = vmul.f32 %v4549_v4, %v613_v19  ;;  %v4891_v26 = vmul.f32 %v4540_v58, %v614_v11  ;;  %v608_v39 = vmul.f32 0.00390625, %v604_v22  ;;  %v647_v23 = vadd.f32 %v639_v20, %v638_v14 }
 0x384   :  { %v615_v25 = vsub.f32 %v4781_v29, %v608_v39  ;;  %v616_v18 = vsub.f32 %v4786_v40, %v608_v39  ;;  %648 = vadd.xlane.f32.xlu0 %v647_v23  ;;  %v640_v36 = vmul.f32 %v4888_v24, %v4888_v24  ;;  %v641_v27 = vmul.f32 %v4891_v26, %v4891_v26  ;;  %v3543_v29 = vld [vmem:[%s5526_s6 + $0xd8] sm:$0xff] }
 0x385   :  { %v1803_v32 = vpop.permute.xlu1 %1802  ;;  %3547 = vmatmul.mubr.msk.f32.gmra.mxu0 %vm249_vm0, %v3543_v29 }
 0x386   :  { %v4900_v44 = vmul.f32 %v4549_v4, %v615_v25  ;;  %v4903_v47 = vmul.f32 %v4540_v58, %v616_v18  ;;  %v650_v28 = vadd.f32 %v641_v27, %v640_v36  ;;  %2077 = vmatprep.mubr.f32.mxu0 %v5546_v1  ;;  %v4083_v18 = vmov 1  }
 0x387   :  { %3880 = vset.pattern.permute.xlu1 %v4083_v18  ;;  %3881 = vset.pattern.permute.xlu0 %v4083_v18 }
 0x388   :  { %651 = vadd.xlane.f32.xlu1 %v650_v28  ;;  %v642_v40 = vmul.f32 %v4900_v44, %v4900_v44  ;;  %v643_v48 = vmul.f32 %v4903_v47, %v4903_v47 }
 0x389   :  { %v4913_v42 = vpop.permute.xlu0 %677  ;;  %v1965_v49 = vpop.permute.xlu1 %1964 }
 0x38a   :  { %v653_v35 = vadd.f32 %v643_v48, %v642_v40 }
 0x38c   :  { %654 = vadd.xlane.f32.xlu0 %v653_v35 }
 0x38d   :  { %v1795_v50 = vpop.permute.xlu0 %1794  ;;  %v1793_v33 = vpop.permute.xlu1 %1792 }
 0x38e   :  { %v1809_v51 = vsel %vm1806_vm7, %v1795_v50, %v1803_v32  ;;  %v1813_v52 = vsel %vm1806_vm7, %v1803_v32, %v1795_v50 }
 0x38f   :  { %v1832_v53 = vmul.f32 %v4719_v37, %v1809_v51  ;;  %v1833_v54 = vmul.f32 %v4722_v34, %v1813_v52 }
 0x391   :  { %1879 = vmatprep.subr.mxu1 %v1833_v54  ;;  %v1957_v5 = vpop.permute.xlu0 %1956  ;;  %v1801_v6 = vpop.permute.xlu1 %1800  ;;  %v3549_v54 = vld [vmem:[%s5526_s6 + $0xe0] sm:$0xff] }
 0x392   :  { %v1970_v7 = vsel %vm1966_vm8, %v1957_v5, %v1965_v49  ;;  %v1974_v63 = vsel %vm1966_vm8, %v1965_v49, %v1957_v5  ;;  %1880 = vmatpush1.msra.mxu1 %v1832_v53  ;;  %v1808_v8 = vsel %vm1806_vm7, %v1793_v33, %v1801_v6  ;;  %v1812_v60 = vsel %vm1806_vm7, %v1801_v6, %v1793_v33 }
 0x393   :  { %v1994_v16 = vmul.f32 %v4927_v55, %v1970_v7  ;;  %v1995_v0 = vmul.f32 %v4930_v61, %v1974_v63  ;;  %v1830_v38 = vmul.f32 %v4719_v37, %v1808_v8  ;;  %v1831_v19 = vmul.f32 %v4722_v34, %v1812_v60 }
 0x395   :  { %2037 = vmatprep.subr.mxu0 %v1995_v0  ;;  %1881 = vmatprep.subr.mxu1 %v1831_v19  ;;  %v4944_v11 = vpop.permute.xlu0 %701  ;;  %v1963_v14 = vpop.permute.xlu1 %1962 }
 0x396   :  { %2038 = vmatpush1.msra.mxu0 %v1994_v16  ;;  %1882 = vmatpush1.msra.mxu1 %v1830_v38 }
 0x399   :  { %1798 = vrot.lane.b32.xlu1 %v4741_v2, %s4081_s28  ;;  %v1955_v20 = vpop.permute.xlu0 %1954 }
 0x39a   :  { %v1969_v22 = vsel %vm1966_vm8, %v1955_v20, %v1963_v14  ;;  %v1973_v39 = vsel %vm1966_vm8, %v1963_v14, %v1955_v20 }
 0x39b   :  { %v1992_v23 = vmul.f32 %v4927_v55, %v1969_v22  ;;  %v1993_v25 = vmul.f32 %v4930_v61, %v1973_v39  ;;  %v3551_v39 = vld [vmem:[%s5526_s6 + $0xf0] sm:$0xff] }
 0x39d   :  { %1960 = vrot.lane.b32.xlu1 %v4759_v12, %s4082_s15  ;;  %2039 = vmatprep.subr.mxu0 %v1993_v25 }
 0x39e   :  { %2040 = vmatpush1.msra.mxu0 %v1992_v23 }
 0x3a1   :  { %1958 = vrot.lane.b32.xlu1 %v4741_v2, %s4082_s15 }
 0x3a2   :  { %1790 = vrot.lane.b32.xlu0 %v4733_v62, %s4081_s28 }
 0x3a6   :  { %1952 = vrot.lane.b32.xlu0 %v4751_v10, %s4082_s15 }
 0x3aa   :  { %1950 = vrot.lane.b32.xlu0 %v4733_v62, %s4082_s15 }
 0x409   :  { %v646_v36 = vpop.xlane.xlu1 %645 }
 0x40a   :  { %v656_v32 = vmul.f32 0.00390625, %v646_v36 }
 0x40c   :  { %v660_v2 = vadd.f32 1e-05, %v656_v32 }
 0x40d   :  { %v649_v27 = vpop.xlane.xlu0 %648 }
 0x40e   :  { %v657_v12 = vmul.f32 0.00390625, %v649_v27 }
 0x410   :  { %v661_v28 = vadd.f32 1e-05, %v657_v12 }
 0x411   :  { %v652_v29 = vpop.xlane.xlu1 %651 }
 0x412   :  { %v658_v40 = vmul.f32 0.00390625, %v652_v29  ;;  %3900 = vrsqrt.f32 %v661_v28 }
 0x414   :  { %v662_v48 = vadd.f32 1e-05, %v658_v40 }
 0x415   :  { %v655_v49 = vpop.xlane.xlu0 %654  ;;  %v1799_v35 = vpop.permute.xlu1 %1798 }
 0x416   :  { %3902 = vrsqrt.f32 %v662_v48  ;;  %v659_v10 = vmul.f32 0.00390625, %v655_v49 }
 0x417   :  { %3904 = vrsqrt.f32 %v660_v2 }
 0x418   :  { %v663_v13 = vadd.f32 1e-05, %v659_v10 }
 0x419   :  { %v1791_v62 = vpop.permute.xlu0 %1790  ;;  %v1961_v50 = vpop.permute.xlu1 %1960 }
 0x41a   :  { %3906 = vrsqrt.f32 %v663_v13  ;;  %v1807_v33 = vsel %vm1806_vm7, %v1791_v62, %v1799_v35  ;;  %v1811_v51 = vsel %vm1806_vm7, %v1799_v35, %v1791_v62 }
 0x41b   :  { %v1828_v52 = vmul.f32 %v4719_v37, %v1807_v33  ;;  %v1829_v53 = vmul.f32 %v4722_v34, %v1811_v51  ;;  %v3550_v34 = vld [vmem:[%s5526_s6 + $0xe8] sm:$0xff] }
 0x41d   :  { %1883 = vmatprep.subr.mxu1 %v1829_v53  ;;  %v1953_v5 = vpop.permute.xlu0 %1952  ;;  %v1959_v37 = vpop.permute.xlu1 %1958 }
 0x41e   :  { %v1968_v6 = vsel %vm1966_vm8, %v1953_v5, %v1961_v50  ;;  %v1972_v7 = vsel %vm1966_vm8, %v1961_v50, %v1953_v5  ;;  %1884 = vmatpush1.msra.mxu1 %v1828_v52 }
 0x41f   :  { %v1990_v63 = vmul.f32 %v4927_v55, %v1968_v6  ;;  %v1991_v8 = vmul.f32 %v4930_v61, %v1972_v7  ;;  %3553 = vmatmul.mubr.msk.f32.vlgmr.msra.gmra.mxu1 %vm249_vm0, %v3549_v54  ;;  %3718 = vmatprep.subr.mxu1 %v5546_v1  ;;  %v3901_v16 = vpop.eup %3900  ;;  %v3946_v6 = vld [vmem:[%s5527_s7 + $0x18] sm:$0xff]  ;;  %v5092_v7 = vpop.f32.mrf.mxu1 }
 0x420   :  { %1923 = vmatprep.mubr.f32.mxu1 %v5546_v1 }
 0x421   :  { %v1951_v60 = vpop.permute.xlu0 %1950  ;;  %2041 = vmatprep.subr.mxu0 %v1991_v8 }
 0x422   :  { %v1967_v0 = vsel %vm1966_vm8, %v1951_v60, %v1959_v37  ;;  %v1971_v38 = vsel %vm1966_vm8, %v1959_v37, %v1951_v60  ;;  %2042 = vmatpush1.msra.mxu0 %v1990_v63 }
 0x423   :  { %v3903_v19 = vpop.eup %3902  ;;  %v1988_v14 = vmul.f32 %v4927_v55, %v1967_v0  ;;  %v1989_v20 = vmul.f32 %v4930_v61, %v1971_v38  ;;  %3554 = vmatmul.mubr.msk.f32.gmra.mxu1 %vm249_vm0, %v3550_v34  ;;  %v670_v55 = vmul.f32 %v3901_v16, %v4874_v3  ;;  %v671_v61 = vmul.f32 %v3901_v16, %v4877_v9  ;;  %v3552_v3 = vld [vmem:[%s5526_s6 + $0xf8] sm:$0xff]  ;;  %v3559_v9 = vld [vmem:[%s5526_s6 + $0x108] sm:$0xff] }
 0x424   :  { %v3905_v22 = vpop.eup %3904  ;;  %1929 = vmatprep.mubr.f32.mxu1 %v5546_v1  ;;  %v672_v23 = vmul.f32 %v3903_v19, %v4888_v24  ;;  %v673_v25 = vmul.f32 %v3903_v19, %v4891_v26 }
 0x425   :  { %2043 = vmatprep.subr.mxu0 %v1989_v20  ;;  %v668_v12 = vmul.f32 %v3905_v22, %v4862_v56  ;;  %v694_v32 = vmul.f32 %v4715_v41, %v670_v55  ;;  %v695_v28 = vmul.f32 %v4715_v41, %v671_v61  ;;  %v669_v29 = vmul.f32 %v3905_v22, %v4865_v57  ;;  %v3560_v41 = vld [vmem:[%s5526_s6 + $0x110] sm:$0xff] }
 0x426   :  { %2044 = vmatpush1.msra.mxu0 %v1988_v14  ;;  %v696_v18 = vmul.f32 %v4681_v17, %v672_v23  ;;  %v697_v36 = vmul.f32 %v4681_v17, %v673_v25 }
 0x427   :  { %v3907_v27 = vpop.eup %3906  ;;  %3555 = vmatmul.mubr.msk.f32.gmra.mxu1 %vm249_vm0, %v3551_v39  ;;  %3562 = vmatmul.mubr.msk.f32.vlgmr.msra.gmra.mxu0 %vm249_vm0, %v3558_v59  ;;  %v692_v48 = vmul.f32 %v4913_v42, %v668_v12  ;;  %v5048_v35 = vadd.f32 %v4885_v21, %v694_v32  ;;  %v693_v10 = vmul.f32 %v4913_v42, %v669_v29 }
 0x428   :  { %1935 = vmatprep.mubr.f32.mxu1 %v5546_v1  ;;  %2083 = vmatprep.mubr.f32.mxu0 %v5546_v1  ;;  %v5017_v17 = vadd.f32 %v4710_v31, %v696_v18  ;;  %v5020_v24 = vadd.f32 %v4710_v31, %v697_v36  ;;  %v674_v56 = vmul.f32 %v3907_v27, %v4900_v44 }
 0x429   :  { %v675_v26 = vmul.f32 %v3907_v27, %v4903_v47  ;;  %3740 = vmatprep.subr.mxu0 %v5546_v1  ;;  %5552 = vst [vmem:[#allocation19_spill] sm:$0xff] %v5048_v35  ;;  %v2141_v42 = vmul.f32 %v5048_v35, %v4549_v4  ;;  %v5071_v51 = vadd.f32 %v4944_v11, %v693_v10 }
 0x42a   :  { %5548 = vst [vmem:[#allocation15_spill] sm:$0xff] %v5017_v17  ;;  %5549 = vst [vmem:[#allocation16_spill] sm:$0xff] %v5020_v24  ;;  %v2143_v40 = vmul.f32 %v5017_v17, %v4549_v4  ;;  %v2144_v2 = vmul.f32 %v5020_v24, %v4540_v58  ;;  %v698_v31 = vmul.f32 %v4708_v30, %v674_v56  ;;  %v5240_v24 = vld [vmem:[#allocation8 + $0x18] sm:$0xff] }
 0x42b   :  { %3556 = vmatmul.mubr.msk.f32.gmra.mxu1 %vm249_vm0, %v3552_v3  ;;  %3563 = vmatmul.mubr.msk.f32.gmra.mxu0 %vm249_vm0, %v3559_v9  ;;  %v699_v44 = vmul.f32 %v4708_v30, %v675_v26  ;;  %v5051_v30 = vadd.f32 %v4885_v21, %v695_v28  ;;  %v5064_v21 = vadd.f32 %v4944_v11, %v692_v48  ;;  %v3947_v11 = vld [vmem:[%s5527_s7 + $0x10] sm:$0xff] }
 0x42c   :  { %v2153_v47 = vadd.f32 %v2144_v2, %v2143_v40  ;;  %2089 = vmatprep.mubr.f32.mxu0 %v5546_v1  ;;  %v5041_v57 = vadd.f32 %v4698_v15, %v698_v31  ;;  %5555 = vst [vmem:[#allocation22_spill] sm:$0xff] %v5071_v51  ;;  %v2140_v54 = vmul.f32 %v5071_v51, %v4540_v58  ;;  %5561 = vst [vmem:[#allocation28_spill] sm:$0xff] %v5240_v24 }
 0x42d   :  { %v5045_v49 = vadd.f32 %v4698_v15, %v699_v44  ;;  %5553 = vst [vmem:[#allocation20_spill] sm:$0xff] %v5051_v30  ;;  %v3561_v15 = vld [vmem:[%s5526_s6 + $0x118] sm:$0xff]  ;;  %5554 = vst [vmem:[#allocation21_spill] sm:$0xff] %v5064_v21  ;;  %v2142_v33 = vmul.f32 %v5051_v30, %v4540_v58  ;;  %v2139_v53 = vmul.f32 %v5064_v21, %v4549_v4  ;;  %3726 = vmatprep.mubr.msk.f32.mxu1 %vm4084_vm9, %v5546_v1  ;;  %s3460_s6 = sshll.u32 %s4085_s12, 4  ;;  %s3461_s6 = int_to_ptr.vmem [resolvable:$true] %s3460_s6 }
 0x42e   :  { %5550 = vst [vmem:[#allocation17_spill] sm:$0xff] %v5041_v57  ;;  %2154 = vadd.xlane.f32.xlu1 %v2153_v47  ;;  %v2145_v13 = vmul.f32 %v5041_v57, %v4549_v4  ;;  %s4036_s16 = scalar_lea.vmem %s3461_s6, 1024  ;;  %p4041_p7 = scmp.lt.s32.totalorder %s3461_s6, %s3461_s6 }
 0x42f   :  { %5551 = vst [vmem:[#allocation18_spill] sm:$0xff] %v5045_v49  ;;  %3564 = vmatmul.mubr.msk.f32.gmra.mxu0 %vm249_vm0, %v3560_v41  ;;  %v2146_v62 = vmul.f32 %v5045_v49, %v4540_v58  ;;  %v2150_v52 = vadd.f32 %v2142_v33, %v2141_v42  ;;  %v2147_v5 = vadd.f32 %v2140_v54, %v2139_v53  ;;  %p4037_p6 = scmp.ne.s32.totalorder %s3461_s6, %s4036_s16  ;;  %p4042_p8 = scmp.lt.s32.totalorder %s4036_s16, %s4036_s16 }
 0x430   :  { %2095 = vmatprep.mubr.f32.mxu0 %v5546_v1 }
 0x431   :  { %v2156_v50 = vadd.f32 %v2146_v62, %v2145_v13  ;;  %p4043_p9 = por %p4042_p8, %p4041_p7 }
 0x433   :  { %2157 = vadd.xlane.f32.xlu0 %v2156_v50  ;;  %3565 = vmatmul.mubr.msk.f32.gmra.mxu0 %vm249_vm0, %v3561_v15  ;;  %p4044_p10 = pnand %p4043_p9, %p4037_p6 }
 0x434   :  { %3748 = vmatprep.mubr.msk.f32.mxu0 %vm4084_vm9, %v5546_v1 }
 0x437   :  { %2151 = vadd.xlane.f32.xlu0 %v2150_v52 }
 0x43b   :  { %2148 = vadd.xlane.f32.xlu0 %v2147_v5  ;;  %v5196_v5 = vld [vmem:[#allocation8] sm:$0xff] }
 0x43f   :  { %2123 = vperm.xlu1 %3880, %v3946_v6   ;;  %v5200_v6 = vld [vmem:[#allocation8 + $0x10] sm:$0xff] }
 0x443   :  { %2115 = vperm.xlu1 %3880, %v4793_v46   ;;  %v5094_v46 = vpop.f32.mrf.mxu1 }
 0x445   :  { %v5098_v63 = vpop.f32.mrf.mxu1 }
 0x447   :  { %2111 = vperm.xlu1 %3880, %v4801_v45   ;;  %v5096_v45 = vpop.f32.mrf.mxu0  ;;  %v5102_v37 = vpop.f32.mrf.mxu1 }
 0x449   :  { %v5100_v8 = vpop.f32.mrf.mxu0  ;;  %v5106_v60 = vpop.f32.mrf.mxu1 }
 0x44b   :  { %3882 = vset.pattern.permute.xlu1 %v4072_v43  ;;  %v5104_v34 = vpop.f32.mrf.mxu0  ;;  %v5110_v0 = vpop.f32.mrf.mxu1 }
 0x44d   :  { %v5108_v16 = vpop.f32.mrf.mxu0  ;;  %v5114_v38 = vpop.f32.mrf.mxu1 }
 0x44f   :  { %v5118_v14 = vpop.f32.mrf.mxu1 }
 0x451   :  { %2119 = vperm.xlu0 %3881, %v3947_v11   ;;  %v5122_v22 = vpop.f32.mrf.mxu1 }
 0x452   :  { %v1018_v17 = vadd.f32 %v5122_v22, %v5092_v7  ;;  %v1012_v22 = vadd.f32 %v5114_v38, %v5104_v34  ;;  %v1006_v34 = vadd.f32 %v5106_v60, %v5096_v45 }
 0x453   :  { %v5126_v59 = vpop.f32.mrf.mxu1 }
 0x455   :  { %3883 = vset.pattern.permute.xlu0 %v4072_v43  ;;  %v5112_v43 = vpop.f32.mrf.mxu0  ;;  %v5130_v25 = vpop.f32.mrf.mxu1 }
 0x456   :  { %v1024_v7 = vadd.f32 %v5130_v25, %v5098_v63 }
 0x457   :  { %v5116_v19 = vpop.f32.mrf.mxu0  ;;  %v5134_v61 = vpop.f32.mrf.mxu1 }
 0x459   :  { %v5120_v20 = vpop.f32.mrf.mxu0  ;;  %v5138_v36 = vpop.f32.mrf.mxu1 }
 0x45b   :  { %v5124_v39 = vpop.f32.mrf.mxu0  ;;  %v5142_v12 = vpop.f32.mrf.mxu1 }
 0x45d   :  { %v5128_v23 = vpop.f32.mrf.mxu0  ;;  %v5146_v9 = vpop.f32.mrf.mxu1 }
 0x45f   :  { %v5132_v55 = vpop.f32.mrf.mxu0  ;;  %v5150_v26 = vpop.f32.mrf.mxu1 }
 0x461   :  { %v5136_v18 = vpop.f32.mrf.mxu0  ;;  %v5154_v28 = vpop.f32.mrf.mxu1 }
 0x463   :  { %v5140_v27 = vpop.f32.mrf.mxu0  ;;  %v5158_v40 = vpop.f32.mrf.mxu1 }
 0x465   :  { %v5144_v3 = vpop.f32.mrf.mxu0  ;;  %v5162_v31 = vpop.f32.mrf.mxu1 }
 0x467   :  { %v5148_v56 = vpop.f32.mrf.mxu0  ;;  %v5166_v48 = vpop.f32.mrf.mxu1 }
 0x469   :  { %v5152_v32 = vpop.f32.mrf.mxu0  ;;  %v5178_v50 = vpop.f32.mrf.mxu1 }
 0x46b   :  { %v5156_v29 = vpop.f32.mrf.mxu0  ;;  %v5192_v53 = vpop.f32.mrf.mxu1 }
 0x46d   :  { %v5160_v2 = vpop.f32.mrf.mxu0 }
 0x46f   :  { %v5164_v41 = vpop.f32.mrf.mxu0 }
 0x471   :  { %v5176_v15 = vpop.f32.mrf.mxu0 }
 0x473   :  { %v5190_v52 = vpop.f32.mrf.mxu0 }
 0x475   :  { %v5205_v11 = vpop.f32.mrf.mxu0 }
 0x4b7   :  { %v2155_v44 = vpop.xlane.xlu1 %2154 }
 0x4b8   :  { %v5170_v13 = vmul.f32 0.00390625, %v2155_v44  ;;  %v5207_v44 = vpop.f32.mrf.mxu1 }
 0x4ba   :  { %5557 = vst [vmem:[#allocation24_spill] sm:$0xff] %v5170_v13 }
 0x4bc   :  { %v2158_v47 = vpop.xlane.xlu0 %2157 }
 0x4bd   :  { %v5168_v10 = vmul.f32 0.00390625, %v2158_v47  ;;  %v5217_v47 = vpop.f32.mrf.mxu0 }
 0x4bf   :  { %5556 = vst [vmem:[#allocation23_spill] sm:$0xff] %v5168_v10  ;;  %3719 = vmatpush3.msra.mxu1 %v5168_v10  ;;  %3741 = vmatpush3.msra.mxu0 %v5168_v10  ;;  %v5229_v51 = vpop.f32.mrf.mxu0 }
 0x4c0   :  { %3720 = vmatprep.subr.mxu1 %v5546_v1  ;;  %3742 = vmatprep.subr.mxu0 %v5546_v1  ;;  %v2152_v62 = vpop.xlane.xlu0 %2151 }
 0x4c1   :  { %v5180_v42 = vmul.f32 0.00390625, %v2152_v62  ;;  %3721 = vmatpush3.msra.mxu1 %v5170_v13  ;;  %3743 = vmatpush3.msra.mxu0 %v5170_v13  ;;  %v5219_v62 = vpop.f32.mrf.mxu1  ;;  %v5237_v35 = vpop.f32.mrf.mxu0 }
 0x4c2   :  { %3722 = vmatprep.subr.mxu1 %v5546_v1  ;;  %3744 = vmatprep.subr.mxu0 %v5546_v1 }
 0x4c3   :  { %5558 = vst [vmem:[#allocation25_spill] sm:$0xff] %v5180_v42  ;;  %3723 = vmatpush3.msra.mxu1 %v5180_v42  ;;  %3745 = vmatpush3.msra.mxu0 %v5180_v42  ;;  %v1611_v21 = vpop.f32.mrf.mxu1  ;;  %v1771_v49 = vpop.f32.mrf.mxu0 }
 0x4c4   :  { %v2149_v33 = vpop.xlane.xlu0 %2148  ;;  %3724 = vmatprep.subr.mxu1 %v5546_v1  ;;  %3746 = vmatprep.subr.mxu0 %v5546_v1 }
 0x4c5   :  { %v5194_v54 = vmul.f32 0.00390625, %v2149_v33  ;;  %v5222_v33 = vld [vmem:[#allocation8 + $0x8] sm:$0xff]  ;;  %v1613_v30 = vpop.f32.mrf.mxu1 }
 0x4c6   :  { %5560 = vst [vmem:[#allocation27_spill] sm:$0xff] %v5222_v33 }
 0x4c7   :  { %5559 = vst [vmem:[#allocation26_spill] sm:$0xff] %v5194_v54  ;;  %3725 = vmatpush3.msra.mxu1 %v5194_v54  ;;  %3747 = vmatpush3.msra.mxu0 %v5194_v54  ;;  %v1617_v57 = vpop.f32.mrf.mxu1 }
 0x4c8   :  { %3729 = vmatprep.subr.mxu1 %v5546_v1  ;;  %3727 = vmatmul.mubr.msk.f32.vlgmr.msra.gmra.mxu1 %vm249_vm0, %v5196_v5 }
 0x4c9   :  { %3730 = vmatpush3.msra.mxu1 %v5168_v10  ;;  %3737 = vmatprep.mubr.msk.f32.mxu1 %vm4084_vm9, %v5546_v1 }
 0x4ca   :  { %3731 = vmatprep.subr.mxu1 %v5546_v1  ;;  %3749 = vmatmul.mubr.msk.f32.vlgmr.msra.gmra.mxu0 %vm249_vm0, %v5200_v6 }
 0x4cb   :  { %3732 = vmatpush3.msra.mxu1 %v5170_v13 }
 0x4cc   :  { %3733 = vmatprep.subr.mxu1 %v5546_v1 }
 0x4cd   :  { %3734 = vmatpush3.msra.mxu1 %v5180_v42 }
 0x4ce   :  { %3735 = vmatprep.subr.mxu1 %v5546_v1 }
 0x4cf   :  { %3736 = vmatpush3.msra.mxu1 %v5194_v54 }
 0x4d0   :  { %3738 = vmatmul.mubr.msk.f32.vlgmr.msra.gmra.mxu1 %vm249_vm0, %v5222_v33  ;;  %3751 = vmatprep.subr.mxu1 %v5546_v1  ;;  %v1619_v33 = vpop.f32.mrf.mxu1 }
 0x4d1   :  { %3752 = vmatpush3.msra.mxu1 %v5168_v10  ;;  %3759 = vmatprep.mubr.msk.f32.mxu1 %vm4084_vm9, %v5546_v1  ;;  %v1026_v10 = vadd.f32 %v5134_v61, %v5102_v37  ;;  %v1182_v37 = vadd.f32 %v5120_v20, %v1012_v22 }
 0x4d2   :  { %3753 = vmatprep.subr.mxu1 %v5546_v1 }
 0x4d3   :  { %3754 = vmatpush3.msra.mxu1 %v5170_v13  ;;  %v1014_v13 = vadd.f32 %v5118_v14, %v5108_v16  ;;  %v1186_v16 = vadd.f32 %v5136_v18, %v1024_v7  ;;  %v1187_v38 = vadd.f32 %v5140_v27, %v1026_v10  ;;  %v1180_v18 = vadd.f32 %v5112_v43, %v1006_v34 }
 0x4d4   :  { %3755 = vmatprep.subr.mxu1 %v5546_v1  ;;  %v1342_v45 = vadd.f32 %v5146_v9, %v1182_v37 }
 0x4d5   :  { %3756 = vmatpush3.msra.mxu1 %v5180_v42  ;;  %v1020_v42 = vadd.f32 %v5126_v59, %v5094_v46  ;;  %v1008_v46 = vadd.f32 %v5110_v0, %v5100_v8  ;;  %v1346_v61 = vadd.f32 %v5162_v31, %v1186_v16  ;;  %v1347_v60 = vadd.f32 %v5166_v48, %v1187_v38 }
 0x4d6   :  { %3757 = vmatprep.subr.mxu1 %v5546_v1  ;;  %v1340_v31 = vadd.f32 %v5138_v36, %v1180_v18  ;;  %v1464_v43 = vadd.f32 %v5152_v32, %v1342_v45 }
 0x4d7   :  { %3758 = vmatpush3.msra.mxu1 %v5194_v54  ;;  %v1184_v54 = vadd.f32 %v5128_v23, %v1018_v17  ;;  %v1183_v17 = vadd.f32 %v5124_v39, %v1014_v13  ;;  %v1181_v8 = vadd.f32 %v5116_v19, %v1008_v46  ;;  %v1469_v9 = vadd.f32 %v5190_v52, %v1347_v60 }
 0x4d8   :  { %3760 = vmatmul.mubr.msk.f32.vlgmr.msra.gmra.mxu1 %vm249_vm0, %v5240_v24  ;;  %3770 = vmatprep.subr.mxu1 %v5546_v1  ;;  %v1773_v24 = vpop.f32.mrf.mxu0 }
 0x4d9   :  { %3778 = vmatprep.mubr.msk.f32.mxu1 %vm4084_vm9, %v5546_v1  ;;  %v1185_v1 = vadd.f32 %v5132_v55, %v1020_v42  ;;  %v1344_v63 = vadd.f32 %v5154_v28, %v1184_v54  ;;  %v1343_v39 = vadd.f32 %v5150_v26, %v1183_v17  ;;  %v2124_v17 = vpop.permute.xlu1 %2123 }
 0x4da   :  { %v1777_v14 = vpop.f32.mrf.mxu0 }
 0x4db   :  { %v1345_v25 = vadd.f32 %v5158_v40, %v1185_v1  ;;  %v1466_v55 = vadd.f32 %v5160_v2, %v1344_v63  ;;  %v1341_v1 = vadd.f32 %v5142_v12, %v1181_v8  ;;  %v1465_v26 = vadd.f32 %v5156_v29, %v1343_v39  ;;  %v2120_v63 = vpop.permute.xlu0 %2119 }
 0x4dc   :  { %v1779_v20 = vpop.f32.mrf.mxu0  ;;  %v1468_v2 = vadd.f32 %v5176_v15, %v1346_v61  ;;  %v1462_v29 = vadd.f32 %v5144_v3, %v1340_v31  ;;  %v1629_v15 = vadd.f32 %v1619_v33, %v1469_v9 }
 0x4dd   :  { %v1467_v28 = vadd.f32 %v5164_v41, %v1345_v25  ;;  %v1626_v10 = vadd.f32 %v1611_v21, %v1466_v55  ;;  %v1463_v41 = vadd.f32 %v5148_v56, %v1341_v1  ;;  %v1625_v12 = vadd.f32 %v5219_v62, %v1465_v26  ;;  %v2116_v45 = vpop.permute.xlu1 %2115 }
 0x4de   :  { %v1628_v22 = vadd.f32 %v1617_v57, %v1468_v2  ;;  %v1624_v21 = vadd.f32 %v5207_v44, %v1464_v43  ;;  %v1622_v57 = vadd.f32 %v5178_v50, %v1462_v29  ;;  %v1789_v44 = vadd.f32 %v1779_v20, %v1629_v15 }
 0x4df   :  { %v5265_v59 = vpop.f32.mrf.mxu1  ;;  %v1627_v42 = vadd.f32 %v1613_v30, %v1467_v28  ;;  %v1786_v7 = vadd.f32 %v1771_v49, %v1626_v10  ;;  %v1623_v16 = vadd.f32 %v5192_v53, %v1463_v41  ;;  %v1785_v56 = vadd.f32 %v5237_v35, %v1625_v12 }
 0x4e0   :  { %v1788_v34 = vadd.f32 %v1777_v14, %v1628_v22  ;;  %v1784_v3 = vadd.f32 %v5229_v51, %v1624_v21  ;;  %v1782_v50 = vadd.f32 %v5205_v11, %v1622_v57  ;;  %v5335_v22 = vld [vmem:[%s5530_s10] sm:$0xff] }
 0x4e1   :  { %v1921_v23 = vpop.f32.mrf.mxu1  ;;  %v1787_v32 = vadd.f32 %v1773_v24, %v1627_v42  ;;  %v1783_v53 = vadd.f32 %v5217_v47, %v1623_v16  ;;  %v2112_v9 = vpop.permute.xlu1 %2111  ;;  %3764 = vmatprep.mubr.msk.f32.mxu0 %vm2489_vm10, %v5335_v22 }
 0x4e3   :  { %v1925_v0 = vpop.f32.mrf.mxu1  ;;  %v1943_v51 = vadd.f32 %v1921_v23, %v1783_v53 }
 0x4e4   :  { %v1944_v39 = vadd.f32 %v1925_v0, %v1784_v3  ;;  %v1942_v0 = vadd.f32 %v5265_v59, %v1782_v50 }
 0x4e5   :  { %v1927_v27 = vpop.f32.mrf.mxu1 }
 0x4e6   :  { %v1945_v38 = vadd.f32 %v1927_v27, %v1785_v56 }
 0x4e7   :  { %v1931_v19 = vpop.f32.mrf.mxu1  ;;  %v2079_v40 = vpop.f32.mrf.mxu0 }
 0x4e8   :  { %v1946_v52 = vadd.f32 %v1931_v19, %v1786_v7  ;;  %v2102_v23 = vadd.f32 %v2079_v40, %v1942_v0 }
 0x4e9   :  { %v1933_v48 = vpop.f32.mrf.mxu1  ;;  %v2081_v13 = vpop.f32.mrf.mxu0 }
 0x4ea   :  { %v1947_v62 = vadd.f32 %v1933_v48, %v1787_v32  ;;  %v2103_v19 = vadd.f32 %v2081_v13, %v1943_v51  ;;  %v5324_v42 = vadd.f32 %v2112_v9, %v2102_v23 }
 0x4eb   :  { %v2085_v54 = vpop.f32.mrf.mxu0  ;;  %v1937_v36 = vpop.f32.mrf.mxu1 }
 0x4ec   :  { %v1948_v24 = vadd.f32 %v1937_v36, %v1788_v34  ;;  %v2104_v60 = vadd.f32 %v2085_v54, %v1944_v39  ;;  %v5320_v48 = vadd.f32 %v2112_v9, %v2103_v19  ;;  %v2163_v12 = vmul.f32 %v5324_v42, %v4549_v4 }
 0x4ed   :  { %v2087_v46 = vpop.f32.mrf.mxu0  ;;  %v1939_v33 = vpop.f32.mrf.mxu1 }
 0x4ee   :  { %v1949_v35 = vadd.f32 %v1939_v33, %v1789_v44  ;;  %v2105_v14 = vadd.f32 %v2087_v46, %v1945_v38  ;;  %v5314_v10 = vadd.f32 %v2116_v45, %v2104_v60  ;;  %v2164_v41 = vmul.f32 %v5320_v48, %v4540_v58  ;;  %v5374_v33 = vld [vmem:[%s5530_s10 + $0x10] sm:$0xff]  ;;  %v5564_v38 = vld [vmem:[#allocation28_spill] sm:$0xff] }
 0x4ef   :  { %v2091_v30 = vpop.f32.mrf.mxu0  ;;  %v5566_v60 = vld [vmem:[#allocation24_spill] sm:$0xff] }
 0x4f0   :  { %v2106_v49 = vadd.f32 %v2091_v30, %v1946_v52  ;;  %v5310_v26 = vadd.f32 %v2116_v45, %v2105_v14  ;;  %v2165_v40 = vmul.f32 %v5314_v10, %v4549_v4  ;;  %v2171_v7 = vadd.f32 %v2164_v41, %v2163_v12 }
 0x4f1   :  { %v2093_v37 = vpop.f32.mrf.mxu0 }
 0x4f2   :  { %v2107_v25 = vadd.f32 %v2093_v37, %v1947_v62  ;;  %v5297_v8 = vadd.f32 %v2120_v63, %v2106_v49  ;;  %v2166_v13 = vmul.f32 %v5310_v26, %v4540_v58  ;;  %v5389_v37 = vld [vmem:[%s5530_s10 + $0x18] sm:$0xff] }
 0x4f3   :  { %v2097_v55 = vpop.f32.mrf.mxu0 }
 0x4f4   :  { %v5300_v61 = vadd.f32 %v2120_v63, %v2107_v25  ;;  %v2108_v18 = vadd.f32 %v2097_v55, %v1948_v24  ;;  %v2167_v1 = vmul.f32 %v5297_v8, %v4549_v4  ;;  %v2174_v54 = vadd.f32 %v2166_v13, %v2165_v40 }
 0x4f5   :  { %v2099_v20 = vpop.f32.mrf.mxu0 }
 0x4f6   :  { %v5303_v27 = vadd.f32 %v2124_v17, %v2108_v18  ;;  %v2109_v28 = vadd.f32 %v2099_v20, %v1949_v35  ;;  %v2168_v47 = vmul.f32 %v5300_v61, %v4540_v58  ;;  %v5565_v18 = vld [vmem:[#allocation23_spill] sm:$0xff] }
 0x4f8   :  { %v5312_v2 = vadd.f32 %v2124_v17, %v2109_v28  ;;  %v2177_v11 = vadd.f32 %v2168_v47, %v2167_v1  ;;  %v2169_v31 = vmul.f32 %v5303_v27, %v4549_v4  ;;  %v5562_v17 = vmov 0.0   ;;  %v5567_v1 = vld [vmem:[#allocation25_spill] sm:$0xff] }
 0x4fa   :  { %2178 = vadd.xlane.f32.xlu0 %v2177_v11  ;;  %v2170_v43 = vmul.f32 %v5312_v2, %v4540_v58 }
 0x4fc   :  { %v2180_v59 = vadd.f32 %v2170_v43, %v2169_v31 }
 0x4fe   :  { %2181 = vadd.xlane.f32.xlu1 %v2180_v59 }
 0x502   :  { %2175 = vadd.xlane.f32.xlu1 %v2174_v54 }
 0x506   :  { %2172 = vadd.xlane.f32.xlu1 %v2171_v7 }
 0x583   :  { %v2179_v29 = vpop.xlane.xlu0 %2178 }
 0x584   :  { %v5341_v36 = vmul.f32 0.00390625, %v2179_v29 }
 0x587   :  { %v2182_v21 = vpop.xlane.xlu1 %2181 }
 0x588   :  { %v5339_v15 = vmul.f32 0.00390625, %v2182_v21  ;;  %v2257_v58 = vpop.f32.mrf.mxu1 }
 0x58a   :  { %3771 = vmatpush3.msra.mxu1 %v5339_v15  ;;  %v3728_v4 = vpop.f32.mrf.mxu1  ;;  %v2408_v46 = vpop.f32.mrf.mxu0 }
 0x58b   :  { %v2176_v32 = vpop.xlane.xlu1 %2175  ;;  %3772 = vmatprep.subr.mxu1 %v5562_v17 }
 0x58c   :  { %v5345_v52 = vmul.f32 0.00390625, %v2176_v32  ;;  %3773 = vmatpush3.msra.mxu1 %v5341_v36  ;;  %v3750_v16 = vpop.f32.mrf.mxu0 }
 0x58d   :  { %3774 = vmatprep.subr.mxu1 %v5562_v17  ;;  %v5568_v16 = vld [vmem:[#allocation26_spill] sm:$0xff] }
 0x58e   :  { %3775 = vmatpush3.msra.mxu1 %v5345_v52 }
 0x58f   :  { %v2173_v30 = vpop.xlane.xlu1 %2172  ;;  %3776 = vmatprep.subr.mxu1 %v5562_v17 }
 0x590   :  { %v5351_v63 = vmul.f32 0.00390625, %v2173_v30  ;;  %v2332_v56 = vpop.f32.mrf.mxu1 }
 0x591   :  { %v2336_v62 = vmax.f32 %v2257_v58, %v2332_v56 }
 0x592   :  { %3777 = vmatpush3.msra.mxu1 %v5351_v63  ;;  %v3739_v34 = vpop.f32.mrf.mxu1 }
 0x593   :  { %3792 = vmatprep.subr.mxu1 %v5562_v17  ;;  %3779 = vmatmul.mubr.msk.f32.vlgmr.msra.gmra.mxu1 %vm249_vm0, %v5196_v5  ;;  %v2412_v49 = vmax.f32 %v2336_v62, %v2408_v46  ;;  %v5369_v5 = vld [vmem:[%s5530_s10 + $0x8] sm:$0xff] }
 0x594   :  { %3793 = vmatpush3.msra.mxu1 %v5339_v15  ;;  %3800 = vmatprep.mubr.msk.f32.mxu1 %vm4084_vm9, %v5562_v17 }
 0x595   :  { %3794 = vmatprep.subr.mxu1 %v5562_v17 }
 0x596   :  { %3795 = vmatpush3.msra.mxu1 %v5341_v36 }
 0x597   :  { %3796 = vmatprep.subr.mxu1 %v5562_v17 }
 0x598   :  { %v2484_v57 = vpop.f32.mrf.mxu1  ;;  %3797 = vmatpush3.msra.mxu1 %v5345_v52 }
 0x599   :  { %v2488_v3 = vmax.f32 %v2412_v49, %v2484_v57  ;;  %3798 = vmatprep.subr.mxu1 %v5562_v17 }
 0x59a   :  { %v3761_v44 = vpop.f32.mrf.mxu1  ;;  %3799 = vmatpush3.msra.mxu1 %v5351_v63 }
 0x59b   :  { %3762 = vmatprep.subr.mxu0 %v2488_v3  ;;  %3801 = vmatmul.mubr.msk.f32.vlgmr.msra.gmra.mxu1 %vm249_vm0, %v5200_v6  ;;  %v5563_v6 = vld [vmem:[#allocation27_spill] sm:$0xff] }
 0x59c   :  { %3763 = vmatpush3.msra.mxu0 %v2488_v3  ;;  %3816 = vmatprep.mubr.msk.f32.mxu1 %vm2489_vm10, %v5335_v22 }
 0x59d   :  { %3765 = vmatmul.mubr.msk.f32.vlgmr.msra.gmra.mxu0 %vm2489_vm10, %v5369_v5  ;;  %3781 = vmatprep.subr.mxu0 %v5562_v17 }
 0x59e   :  { %3782 = vmatpush3.msra.mxu0 %v5339_v15  ;;  %3767 = vmatprep.mubr.msk.f32.mxu0 %vm2489_vm10, %v5374_v33 }
 0x59f   :  { %3783 = vmatprep.subr.mxu0 %v5562_v17 }
 0x5a0   :  { %3784 = vmatpush3.msra.mxu0 %v5341_v36 }
 0x5a1   :  { %3768 = vmatmul.mubr.msk.f32.gmra.mxu0 %vm2489_vm10, %v5389_v37  ;;  %3785 = vmatprep.subr.mxu0 %v5562_v17 }
 0x5a2   :  { %3786 = vmatpush3.msra.mxu0 %v5345_v52  ;;  %3789 = vmatprep.mubr.msk.f32.mxu0 %vm4084_vm9, %v5562_v17 }
 0x5a3   :  { %3787 = vmatprep.subr.mxu0 %v5562_v17 }
 0x5a4   :  { %3788 = vmatpush3.msra.mxu0 %v5351_v63 }
 0x5a5   :  { %3803 = vmatprep.subr.mxu0 %v5562_v17  ;;  %3790 = vmatmul.mubr.msk.f32.vlgmr.msra.gmra.mxu0 %vm249_vm0, %v5563_v6 }
 0x5a6   :  { %3804 = vmatpush3.msra.mxu0 %v5339_v15  ;;  %3811 = vmatprep.mubr.msk.f32.mxu0 %vm4084_vm9, %v5562_v17 }
 0x5a7   :  { %3805 = vmatprep.subr.mxu0 %v5562_v17 }
 0x5a8   :  { %3806 = vmatpush3.msra.mxu0 %v5341_v36 }
 0x5a9   :  { %3807 = vmatprep.subr.mxu0 %v5562_v17 }
 0x5aa   :  { %3808 = vmatpush3.msra.mxu0 %v5345_v52 }
 0x5ab   :  { %3809 = vmatprep.subr.mxu0 %v5562_v17 }
 0x5ac   :  { %3810 = vmatpush3.msra.mxu0 %v5351_v63 }
 0x5ad   :  { %3812 = vmatmul.mubr.msk.f32.vlgmr.msra.gmra.mxu0 %vm249_vm0, %v5564_v38 }
 0x5ae   :  { %3074 = vmatprep.mubr.f32.mxu0 %v5562_v17 }
 0x653   :  { %v2665_v24 = vpop.f32.mrf.mxu1 }
 0x655   :  { %v3780_v25 = vpop.f32.mrf.mxu1 }
 0x65b   :  { %v2806_v53 = vpop.f32.mrf.mxu1 }
 0x65d   :  { %v3766_v39 = vpop.f32.mrf.mxu0  ;;  %v3802_v55 = vpop.f32.mrf.mxu1 }
 0x65e   :  { %v2588_v47 = vsub.f32 %v5567_v1, %v3766_v39  ;;  %v5569_v55 = vld [vmem:[#allocation17_spill] sm:$0xff]  ;;  %v5574_v1 = vld [vmem:[#allocation19_spill] sm:$0xff] }
 0x65f   :  { %v2568_v35 = vpop.f32.mrf.mxu0 }
 0x660   :  { %v2593_v23 = vmul.f32 1.442695, %v2588_v47 }
 0x661   :  { %v3769_v14 = vpop.f32.mrf.mxu0 }
 0x662   :  { %v2590_v50 = vsub.f32 %v5565_v18, %v3769_v14  ;;  %v5570_v14 = vld [vmem:[#allocation18_spill] sm:$0xff] }
 0x663   :  { %v2578_v51 = vpop.f32.mrf.mxu0 }
 0x664   :  { %v2597_v45 = vmul.f32 1.442695, %v2590_v50  ;;  %v2589_v20 = vsub.f32 %v5566_v60, %v2578_v51  ;;  %v2134_v50 = vld [vmem:[%s5529_s9] sm:$0xff] }
 0x665   :  { %v2735_v28 = vpop.f32.mrf.mxu0 }
 0x666   :  { %3908 = vpow2.f32 %v2597_v45  ;;  %v2595_v0 = vmul.f32 1.442695, %v2589_v20  ;;  %v2739_v11 = vmax.f32 %v2665_v24, %v2735_v28  ;;  %v5571_v45 = vld [vmem:[#allocation15_spill] sm:$0xff]  ;;  %v5572_v20 = vld [vmem:[#allocation16_spill] sm:$0xff] }
 0x667   :  { %v3791_v19 = vpop.f32.mrf.mxu0 }
 0x668   :  { %3910 = vpow2.f32 %v2595_v0  ;;  %v2810_v31 = vmax.f32 %v2739_v11, %v2806_v53  ;;  %v5575_v19 = vld [vmem:[#allocation21_spill] sm:$0xff] }
 0x669   :  { %3912 = vpow2.f32 %v2593_v23  ;;  %v5576_v23 = vld [vmem:[#allocation22_spill] sm:$0xff] }
 0x66d   :  { %v2877_v43 = vpop.f32.mrf.mxu0 }
 0x66e   :  { %v2881_v9 = vmax.f32 %v2810_v31, %v2877_v43 }
 0x66f   :  { %v3813_v59 = vpop.f32.mrf.mxu0 }
 0x670   :  { %3814 = vmatprep.subr.mxu1 %v2881_v9 }
 0x671   :  { %3815 = vmatpush3.msra.mxu1 %v2881_v9 }
 0x672   :  { %3817 = vmatmul.mubr.msk.f32.vlgmr.msra.gmra.mxu1 %vm2489_vm10, %v5369_v5 }
 0x673   :  { %v5421_v13 = vpop.eup %3908  ;;  %3819 = vmatprep.mubr.msk.f32.mxu1 %vm2489_vm10, %v5374_v33 }
 0x674   :  { %2996 = vperm.xlu1 %3882, %v5421_v13  }
 0x675   :  { %v5428_v40 = vpop.eup %3910 }
 0x676   :  { %3820 = vmatmul.mubr.msk.f32.gmra.mxu1 %vm2489_vm10, %v5389_v37  ;;  %v5432_v41 = vpop.eup %3912 }
 0x677   :  { %3173 = vmatprep.mubr.f32.mxu1 %v5562_v17 }
 0x678   :  { %2991 = vperm.xlu1 %3882, %v5428_v40  }
 0x67c   :  { %2986 = vperm.xlu1 %3882, %v5432_v41  }
 0x6ef   :  { %v2997_v54 = vpop.permute.xlu1 %2996 }
 0x6f0   :  { %v3005_v12 = vmul.f32 %v2997_v54, %v5303_v27  ;;  %v3006_v7 = vmul.f32 %v2997_v54, %v5312_v2  ;;  %v2587_v27 = vsub.f32 %v5568_v16, %v2568_v35 }
 0x6f2   :  { %3034 = vmatprep.subr.mxu0 %v3006_v7  ;;  %v2591_v62 = vmul.f32 1.442695, %v2587_v27 }
 0x6f3   :  { %v2992_v29 = vpop.permute.xlu1 %2991  ;;  %3035 = vmatpush1.msra.mxu0 %v3005_v12 }
 0x6f4   :  { %v3003_v21 = vmul.f32 %v2992_v29, %v5297_v8  ;;  %v3004_v58 = vmul.f32 %v2992_v29, %v5300_v61 }
 0x6f6   :  { %3036 = vmatprep.subr.mxu0 %v3004_v58 }
 0x6f7   :  { %v2987_v4 = vpop.permute.xlu1 %2986  ;;  %3037 = vmatpush1.msra.mxu0 %v3003_v21 }
 0x6f8   :  { %v3001_v46 = vmul.f32 %v2987_v4, %v5314_v10  ;;  %v3002_v32 = vmul.f32 %v2987_v4, %v5310_v26 }
 0x6fa   :  { %3038 = vmatprep.subr.mxu0 %v3002_v32 }
 0x6fb   :  { %3039 = vmatpush1.msra.mxu0 %v3001_v46 }
 0x732   :  { %v3818_v30 = vpop.f32.mrf.mxu1 }
 0x733   :  { %v2968_v2 = vsub.f32 %v5345_v52, %v3818_v30 }
 0x734   :  { %v2948_v56 = vpop.f32.mrf.mxu1 }
 0x735   :  { %v2973_v34 = vmul.f32 1.442695, %v2968_v2  ;;  %v2967_v26 = vsub.f32 %v5351_v63, %v2948_v56 }
 0x736   :  { %v3821_v8 = vpop.f32.mrf.mxu1 }
 0x737   :  { %3914 = vpow2.f32 %v2973_v34  ;;  %v2970_v61 = vsub.f32 %v5339_v15, %v3821_v8  ;;  %v2971_v44 = vmul.f32 1.442695, %v2967_v26 }
 0x738   :  { %v2958_v49 = vpop.f32.mrf.mxu1  ;;  %3916 = vpow2.f32 %v2591_v62 }
 0x739   :  { %v2977_v57 = vmul.f32 1.442695, %v2970_v61  ;;  %v2969_v10 = vsub.f32 %v5341_v36, %v2958_v49 }
 0x73b   :  { %3918 = vpow2.f32 %v2977_v57  ;;  %v2975_v3 = vmul.f32 1.442695, %v2969_v10 }
 0x73d   :  { %3920 = vpow2.f32 %v2975_v3 }
 0x73e   :  { %3922 = vpow2.f32 %v2971_v44 }
 0x744   :  { %v3915_v52 = vpop.eup %3914 }
 0x745   :  { %3088 = vperm.xlu1 %3882, %v3915_v52   ;;  %v3917_v6 = vpop.eup %3916 }
 0x748   :  { %v3919_v38 = vpop.eup %3918 }
 0x749   :  { %2981 = vperm.xlu1 %3882, %v3917_v6   ;;  %3098 = vperm.xlu0 %3883, %v3919_v38  }
 0x74a   :  { %v3921_v24 = vpop.eup %3920 }
 0x74b   :  { %v3923_v15 = vpop.eup %3922 }
 0x74d   :  { %3093 = vperm.xlu1 %3882, %v3921_v24  }
 0x751   :  { %3083 = vperm.xlu1 %3882, %v3923_v15  }
 0x7c0   :  { %v3089_v25 = vpop.permute.xlu1 %3088 }
 0x7c1   :  { %v3103_v47 = vmul.f32 %v3089_v25, %v5574_v1 }
 0x7c4   :  { %v2982_v36 = vpop.permute.xlu1 %2981  ;;  %v3099_v53 = vpop.permute.xlu0 %3098 }
 0x7c5   :  { %v2999_v63 = vmul.f32 %v2982_v36, %v5324_v42  ;;  %v3000_v39 = vmul.f32 %v2982_v36, %v5320_v48  ;;  %v3107_v35 = vmul.f32 %v3099_v53, %v5569_v55  ;;  %v3108_v18 = vmul.f32 %v3099_v53, %v5570_v14  ;;  %v5573_v48 = vld [vmem:[#allocation20_spill] sm:$0xff]  ;;  %v3954_v55 = vld [vmem:[%s5520_s0 + $0x30] sm:$0xff] }
 0x7c6   :  { %v3104_v42 = vmul.f32 %v3089_v25, %v5573_v48  ;;  %v3953_v53 = vld [vmem:[%s5520_s0 + $0x28] sm:$0xff] }
 0x7c7   :  { %3040 = vmatprep.subr.mxu0 %v3000_v39  ;;  %3133 = vmatprep.subr.mxu1 %v3108_v18  ;;  %v3955_v18 = vld [vmem:[%s5520_s0 + $0x38] sm:$0xff] }
 0x7c8   :  { %3041 = vmatpush1.msra.mxu0 %v2999_v63  ;;  %3134 = vmatpush1.msra.mxu1 %v3107_v35  ;;  %v3094_v51 = vpop.permute.xlu1 %3093 }
 0x7c9   :  { %v3105_v60 = vmul.f32 %v3094_v51, %v5571_v45  ;;  %v3106_v28 = vmul.f32 %v3094_v51, %v5572_v20  ;;  %3822 = vmatprep.subr.mxu0 %v5562_v17  ;;  %3582 = vmatmul.mubr.msk.f32.vlgmr.msra.gmra.mxu0 %vm249_vm0, %v2134_v50 }
 0x7ca   :  { %3823 = vmatpush3.msra.mxu0 %v5421_v13  ;;  %3830 = vmatprep.mubr.msk.f32.mxu0 %vm4084_vm9, %v5562_v17 }
 0x7cb   :  { %3135 = vmatprep.subr.mxu1 %v3106_v28  ;;  %3824 = vmatprep.subr.mxu0 %v5562_v17 }
 0x7cc   :  { %3136 = vmatpush1.msra.mxu1 %v3105_v60  ;;  %3825 = vmatpush3.msra.mxu0 %v5428_v40  ;;  %v3084_v0 = vpop.permute.xlu1 %3083 }
 0x7cd   :  { %v3101_v11 = vmul.f32 %v3084_v0, %v5575_v19  ;;  %v3102_v31 = vmul.f32 %v3084_v0, %v5576_v23  ;;  %3137 = vmatprep.subr.mxu1 %v3104_v42  ;;  %3826 = vmatprep.subr.mxu0 %v5562_v17 }
 0x7ce   :  { %3138 = vmatpush1.msra.mxu1 %v3103_v47  ;;  %3827 = vmatpush3.msra.mxu0 %v5432_v41 }
 0x7cf   :  { %3139 = vmatprep.subr.mxu1 %v3102_v31  ;;  %3828 = vmatprep.subr.mxu0 %v5562_v17 }
 0x7d0   :  { %3140 = vmatpush1.msra.mxu1 %v3101_v11  ;;  %3829 = vmatpush3.msra.mxu0 %v3917_v6  ;;  %v3951_v6 = vld [vmem:[%s5520_s0 + $0x18] sm:$0xff] }
 0x7d1   :  { %3831 = vmatmul.mubr.msk.f32.vlgmr.msra.gmra.mxu0 %vm249_vm0, %v2134_v50  ;;  %3833 = vmatprep.subr.mxu1 %v5562_v17 }
 0x7d2   :  { %3583 = vmatmul.mubr.msk.f32.vlgmr.msra.gmra.mxu1 %vm249_vm0, %v2134_v50  ;;  %3414 = vmatprep.mubr.f32.mxu0 %v5562_v17 }
 0x7d3   :  { %3834 = vmatpush3.msra.mxu1 %v3919_v38  ;;  %3841 = vmatprep.mubr.msk.f32.mxu1 %vm4084_vm9, %v5562_v17 }
 0x7d4   :  { %3835 = vmatprep.subr.mxu1 %v5562_v17 }
 0x7d5   :  { %3836 = vmatpush3.msra.mxu1 %v3921_v24 }
 0x7d6   :  { %3837 = vmatprep.subr.mxu1 %v5562_v17 }
 0x7d7   :  { %3838 = vmatpush3.msra.mxu1 %v3915_v52 }
 0x7d8   :  { %3839 = vmatprep.subr.mxu1 %v5562_v17 }
 0x7d9   :  { %3840 = vmatpush3.msra.mxu1 %v3923_v15  ;;  %v3952_v15 = vld [vmem:[%s5520_s0 + $0x20] sm:$0xff] }
 0x7da   :  { %3842 = vmatmul.mubr.msk.f32.vlgmr.msra.gmra.mxu1 %vm249_vm0, %v2134_v50 }
 0x889   :  { %v3076_v43 = vpop.f32.mrf.mxu0 }
 0x88b   :  { %v3078_v9 = vpop.f32.mrf.mxu0 }
 0x891   :  { %v3246_v59 = vpop.f32.mrf.mxu0 }
 0x892   :  { %3322 = vperm.xlu1 %3882, %v3246_v59   ;;  %v3175_v40 = vpop.f32.mrf.mxu1 }
 0x893   :  { %v3832_v13 = vpop.f32.mrf.mxu0 }
 0x894   :  { %v3177_v41 = vpop.f32.mrf.mxu1 }
 0x89a   :  { %v3316_v54 = vpop.f32.mrf.mxu1 }
 0x89b   :  { %3330 = vperm.xlu1 %3882, %v3316_v54  }
 0x89c   :  { %v3843_v12 = vpop.f32.mrf.mxu1 }
 0x90d   :  { %v3323_v7 = vpop.permute.xlu1 %3322 }
 0x90e   :  { %3924 = vrcp.f32 %v3323_v7 }
 0x916   :  { %v3331_v29 = vpop.permute.xlu1 %3330 }
 0x917   :  { %3926 = vrcp.f32 %v3331_v29 }
 0x91b   :  { %v3925_v21 = vpop.eup %3924 }
 0x91c   :  { %v3326_v4 = vmul.f32 %v3925_v21, %v3076_v43  ;;  %v3327_v46 = vmul.f32 %v3925_v21, %v3078_v9 }
 0x924   :  { %v3927_v58 = vpop.eup %3926 }
 0x925   :  { %v3334_v32 = vmul.f32 %v3927_v58, %v3175_v40  ;;  %v3335_v16 = vmul.f32 %v3927_v58, %v3177_v41 }
 0x927   :  { %v3336_v27 = vadd.f32 %v3334_v32, %v3326_v4  ;;  %v3337_v30 = vadd.f32 %v3335_v16, %v3327_v46 }
 0x929   :  { %v3586_v2 = vmul.f32 -1.442695, %v3336_v27  ;;  %v3587_v56 = vmul.f32 -1.442695, %v3337_v30 }
 0x92b   :  { %3928 = vpow2.f32 %v3586_v2 }
 0x92c   :  { %3930 = vpow2.f32 %v3587_v56 }
 0x938   :  { %v3929_v34 = vpop.eup %3928 }
 0x939   :  { %v3931_v62 = vpop.eup %3930  ;;  %v3344_v8 = vadd.f32 1.0, %v3929_v34 }
 0x93a   :  { %v3345_v61 = vadd.f32 1.0, %v3931_v62 }
 0x93b   :  { %3932 = vrcp.f32 %v3344_v8 }
 0x93c   :  { %3934 = vrcp.f32 %v3345_v61 }
 0x948   :  { %v3933_v49 = vpop.eup %3932 }
 0x949   :  { %v3935_v57 = vpop.eup %3934 }
 0x94a   :  { %3380 = vmatprep.subr.mxu0 %v3935_v57 }
 0x94b   :  { %3381 = vmatpush1.msra.mxu0 %v3933_v49 }
 0x94c   :  { %3588 = vmatmul.mubr.msk.f32.vlgmr.msra.gmra.mxu0 %vm2489_vm10, %v5335_v22  ;;  %v3948_v22 = vld [vmem:[%s5520_s0] sm:$0xff] }
 0x94d   :  { %3420 = vmatprep.mubr.f32.mxu0 %v5562_v17 }
 0x950   :  { %3589 = vmatmul.mubr.msk.f32.gmra.mxu0 %vm2489_vm10, %v5369_v5  ;;  %v3949_v5 = vld [vmem:[%s5520_s0 + $0x8] sm:$0xff] }
 0x951   :  { %3426 = vmatprep.mubr.f32.mxu0 %v5562_v17 }
 0x954   :  { %3590 = vmatmul.mubr.msk.f32.gmra.mxu0 %vm2489_vm10, %v5374_v33 }
 0x955   :  { %3432 = vmatprep.mubr.f32.mxu0 %v5562_v17  ;;  %v3950_v17 = vld [vmem:[%s5520_s0 + $0x10] sm:$0xff] }
 0x958   :  { %3591 = vmatmul.mubr.msk.f32.gmra.mxu0 %vm2489_vm10, %v5389_v37 }
 0xa0c   :  { %v3416_v10 = vpop.f32.mrf.mxu0 }
 0xa0d   :  { %v3439_v26 = vmul.f32 %v3948_v22, %v3416_v10 }
 0xa0e   :  { %v3418_v3 = vpop.f32.mrf.mxu0 }
 0xa0f   :  { %3447 = vst [vmem:[#allocation10] sm:$0xff] %v3439_v26  ;;  %v3440_v44 = vmul.f32 %v3949_v5, %v3418_v3 }
 0xa10   :  { %v3422_v52 = vpop.f32.mrf.mxu0 }
 0xa11   :  { %3448 = vst [vmem:[#allocation10 + $0x8] sm:$0xff] %v3440_v44  ;;  %v3441_v33 = vmul.f32 %v3950_v17, %v3422_v52 }
 0xa12   :  { %v3424_v37 = vpop.f32.mrf.mxu0 }
 0xa13   :  { %3449 = vst [vmem:[#allocation10 + $0x10] sm:$0xff] %v3441_v33  ;;  %v3442_v38 = vmul.f32 %v3951_v6, %v3424_v37 }
 0xa14   :  { %v3428_v24 = vpop.f32.mrf.mxu0 }
 0xa15   :  { %3450 = vst [vmem:[#allocation10 + $0x18] sm:$0xff] %v3442_v38  ;;  %v3443_v25 = vmul.f32 %v3952_v15, %v3428_v24 }
 0xa16   :  { %v3430_v36 = vpop.f32.mrf.mxu0 }
 0xa17   :  { %3451 = vst [vmem:[#allocation10 + $0x20] sm:$0xff] %v3443_v25  ;;  %v3444_v63 = vmul.f32 %v3953_v53, %v3430_v36 }
 0xa18   :  { %v3434_v39 = vpop.f32.mrf.mxu0 }
 0xa19   :  { %3452 = vst [vmem:[#allocation10 + $0x28] sm:$0xff] %v3444_v63  ;;  %v3445_v35 = vmul.f32 %v3954_v55, %v3434_v39 }
 0xa1a   :  { %v3436_v14 = vpop.f32.mrf.mxu0 }
 0xa1b   :  { %3453 = vst [vmem:[#allocation10 + $0x30] sm:$0xff] %v3445_v35  ;;  %v3446_v50 = vmul.f32 %v3955_v18, %v3436_v14 }
 0xa1d   :  { %3454 = vst [vmem:[#allocation10 + $0x38] sm:$0xff] %v3446_v50 }
 0xa1e   :  { %4047 = shalt.err (!%p4044_p10)
}
 0xa1f   :  { %3466 = dma.vmem_to_hbm [thread:$0]  %s3461_s6, 1024, %s5531_s11, [#allocation4], %s4066_s22, %s4066_s22, %s4067_s23  }
 0xa20   :  { %4062 = dma.done.wait [#allocation4], 1024  }
 0xa21   :  { %4063 = vsyncadd [#allocation4], 4294966272 }
 0xa22   :  { %3470 = vsyncpa [#allocation3], 1 }
 0xa23   :  { %3471 = vsyncpa [#allocation6], 1 }
 0xa24   :  { %3472 = vsyncpa [#allocation9], 1 }
 0xa25   :  { %3473 = vsyncpa [#allocation4], 1 }

// kernel: tpu_custom_call.1
= control target key start
LH: loop header
LB: loop body
LE: loop exit
PB: predicated region body
PF: predicated region fallthrough
CT: control target
= control target key end

     0   :  { %16 = vsyncpa [#allocation3], 0  ;;  %s5520_s0 = inlined_call_operand.vmem [shape: f32[32,256], index: 0, kind: input, shape index: {}]   ;;  %s5521_s1 = inlined_call_operand.vmem [shape: f32[256,32], index: 1, kind: input, shape index: {}]   ;;  %s5522_s2 = inlined_call_operand.hbm [shape: f32[32,256], index: 2, kind: input, shape index: {}]   ;;  %s5523_s3 = inlined_call_operand.hbm [shape: f32[32,256], index: 3, kind: input, shape index: {}]   ;;  %s5524_s4 = inlined_call_operand.vmem [shape: f32[9,256], index: 4, kind: input, shape index: {}]   ;;  %s5525_s5 = inlined_call_operand.hbm [shape: f32[32,32], index: 5, kind: input, shape index: {}]   ;;  %s5526_s6 = inlined_call_operand.vmem [shape: f32[9,32,32], index: 6, kind: input, shape index: {}]   ;;  %s5527_s7 = inlined_call_operand.vmem [shape: f32[32,8], index: 7, kind: input, shape index: {}]   ;;  %s5528_s8 = inlined_call_operand.hbm [shape: f32[4,8,32], index: 8, kind: input, shape index: {}]   ;;  %s5529_s9 = inlined_call_operand.vmem [shape: f32[8,32], index: 9, kind: input, shape index: {}]   ;;  %s5530_s10 = inlined_call_operand.vmem [shape: f32[32,8], index: 10, kind: input, shape index: {}]   ;;  %s5531_s11 = inlined_call_operand.hbm [shape: f32[32,256], index: 11, kind: output, shape index: {}]  }
   0x1   :  { %17 = vsyncpa [#allocation6], 0 }
   0x2   :  { %18 = vsyncpa [#allocation9], 0 }
   0x3   :  { %19 = vsyncpa [#allocation4], 0  ;;  %s4064_s17 = smov [#allocation5]   ;;  %s4065_s19 = smov [#allocation2]  }
   0x4   :  { %s41_s18 = sshll.u32 %s4064_s17, 4  ;;  %s29_s20 = sshll.u32 %s4065_s19, 4  ;;  %s42_s18 = int_to_ptr.vmem [resolvable:$true] %s41_s18  ;;  %s30_s20 = int_to_ptr.vmem [resolvable:$true] %s29_s20 }
   0x5   :  { %s3964_s21 = scalar_lea.vmem %s42_s18, 1024  ;;  %p3969_p1 = scmp.lt.s32.totalorder %s42_s18, %s42_s18 }
   0x6   :  { %p3965_p0 = scmp.ne.s32.totalorder %s42_s18, %s3964_s21  ;;  %p3970_p2 = scmp.lt.s32.totalorder %s3964_s21, %s3964_s21 }
   0x8   :  { %p3971_p3 = por %p3970_p2, %p3969_p1 }
   0xa   :  { %p3972_p4 = pnand %p3971_p3, %p3965_p0 }
   0xc   :  { %3975 = shalt.err (!%p3972_p4)
}
   0xd   :  { %s4066_s22 = smov 256   ;;  %s4067_s23 = smov 16  }
   0xe   :  { %47 = dma.hbm_to_vmem [thread:$0]  %s5523_s3, 1024, %s42_s18, [#allocation6], %s4066_s22, %s4066_s22, %s4067_s23  }
   0xf   :  { %s3984_s26 = scalar_lea.vmem %s30_s20, 1024  ;;  %p3989_p6 = scmp.lt.s32.totalorder %s30_s20, %s30_s20 }
  0x10   :  { %p3985_p5 = scmp.ne.s32.totalorder %s30_s20, %s3984_s26  ;;  %p3990_p7 = scmp.lt.s32.totalorder %s3984_s26, %s3984_s26 }
  0x12   :  { %p3991_p8 = por %p3990_p7, %p3989_p6 }
  0x14   :  { %p3992_p9 = pnand %p3991_p8, %p3985_p5 }
  0x16   :  { %3995 = shalt.err (!%p3992_p9)
}
  0x17   :  { %35 = dma.hbm_to_vmem [thread:$0]  %s5522_s2, 1024, %s30_s20, [#allocation3], %s4066_s22, %s4066_s22, %s4067_s23  }
  0x18   :  { %s4068_s29 = smov [#allocation7]  }
  0x19   :  { %s55_s30 = sshll.u32 %s4068_s29, 4  ;;  %s56_s30 = int_to_ptr.vmem [resolvable:$true] %s55_s30 }
  0x1a   :  { %s4004_s12 = scalar_lea.vmem %s56_s30, 512  ;;  %p4009_p11 = scmp.lt.s32.totalorder %s56_s30, %s56_s30 }
  0x1b   :  { %p4005_p10 = scmp.ne.s32.totalorder %s56_s30, %s4004_s12  ;;  %p4010_p12 = scmp.lt.s32.totalorder %s4004_s12, %s4004_s12 }
  0x1d   :  { %p4011_p13 = por %p4010_p12, %p4009_p11 }
  0x1f   :  { %p4012_p0 = pnand %p4011_p13, %p4005_p10 }
  0x21   :  { %4015 = shalt.err (!%p4012_p0)
}
  0x22   :  { %s4069_s3 = smov 128   ;;  %s4070_s13 = smov 8  }
  0x23   :  { %61 = dma.hbm_to_vmem [thread:$0]  %s5525_s5, 512, %s56_s30, [#allocation6], %s4069_s3, %s4069_s3, %s4070_s13  }
  0x24   :  { %s4071_s16 = smov [#allocation8]  }
  0x25   :  { %s71_s17 = sshll.u32 %s4071_s16, 4  ;;  %s72_s17 = int_to_ptr.vmem [resolvable:$true] %s71_s17 }
  0x26   :  { %s4024_s2 = scalar_lea.vmem %s72_s17, 512  ;;  %p4029_p2 = scmp.lt.s32.totalorder %s72_s17, %s72_s17 }
  0x27   :  { %p4025_p1 = scmp.ne.s32.totalorder %s72_s17, %s4024_s2  ;;  %p4030_p3 = scmp.lt.s32.totalorder %s4024_s2, %s4024_s2 }
  0x29   :  { %p4031_p4 = por %p4030_p3, %p4029_p2 }
  0x2b   :  { %p4032_p5 = pnand %p4031_p4, %p4025_p1 }
  0x2d   :  { %4035 = shalt.err (!%p4032_p5)
}
  0x2e   :  { %77 = dma.hbm_to_vmem [thread:$0]  %s5528_s8, 512, %s72_s17, [#allocation9], %s4069_s3, %s4069_s3, %s4070_s13  }
  0x2f   :  { %4056 = dma.done.wait [#allocation3], 1024  }
  0x30   :  { %4057 = vsyncadd [#allocation3], 4294966272 }
  0x31   :  { %4058 = dma.done.wait [#allocation6], 1536  }
  0x32   :  { %4059 = vsyncadd [#allocation6], 4294965760 }
  0x33   :  { %4060 = dma.done.wait [#allocation9], 512  }
  0x34   :  { %4061 = vsyncadd [#allocation9], 4294966784  ;;  %v139_v0 = vld [vmem:[%s5521_s1 + $0xf8] sm:$0xff]  ;;  %v138_v2 = vld [vmem:[%s5521_s1 + $0xf0] sm:$0xff]  ;;  %vm249_vm0 = vcmask 261120   ;;  %v4072_v43 = vmov 0  }
  0x35   :  { %v123_v1 = vld [vmem:[%s5521_s1 + $0x78] sm:$0xff]  ;;  %3592 = vmatprep.subr.mxu0 %v139_v0  ;;  %v122_v3 = vld [vmem:[%s5521_s1 + $0x70] sm:$0xff]  ;;  %v137_v4 = vld [vmem:[%s5521_s1 + $0xe8] sm:$0xff]  ;;  %3874 = vset.pattern.permute.xlu0 %v4072_v43  ;;  %s4074_s24 = smov 17   ;;  %s4076_s25 = smov 15   ;;  %vm4084_vm9 = vmmov 0  }
  0x36   :  { %3593 = vmatpush3.msra.mxu0 %v123_v1  ;;  %v121_v5 = vld [vmem:[%s5521_s1 + $0x68] sm:$0xff]  ;;  %v136_v6 = vld [vmem:[%s5521_s1 + $0xe0] sm:$0xff]  ;;  %v135_v8 = vld [vmem:[%s5521_s1 + $0xd8] sm:$0xff]  ;;  %3875 = vset.pattern.permute.xlu1 %v4072_v43  ;;  %v5546_v1 = vmov 0.0   ;;  %s4077_s26 = smov 1   ;;  %s4078_s8 = smov 127  }
  0x37   :  { %3594 = vmatprep.subr.mxu0 %v138_v2  ;;  %v120_v7 = vld [vmem:[%s5521_s1 + $0x60] sm:$0xff]  ;;  %v119_v9 = vld [vmem:[%s5521_s1 + $0x58] sm:$0xff]  ;;  %v134_v10 = vld [vmem:[%s5521_s1 + $0xd0] sm:$0xff]  ;;  %s4079_s27 = smov 113   ;;  %s4081_s28 = smov 112   ;;  %vm2489_vm10 = vcmask 64512  }
  0x38   :  { %3595 = vmatpush3.msra.mxu0 %v122_v3  ;;  %v118_v11 = vld [vmem:[%s5521_s1 + $0x50] sm:$0xff]  ;;  %v133_v12 = vld [vmem:[%s5521_s1 + $0xc8] sm:$0xff]  ;;  %v132_v15 = vld [vmem:[%s5521_s1 + $0xc0] sm:$0xff]  ;;  %s4082_s15 = smov 111   ;;  %s4085_s12 = smov [#allocation10]  }
  0x39   :  { %3596 = vmatprep.subr.mxu0 %v137_v4  ;;  %v4206_v13 = vld [vmem:[%s5520_s0 + $0x8] sm:$0xff]  ;;  %v116_v16 = vld [vmem:[%s5521_s1 + $0x40] sm:$0xff]  ;;  %v131_v17 = vld [vmem:[%s5521_s1 + $0xb8] sm:$0xff] }
  0x3a   :  { %3597 = vmatpush3.msra.mxu0 %v121_v5  ;;  %v117_v14 = vld [vmem:[%s5521_s1 + $0x48] sm:$0xff]  ;;  %204 = vmatprep.mubr.f32.mxu0 %v4206_v13  ;;  %v115_v18 = vld [vmem:[%s5521_s1 + $0x38] sm:$0xff]  ;;  %v130_v19 = vld [vmem:[%s5521_s1 + $0xb0] sm:$0xff] }
  0x3b   :  { %3598 = vmatprep.subr.mxu0 %v136_v6  ;;  %v114_v20 = vld [vmem:[%s5521_s1 + $0x30] sm:$0xff]  ;;  %v129_v21 = vld [vmem:[%s5521_s1 + $0xa8] sm:$0xff]  ;;  %v128_v23 = vld [vmem:[%s5521_s1 + $0xa0] sm:$0xff] }
  0x3c   :  { %3599 = vmatpush3.msra.mxu0 %v120_v7  ;;  %v113_v22 = vld [vmem:[%s5521_s1 + $0x28] sm:$0xff]  ;;  %v112_v24 = vld [vmem:[%s5521_s1 + $0x20] sm:$0xff]  ;;  %v127_v25 = vld [vmem:[%s5521_s1 + $0x98] sm:$0xff]  ;;  %v4075_v7 = vmov 2  }
  0x3d   :  { %3600 = vmatprep.subr.mxu0 %v135_v8  ;;  %v111_v26 = vld [vmem:[%s5521_s1 + $0x18] sm:$0xff]  ;;  %v126_v27 = vld [vmem:[%s5521_s1 + $0x90] sm:$0xff]  ;;  %v125_v29 = vld [vmem:[%s5521_s1 + $0x88] sm:$0xff] }
  0x3e   :  { %3601 = vmatpush3.msra.mxu0 %v119_v9  ;;  %v110_v28 = vld [vmem:[%s5521_s1 + $0x10] sm:$0xff]  ;;  %v109_v30 = vld [vmem:[%s5521_s1 + $0x8] sm:$0xff]  ;;  %v124_v31 = vld [vmem:[%s5521_s1 + $0x80] sm:$0xff] }
  0x3f   :  { %3602 = vmatprep.subr.mxu0 %v134_v10  ;;  %v108_v32 = vld [vmem:[%s5521_s1] sm:$0xff]  ;;  %v4274_v34 = vld [vmem:[%s5520_s0 + $0x18] sm:$0xff]  ;;  %v4281_v35 = vld [vmem:[%s5520_s0 + $0x10] sm:$0xff] }
  0x40   :  { %3603 = vmatpush3.msra.mxu0 %v118_v11  ;;  %v4269_v33 = vld [vmem:[%s5520_s0] sm:$0xff]  ;;  %v4286_v36 = vld [vmem:[%s5520_s0 + $0x28] sm:$0xff]  ;;  %v4298_v38 = vld [vmem:[%s5520_s0 + $0x38] sm:$0xff] }
  0x41   :  { %3604 = vmatprep.subr.mxu0 %v133_v12  ;;  %v4293_v37 = vld [vmem:[%s5520_s0 + $0x20] sm:$0xff]  ;;  %v4305_v39 = vld [vmem:[%s5520_s0 + $0x30] sm:$0xff]  ;;  %v4323_v44 = vld [vmem:[%s5527_s7 + $0x8] sm:$0xff] }
  0x42   :  { %3605 = vmatpush3.msra.mxu0 %v117_v14  ;;  %v225_v40 = vld [vmem:[#allocation7] sm:$0xff]  ;;  %v4315_v42 = vld [vmem:[%s5527_s7 + $0x10] sm:$0xff]  ;;  %v4328_v45 = vld [vmem:[%s5527_s7 + $0x18] sm:$0xff] }
  0x43   :  { %3606 = vmatprep.subr.mxu0 %v132_v15  ;;  %3712 = vmatprep.mubr.msk.f32.mxu1 %vm249_vm0, %v225_v40  ;;  %v102_v41 = vld [vmem:[%s5527_s7] sm:$0xff]  ;;  %v226_v58 = vld [vmem:[#allocation7 + $0x8] sm:$0xff]  ;;  %v227_v59 = vld [vmem:[#allocation7 + $0x10] sm:$0xff] }
  0x44   :  { %3607 = vmatpush3.msra.mxu0 %v116_v16  ;;  %231 = vperm.xlu0 %3874, %v102_v41   ;;  %v228_v60 = vld [vmem:[#allocation7 + $0x18] sm:$0xff]  ;;  %v377_v62 = vld [vmem:[#allocation2 + $0x30] sm:$0xff]  ;;  %v376_v63 = vld [vmem:[#allocation2 + $0x28] sm:$0xff] }
  0x45   :  { %3608 = vmatprep.subr.mxu0 %v131_v17  ;;  %241 = vperm.xlu1 %3875, %v4315_v42   ;;  %v378_v61 = vld [vmem:[#allocation2 + $0x38] sm:$0xff]  ;;  %v375_v0 = vld [vmem:[#allocation2 + $0x20] sm:$0xff]  ;;  %v373_v3 = vld [vmem:[#allocation2 + $0x10] sm:$0xff] }
  0x46   :  { %3609 = vmatpush3.msra.mxu0 %v115_v18  ;;  %v374_v2 = vld [vmem:[#allocation2 + $0x18] sm:$0xff]  ;;  %v372_v4 = vld [vmem:[#allocation2 + $0x8] sm:$0xff]  ;;  %v371_v5 = vld [vmem:[#allocation2] sm:$0xff] }
  0x47   :  { %3610 = vmatprep.subr.mxu0 %v130_v19  ;;  %v487_v6 = vld [vmem:[#allocation5 + $0x38] sm:$0xff]  ;;  %v486_v41 = vld [vmem:[#allocation5 + $0x30] sm:$0xff] }
  0x48   :  { %3611 = vmatpush3.msra.mxu0 %v114_v20  ;;  %236 = vperm.xlu0 %3874, %v4323_v44  }
  0x49   :  { %3612 = vmatprep.subr.mxu0 %v129_v21  ;;  %246 = vperm.xlu1 %3875, %v4328_v45  }
  0x4a   :  { %3613 = vmatpush3.msra.mxu0 %v113_v22 }
  0x4b   :  { %3614 = vmatprep.subr.mxu0 %v128_v23 }
  0x4c   :  { %3615 = vmatpush3.msra.mxu0 %v112_v24  ;;  %789 = vrot.lane.b32.xlu0 %v4298_v38, %s4067_s23 }
  0x4d   :  { %3616 = vmatprep.subr.mxu0 %v127_v25  ;;  %781 = vrot.lane.b32.xlu1 %v4305_v39, %s4067_s23 }
  0x4e   :  { %3617 = vmatpush3.msra.mxu0 %v111_v26  ;;  %3877 = vset.pattern.permute.xlu1 %v4075_v7 }
  0x4f   :  { %3618 = vmatprep.subr.mxu0 %v126_v27  ;;  %3876 = vset.pattern.permute.xlu0 %v4075_v7 }
  0x50   :  { %3619 = vmatpush3.msra.mxu0 %v110_v28  ;;  %777 = vrot.lane.b32.xlu0 %v4281_v35, %s4067_s23  ;;  %v4080_v28 = vmov 3  }
  0x51   :  { %3620 = vmatprep.subr.mxu0 %v125_v29  ;;  %779 = vrot.lane.b32.xlu1 %v4293_v37, %s4067_s23 }
  0x52   :  { %3621 = vmatpush3.msra.mxu0 %v109_v30 }
  0x53   :  { %3622 = vmatprep.subr.mxu0 %v124_v31 }
  0x54   :  { %3623 = vmatpush3.msra.mxu0 %v108_v32  ;;  %775 = vrot.lane.b32.xlu0 %v4269_v33, %s4067_s23 }
  0x55   :  { %205 = vmatmul.mubr.f32.vlgmr.msra.gmra.mxu0 %v4269_v33  ;;  %787 = vrot.lane.b32.xlu1 %v4286_v36, %s4067_s23 }
  0x56   :  { %209 = vmatprep.mubr.f32.mxu0 %v4274_v34 }
  0x58   :  { %730 = vrot.lane.b32.xlu0 %v4305_v39, %s4074_s24 }
  0x59   :  { %210 = vmatmul.mubr.f32.gmra.mxu0 %v4281_v35  ;;  %785 = vrot.lane.b32.xlu1 %v4274_v34, %s4067_s23 }
  0x5a   :  { %214 = vmatprep.mubr.f32.mxu0 %v4286_v36 }
  0x5c   :  { %728 = vrot.lane.b32.xlu0 %v4293_v37, %s4074_s24 }
  0x5d   :  { %215 = vmatmul.mubr.f32.gmra.mxu0 %v4293_v37  ;;  %783 = vrot.lane.b32.xlu1 %v4206_v13, %s4067_s23 }
  0x5e   :  { %219 = vmatprep.mubr.f32.mxu0 %v4298_v38 }
  0x60   :  { %1034 = vrot.lane.b32.xlu0 %v4305_v39, %s4076_s25 }
  0x61   :  { %220 = vmatmul.mubr.f32.gmra.mxu0 %v4305_v39  ;;  %738 = vrot.lane.b32.xlu1 %v4298_v38, %s4074_s24 }
  0x62   :  { %902 = vmatprep.mubr.f32.mxu0 %v5546_v1 }
  0x64   :  { %726 = vrot.lane.b32.xlu0 %v4281_v35, %s4074_s24 }
  0x65   :  { %736 = vrot.lane.b32.xlu1 %v4286_v36, %s4074_s24 }
  0x68   :  { %1032 = vrot.lane.b32.xlu0 %v4293_v37, %s4076_s25 }
  0x69   :  { %1042 = vrot.lane.b32.xlu1 %v4298_v38, %s4076_s25 }
  0x6c   :  { %724 = vrot.lane.b32.xlu0 %v4269_v33, %s4074_s24 }
  0x6d   :  { %734 = vrot.lane.b32.xlu1 %v4274_v34, %s4074_s24 }
  0x70   :  { %1030 = vrot.lane.b32.xlu0 %v4281_v35, %s4076_s25 }
  0x71   :  { %1040 = vrot.lane.b32.xlu1 %v4286_v36, %s4076_s25 }
  0x74   :  { %1028 = vrot.lane.b32.xlu0 %v4269_v33, %s4076_s25 }
  0x75   :  { %732 = vrot.lane.b32.xlu1 %v4206_v13, %s4074_s24 }
  0x78   :  { %1194 = vrot.lane.b32.xlu0 %v4305_v39, %s4077_s26 }
  0x79   :  { %1038 = vrot.lane.b32.xlu1 %v4274_v34, %s4076_s25 }
  0x7c   :  { %1190 = vrot.lane.b32.xlu0 %v4281_v35, %s4077_s26 }
  0x7d   :  { %1036 = vrot.lane.b32.xlu1 %v4206_v13, %s4076_s25 }
  0x80   :  { %1476 = vrot.lane.b32.xlu0 %v4305_v39, %s4078_s8 }
  0x81   :  { %1202 = vrot.lane.b32.xlu1 %v4298_v38, %s4077_s26 }
  0x84   :  { %1474 = vrot.lane.b32.xlu0 %v4293_v37, %s4078_s8 }
  0x85   :  { %1192 = vrot.lane.b32.xlu1 %v4293_v37, %s4077_s26 }
  0x88   :  { %1482 = vrot.lane.b32.xlu0 %v4286_v36, %s4078_s8 }
  0x89   :  { %1200 = vrot.lane.b32.xlu1 %v4286_v36, %s4077_s26 }
  0x8c   :  { %1636 = vrot.lane.b32.xlu0 %v4305_v39, %s4079_s27 }
  0x8d   :  { %1198 = vrot.lane.b32.xlu1 %v4274_v34, %s4077_s26 }
  0x90   :  { %1644 = vrot.lane.b32.xlu0 %v4298_v38, %s4079_s27 }
  0x91   :  { %1188 = vrot.lane.b32.xlu1 %v4269_v33, %s4077_s26 }
  0x94   :  { %1472 = vrot.lane.b32.xlu0 %v4281_v35, %s4078_s8 }
  0x95   :  { %1196 = vrot.lane.b32.xlu1 %v4206_v13, %s4077_s26 }
  0x98   :  { %1634 = vrot.lane.b32.xlu0 %v4293_v37, %s4079_s27 }
  0x99   :  { %1484 = vrot.lane.b32.xlu1 %v4298_v38, %s4078_s8 }
  0x9c   :  { %1470 = vrot.lane.b32.xlu0 %v4269_v33, %s4078_s8 }
  0x9d   :  { %1480 = vrot.lane.b32.xlu1 %v4274_v34, %s4078_s8 }
  0xa0   :  { %1632 = vrot.lane.b32.xlu0 %v4281_v35, %s4079_s27 }
  0xa1   :  { %1642 = vrot.lane.b32.xlu1 %v4286_v36, %s4079_s27 }
  0xa4   :  { %1630 = vrot.lane.b32.xlu0 %v4269_v33, %s4079_s27 }
  0xa5   :  { %1478 = vrot.lane.b32.xlu1 %v4206_v13, %s4078_s8 }
  0xa8   :  { %689 = vperm.xlu0 %3876, %v4328_v45  }
  0xa9   :  { %1640 = vrot.lane.b32.xlu1 %v4274_v34, %s4079_s27 }
  0xac   :  { %681 = vperm.xlu0 %3876, %v4323_v44  }
  0xad   :  { %1638 = vrot.lane.b32.xlu1 %v4206_v13, %s4079_s27 }
  0xb0   :  { %1796 = vrot.lane.b32.xlu0 %v4305_v39, %s4081_s28 }
  0xb1   :  { %685 = vperm.xlu1 %3877, %v4315_v42  }
  0xb5   :  { %3878 = vset.pattern.permute.xlu1 %v4080_v28 }
  0xb6   :  { %713 = vperm.xlu1 %3878, %v4328_v45   ;;  %v484_v45 = vld [vmem:[#allocation5 + $0x20] sm:$0xff] }
  0xba   :  { %709 = vperm.xlu1 %3878, %v4315_v42  }
  0xbe   :  { %1804 = vrot.lane.b32.xlu1 %v4298_v38, %s4081_s28 }
  0xbf   :  { %v232_v8 = vpop.permute.xlu0 %231 }
  0xc0   :  { %v242_v10 = vpop.permute.xlu1 %241 }
  0xc3   :  { %v237_v9 = vpop.permute.xlu0 %236 }
  0xc4   :  { %v247_v18 = vpop.permute.xlu1 %246 }
 0x115   :  { %v3624_v46 = vpop.f32.mrf.mxu0 }
 0x117   :  { %v3625_v47 = vpop.f32.mrf.mxu0 }
 0x118   :  { %v3626_v57 = vadd.f32 %v3625_v47, %v3624_v46  ;;  %v485_v46 = vld [vmem:[#allocation5 + $0x28] sm:$0xff]  ;;  %v483_v47 = vld [vmem:[#allocation5 + $0x18] sm:$0xff] }
 0x119   :  { %v3627_v48 = vpop.f32.mrf.mxu0 }
 0x11b   :  { %v3628_v49 = vpop.f32.mrf.mxu0 }
 0x11c   :  { %v3629_v56 = vadd.f32 %v3628_v49, %v3627_v48  ;;  %v482_v48 = vld [vmem:[#allocation5 + $0x10] sm:$0xff]  ;;  %v481_v49 = vld [vmem:[#allocation5 + $0x8] sm:$0xff] }
 0x11d   :  { %v3630_v50 = vpop.f32.mrf.mxu0 }
 0x11f   :  { %v3631_v51 = vpop.f32.mrf.mxu0 }
 0x120   :  { %v3632_v55 = vadd.f32 %v3631_v51, %v3630_v50  ;;  %v480_v50 = vld [vmem:[#allocation5] sm:$0xff] }
 0x121   :  { %v3633_v52 = vpop.f32.mrf.mxu0 }
 0x123   :  { %v3634_v53 = vpop.f32.mrf.mxu0 }
 0x124   :  { %v3635_v54 = vadd.f32 %v3634_v53, %v3633_v52  ;;  %v782_v53 = vpop.permute.xlu1 %781 }
 0x126   :  { %3704 = vmatprep.subr.mxu1 %v3635_v54 }
 0x127   :  { %3705 = vmatpush3.msra.mxu1 %v3635_v54 }
 0x128   :  { %3706 = vmatprep.subr.mxu1 %v3632_v55  ;;  %v780_v54 = vpop.permute.xlu1 %779 }
 0x129   :  { %3707 = vmatpush3.msra.mxu1 %v3632_v55 }
 0x12a   :  { %3708 = vmatprep.subr.mxu1 %v3629_v56 }
 0x12b   :  { %3709 = vmatpush3.msra.mxu1 %v3629_v56  ;;  %v618_v56 = vlaneseq }
 0x12c   :  { %3710 = vmatprep.subr.mxu1 %v3626_v57  ;;  %v788_v55 = vpop.permute.xlu1 %787 }
 0x12d   :  { %3711 = vmatpush3.msra.mxu1 %v3626_v57  ;;  %v619_v57 = vshrl.u32 %v618_v56, 7 }
 0x12e   :  { %3713 = vmatmul.mubr.msk.f32.vlgmr.msra.gmra.mxu1 %vm249_vm0, %v226_v58  ;;  %415 = vmatprep.subr.mxu1 %v378_v61  ;;  %v3491_v61 = vld [vmem:[%s5524_s4 + $0x1] ss:$8 sm:$0x3] }
 0x12f   :  { %3715 = vmatprep.mubr.msk.f32.mxu1 %vm249_vm0, %v227_v59  ;;  %416 = vmatpush1.msra.mxu1 %v377_v62  ;;  %v4427_v59 = vand.u32 127, %v618_v56 }
 0x130   :  { %417 = vmatprep.subr.mxu1 %v376_v63  ;;  %v786_v58 = vpop.permute.xlu1 %785 }
 0x131   :  { %418 = vmatpush1.msra.mxu1 %v375_v0  ;;  %vm791_vm1 = vcmp.lt.s32.totalorder %v4427_v59, 16  ;;  %v4436_v0 = vsub.s32 1, %v619_v57  ;;  %vm742_vm2 = vcmp.lt.s32.totalorder %v4427_v59, 17  ;;  %vm1044_vm3 = vcmp.lt.s32.totalorder %v4427_v59, 15 }
 0x132   :  { %3716 = vmatmul.mubr.msk.f32.gmra.mxu1 %vm249_vm0, %v228_v60  ;;  %419 = vmatprep.subr.mxu1 %v374_v2  ;;  %v4429_v60 = vsub.s32 0, %v619_v57  ;;  %v790_v2 = vpop.permute.xlu0 %789  ;;  %v798_v7 = vsel %vm791_vm1, %v788_v55, %v780_v54  ;;  %vm1204_vm4 = vcmp.lt.s32.totalorder %v4427_v59, 1  ;;  %vm1486_vm5 = vcmp.lt.s32.totalorder %v4427_v59, 127 }
 0x133   :  { %455 = vmatprep.mubr.f32.mxu1 %v5546_v1  ;;  %420 = vmatpush1.msra.mxu1 %v373_v3  ;;  %v810_v3 = vrot.slane %v3491_v61, %v4436_v0  ;;  %vm1646_vm6 = vcmp.lt.s32.totalorder %v4427_v59, 113  ;;  %vm1806_vm7 = vcmp.lt.s32.totalorder %v4427_v59, 112  ;;  %vm1966_vm8 = vcmp.lt.s32.totalorder %v4427_v59, 111  ;;  %v3558_v59 = vld [vmem:[%s5526_s6 + $0x100] sm:$0xff] }
 0x134   :  { %421 = vmatprep.subr.mxu1 %v372_v4  ;;  %v784_v62 = vpop.permute.xlu1 %783  ;;  %v806_v63 = vrot.slane %v3491_v61, %v4429_v60  ;;  %v795_v4 = vsel %vm791_vm1, %v782_v53, %v790_v2 }
 0x135   :  { %422 = vmatpush1.msra.mxu1 %v371_v5  ;;  %v799_v5 = vsel %vm791_vm1, %v790_v2, %v782_v53  ;;  %v3504_v53 = vld [vmem:[%s5524_s4 + $0x2] ss:$8 sm:$0x3] }
 0x136   :  { %512 = vmatprep.subr.mxu1 %v487_v6 }
 0x138   :  { %v739_v6 = vpop.permute.xlu1 %738 }
 0x1ee   :  { %v3714_v11 = vpop.f32.mrf.mxu1 }
 0x1ef   :  { %v334_v12 = vadd.f32 %v3714_v11, %v237_v9  ;;  %v820_v9 = vmul.f32 %v810_v3, %v795_v4  ;;  %v817_v11 = vmul.f32 %v806_v63, %v798_v7  ;;  %v3492_v4 = vld [vmem:[%s5526_s6 + $0x20] sm:$0xff] }
 0x1f0   :  { %v328_v14 = vpop.f32.mrf.mxu1 }
 0x1f1   :  { %v3480_v15 = vmul.f32 -1.442695, %v334_v12  ;;  %v329_v16 = vadd.f32 %v328_v14, %v232_v8  ;;  %v819_v8 = vmul.f32 %v806_v63, %v799_v5  ;;  %862 = vmatprep.subr.mxu0 %v820_v9  ;;  %v778_v12 = vpop.permute.xlu0 %777  ;;  %v737_v14 = vpop.permute.xlu1 %736 }
 0x1f2   :  { %v3717_v17 = vpop.f32.mrf.mxu1 }
 0x1f3   :  { %v3479_v19 = vmul.f32 -1.442695, %v329_v16  ;;  %3884 = vpow2.f32 %v3480_v15  ;;  %v344_v21 = vadd.f32 %v3717_v17, %v247_v18  ;;  %863 = vmatpush1.msra.mxu0 %v819_v8  ;;  %v793_v15 = vsel %vm791_vm1, %v778_v12, %v786_v58 }
 0x1f4   :  { %v338_v20 = vpop.f32.mrf.mxu1  ;;  %v797_v16 = vsel %vm791_vm1, %v786_v58, %v778_v12 }
 0x1f5   :  { %3886 = vpow2.f32 %v3479_v19  ;;  %v339_v22 = vadd.f32 %v338_v20, %v242_v10  ;;  %v3482_v24 = vmul.f32 -1.442695, %v344_v21  ;;  %v794_v10 = vsel %vm791_vm1, %v780_v54, %v788_v55  ;;  %v1043_v20 = vpop.permute.xlu1 %1042  ;;  %v776_v21 = vpop.permute.xlu0 %775 }
 0x1f6   :  { %v818_v17 = vmul.f32 %v810_v3, %v794_v10  ;;  %v815_v18 = vmul.f32 %v806_v63, %v797_v16  ;;  %v816_v19 = vmul.f32 %v810_v3, %v793_v15  ;;  %v1059_v54 = vrot.slane %v3504_v53, %v4429_v60 }
 0x1f7   :  { %v3481_v23 = vmul.f32 -1.442695, %v339_v22  ;;  %v792_v22 = vsel %vm791_vm1, %v776_v21, %v784_v62  ;;  %v1063_v55 = vrot.slane %v3504_v53, %v4436_v0  ;;  %v772_v53 = vld [vmem:[%s5526_s6 + $0x8] sm:$0xff] }
 0x1f8   :  { %864 = vmatprep.subr.mxu0 %v818_v17 }
 0x1f9   :  { %3888 = vpow2.f32 %v3481_v23  ;;  %865 = vmatpush1.msra.mxu0 %v817_v11  ;;  %v796_v23 = vsel %vm791_vm1, %v784_v62, %v776_v21 }
 0x1fa   :  { %3890 = vpow2.f32 %v3482_v24  ;;  %866 = vmatprep.subr.mxu0 %v816_v19  ;;  %v813_v24 = vmul.f32 %v806_v63, %v796_v23 }
 0x1fb   :  { %867 = vmatpush1.msra.mxu0 %v815_v18 }
 0x200   :  { %v3885_v25 = vpop.eup %3884 }
 0x201   :  { %v360_v29 = vadd.f32 1.0, %v3885_v25  ;;  %v814_v25 = vmul.f32 %v810_v3, %v792_v22 }
 0x202   :  { %v3887_v26 = vpop.eup %3886 }
 0x203   :  { %v359_v27 = vadd.f32 1.0, %v3887_v26  ;;  %868 = vmatprep.subr.mxu0 %v814_v25  ;;  %v735_v26 = vpop.permute.xlu1 %734 }
 0x204   :  { %869 = vmatpush1.msra.mxu0 %v813_v24 }
 0x205   :  { %3892 = vrcp.f32 %v359_v27  ;;  %v731_v27 = vpop.permute.xlu0 %730  ;;  %3496 = vmatmul.mubr.msk.f32.vlgmr.msra.gmra.mxu0 %vm249_vm0, %v3492_v4 }
 0x206   :  { %v3889_v30 = vpop.eup %3888  ;;  %3894 = vrcp.f32 %v360_v29  ;;  %v751_v29 = vld [vmem:[%s5524_s4] ss:$8 sm:$0x3]  ;;  %908 = vmatprep.mubr.f32.mxu0 %v5546_v1 }
 0x207   :  { %v361_v31 = vadd.f32 1.0, %v3889_v30  ;;  %v3891_v32 = vpop.eup %3890  ;;  %v756_v30 = vrot.slane %v751_v29, %v4429_v60 }
 0x208   :  { %v362_v40 = vadd.f32 1.0, %v3891_v32  ;;  %v746_v32 = vsel %vm742_vm2, %v731_v27, %v739_v6 }
 0x209   :  { %3896 = vrcp.f32 %v361_v31  ;;  %v760_v31 = vrot.slane %v751_v29, %v4436_v0 }
 0x20a   :  { %3898 = vrcp.f32 %v362_v40  ;;  %v750_v40 = vsel %vm742_vm2, %v739_v6, %v731_v27  ;;  %v3513_v27 = vld [vmem:[%s5524_s4 + $0x3] ss:$8 sm:$0x3] }
 0x212   :  { %v3893_v44 = vpop.eup %3892 }
 0x213   :  { %3483 = vmatmul.mubr.msk.f32.vlgmr.msra.gmra.mxu1 %vm249_vm0, %v3893_v44  ;;  %v3895_v42 = vpop.eup %3894 }
 0x214   :  { %461 = vmatprep.mubr.f32.mxu1 %v5546_v1  ;;  %513 = vmatpush1.msra.mxu1 %v486_v41  ;;  %v1041_v41 = vpop.permute.xlu1 %1040 }
 0x215   :  { %514 = vmatprep.subr.mxu1 %v485_v46  ;;  %v770_v46 = vmul.f32 %v760_v31, %v746_v32 }
 0x216   :  { %515 = vmatpush1.msra.mxu1 %v484_v45  ;;  %v3897_v51 = vpop.eup %3896  ;;  %v769_v45 = vmul.f32 %v756_v30, %v750_v40  ;;  %v1219_v40 = vrot.slane %v3513_v27, %v4429_v60 }
 0x217   :  { %3484 = vmatmul.mubr.msk.f32.gmra.mxu1 %vm249_vm0, %v3895_v42  ;;  %516 = vmatprep.subr.mxu1 %v483_v47  ;;  %v3899_v52 = vpop.eup %3898 }
 0x218   :  { %467 = vmatprep.mubr.f32.mxu1 %v5546_v1  ;;  %517 = vmatpush1.msra.mxu1 %v482_v48 }
 0x219   :  { %518 = vmatprep.subr.mxu1 %v481_v49 }
 0x21a   :  { %519 = vmatpush1.msra.mxu1 %v480_v50  ;;  %v733_v50 = vpop.permute.xlu1 %732 }
 0x21b   :  { %3485 = vmatmul.mubr.msk.f32.gmra.mxu1 %vm249_vm0, %v3897_v51  ;;  %3844 = vmatprep.subr.mxu1 %v820_v9 }
 0x21c   :  { %473 = vmatprep.mubr.f32.mxu1 %v5546_v1 }
 0x21e   :  { %v1039_v58 = vpop.permute.xlu1 %1038 }
 0x21f   :  { %3486 = vmatmul.mubr.msk.f32.gmra.mxu1 %vm249_vm0, %v3899_v52 }
 0x220   :  { %552 = vmatprep.mubr.f32.mxu1 %v5546_v1 }
 0x222   :  { %v1037_v7 = vpop.permute.xlu1 %1036 }
 0x223   :  { %3487 = vmatmul.mubr.msk.f32.vlgmr.msra.gmra.mxu1 %vm249_vm0, %v3893_v44  ;;  %v729_v44 = vpop.permute.xlu0 %728 }
 0x224   :  { %558 = vmatprep.mubr.f32.mxu1 %v5546_v1  ;;  %3848 = vmatpush1.msra.mxu1 %v819_v8  ;;  %v745_v47 = vsel %vm742_vm2, %v729_v44, %v737_v14  ;;  %v749_v48 = vsel %vm742_vm2, %v737_v14, %v729_v44  ;;  %v3495_v14 = vld [vmem:[%s5526_s6 + $0x38] sm:$0xff] }
 0x225   :  { %3845 = vmatprep.subr.mxu1 %v818_v17  ;;  %v767_v49 = vmul.f32 %v756_v30, %v749_v48 }
 0x226   :  { %3849 = vmatpush1.msra.mxu1 %v817_v11  ;;  %v1203_v15 = vpop.permute.xlu1 %1202 }
 0x227   :  { %3488 = vmatmul.mubr.msk.f32.gmra.mxu1 %vm249_vm0, %v3895_v42  ;;  %3846 = vmatprep.subr.mxu1 %v816_v19  ;;  %v768_v42 = vmul.f32 %v760_v31, %v745_v47  ;;  %v771_v47 = vld [vmem:[%s5526_s6] sm:$0xff] }
 0x228   :  { %564 = vmatprep.mubr.f32.mxu1 %v5546_v1  ;;  %3850 = vmatpush1.msra.mxu1 %v815_v18 }
 0x229   :  { %3847 = vmatprep.subr.mxu1 %v814_v25 }
 0x22a   :  { %3851 = vmatpush1.msra.mxu1 %v813_v24  ;;  %v1193_v21 = vpop.permute.xlu1 %1192 }
 0x22b   :  { %3489 = vmatmul.mubr.msk.f32.gmra.mxu1 %vm249_vm0, %v3897_v51  ;;  %963 = vmatprep.subr.mxu1 %v770_v46  ;;  %v1035_v51 = vpop.permute.xlu0 %1034 }
 0x22c   :  { %570 = vmatprep.mubr.f32.mxu1 %v5546_v1  ;;  %v1048_v56 = vsel %vm1044_vm3, %v1035_v51, %v1043_v20  ;;  %v1052_v57 = vsel %vm1044_vm3, %v1043_v20, %v1035_v51 }
 0x22d   :  { %v1072_v62 = vmul.f32 %v1059_v54, %v1052_v57  ;;  %v1073_v63 = vmul.f32 %v1063_v55, %v1048_v56 }
 0x22e   :  { %v1201_v29 = vpop.permute.xlu1 %1200 }
 0x22f   :  { %3490 = vmatmul.mubr.msk.f32.gmra.mxu1 %vm249_vm0, %v3899_v52  ;;  %v3494_v52 = vld [vmem:[%s5526_s6 + $0x30] sm:$0xff]  ;;  %v727_v61 = vpop.permute.xlu0 %726  ;;  %1115 = vmatprep.subr.mxu0 %v1073_v63  ;;  %v1211_v48 = vsel %vm1204_vm4, %v1201_v29, %v1193_v21 }
 0x230   :  { %914 = vmatprep.mubr.f32.mxu1 %v5546_v1  ;;  %v744_v2 = vsel %vm742_vm2, %v727_v61, %v735_v26  ;;  %v748_v3 = vsel %vm742_vm2, %v735_v26, %v727_v61  ;;  %1116 = vmatpush1.msra.mxu0 %v1072_v62  ;;  %v1230_v57 = vmul.f32 %v1219_v40, %v1211_v48 }
 0x231   :  { %v765_v5 = vmul.f32 %v756_v30, %v748_v3  ;;  %v766_v6 = vmul.f32 %v760_v31, %v744_v2 }
 0x233   :  { %3498 = vmatmul.mubr.msk.f32.vlgmr.msra.gmra.mxu1 %vm249_vm0, %v3494_v52  ;;  %v1033_v8 = vpop.permute.xlu0 %1032 }
 0x234   :  { %964 = vmatpush1.msra.mxu1 %v769_v45  ;;  %920 = vmatprep.mubr.f32.mxu1 %v5546_v1  ;;  %v1047_v9 = vsel %vm1044_vm3, %v1033_v8, %v1041_v41  ;;  %v1051_v10 = vsel %vm1044_vm3, %v1041_v41, %v1033_v8  ;;  %v1223_v41 = vrot.slane %v3513_v27, %v4436_v0  ;;  %v3493_v8 = vld [vmem:[%s5526_s6 + $0x28] sm:$0xff]  ;;  %v3514_v27 = vld [vmem:[%s5526_s6 + $0x60] sm:$0xff] }
 0x235   :  { %965 = vmatprep.subr.mxu1 %v768_v42  ;;  %v1070_v11 = vmul.f32 %v1059_v54, %v1051_v10  ;;  %v1071_v12 = vmul.f32 %v1063_v55, %v1047_v9  ;;  %v1207_v45 = vsel %vm1204_vm4, %v1193_v21, %v1201_v29  ;;  %v1199_v42 = vpop.permute.xlu1 %1198  ;;  %v773_v9 = vld [vmem:[%s5526_s6 + $0x10] sm:$0xff]  ;;  %v3530_v10 = vld [vmem:[%s5524_s4 + $0x5] ss:$8 sm:$0x3]  ;;  %3497 = vmatmul.mubr.msk.f32.gmra.mxu0 %vm249_vm0, %v3493_v8 }
 0x236   :  { %966 = vmatpush1.msra.mxu1 %v767_v49  ;;  %1155 = vmatprep.mubr.f32.mxu0 %v5546_v1 }
 0x237   :  { %967 = vmatprep.subr.mxu1 %v766_v6  ;;  %3499 = vmatmul.mubr.msk.f32.gmra.mxu1 %vm249_vm0, %v3495_v14  ;;  %v725_v16 = vpop.permute.xlu0 %724 }
 0x238   :  { %968 = vmatpush1.msra.mxu1 %v765_v5  ;;  %1117 = vmatprep.subr.mxu0 %v1071_v12  ;;  %v743_v17 = vsel %vm742_vm2, %v725_v16, %v733_v50  ;;  %v747_v18 = vsel %vm742_vm2, %v733_v50, %v725_v16  ;;  %v3474_v50 = vld [vmem:[%s5524_s4 + $0x4] ss:$8 sm:$0x3] }
 0x239   :  { %1003 = vmatprep.mubr.f32.mxu1 %v5546_v1  ;;  %1118 = vmatpush1.msra.mxu0 %v1070_v11  ;;  %v763_v19 = vmul.f32 %v756_v30, %v747_v18  ;;  %v764_v20 = vmul.f32 %v760_v31, %v743_v17  ;;  %v1189_v61 = vpop.permute.xlu1 %1188  ;;  %v4549_v4 = vrot.slane %v3474_v50, %v4429_v60 }
 0x23a   :  { %v4573_v18 = vrot.slane %v3530_v10, %v4436_v0 }
 0x23b   :  { %v1031_v22 = vpop.permute.xlu0 %1030  ;;  %969 = vmatprep.subr.mxu1 %v764_v20  ;;  %v1354_v20 = vmul.f32 %v4549_v4, %v4305_v39  ;;  %v1352_v29 = vmul.f32 %v4549_v4, %v4293_v37 }
 0x23c   :  { %v1046_v23 = vsel %vm1044_vm3, %v1031_v22, %v1039_v58  ;;  %v1050_v24 = vsel %vm1044_vm3, %v1039_v58, %v1031_v22  ;;  %970 = vmatpush1.msra.mxu1 %v763_v19  ;;  %v4540_v58 = vrot.slane %v3474_v50, %v4436_v0  ;;  %v3505_v19 = vld [vmem:[%s5526_s6 + $0x40] sm:$0xff] }
 0x23d   :  { %v1068_v25 = vmul.f32 %v1059_v54, %v1050_v24  ;;  %v1069_v26 = vmul.f32 %v1063_v55, %v1046_v23  ;;  %3500 = vmatmul.mubr.msk.f32.vlgmr.msra.gmra.mxu1 %vm249_vm0, %v771_v47  ;;  %v1197_v6 = vpop.permute.xlu1 %1196 }
 0x23e   :  { %1009 = vmatprep.mubr.f32.mxu1 %v5546_v1  ;;  %v1355_v11 = vmul.f32 %v4540_v58, %v4298_v38  ;;  %v1205_v12 = vsel %vm1204_vm4, %v1189_v61, %v1197_v6  ;;  %v1209_v14 = vsel %vm1204_vm4, %v1197_v6, %v1189_v61  ;;  %v774_v38 = vld [vmem:[%s5526_s6 + $0x18] sm:$0xff]  ;;  %v1353_v23 = vmul.f32 %v4540_v58, %v4286_v36  ;;  %v3506_v36 = vld [vmem:[%s5526_s6 + $0x48] sm:$0xff]  ;;  %v3522_v61 = vld [vmem:[%s5526_s6 + $0x80] sm:$0xff] }
 0x23f   :  { %v1029_v32 = vpop.permute.xlu0 %1028  ;;  %1119 = vmatprep.subr.mxu0 %v1069_v26  ;;  %v1226_v16 = vmul.f32 %v1219_v40, %v1209_v14  ;;  %v1227_v17 = vmul.f32 %v1223_v41, %v1205_v12  ;;  %v1349_v47 = vmul.f32 %v4540_v58, %v4206_v13 }
 0x240   :  { %v1045_v30 = vsel %vm1044_vm3, %v1029_v32, %v1037_v7  ;;  %v1049_v31 = vsel %vm1044_vm3, %v1037_v7, %v1029_v32  ;;  %1120 = vmatpush1.msra.mxu0 %v1068_v25 }
 0x241   :  { %v1066_v44 = vmul.f32 %v1059_v54, %v1049_v31  ;;  %v1067_v46 = vmul.f32 %v1063_v55, %v1045_v30  ;;  %v1231_v54 = vmul.f32 %v1223_v41, %v1207_v45  ;;  %3501 = vmatmul.mubr.msk.f32.gmra.mxu1 %vm249_vm0, %v772_v53  ;;  %v1485_v21 = vpop.permute.xlu1 %1484  ;;  %v1351_v30 = vmul.f32 %v4540_v58, %v4274_v34  ;;  %v3507_v34 = vld [vmem:[%s5526_s6 + $0x50] sm:$0xff]  ;;  %v3539_v45 = vld [vmem:[%s5524_s4 + $0x6] ss:$8 sm:$0x3] }
 0x242   :  { %1015 = vmatprep.mubr.f32.mxu1 %v5546_v1  ;;  %v4635_v13 = vrot.slane %v3539_v45, %v4429_v60  ;;  %v4638_v50 = vrot.slane %v3539_v45, %v4436_v0  ;;  %v3516_v53 = vld [vmem:[%s5526_s6 + $0x70] sm:$0xff] }
 0x243   :  { %v1195_v49 = vpop.permute.xlu0 %1194  ;;  %1121 = vmatprep.subr.mxu0 %v1067_v46  ;;  %v1350_v46 = vmul.f32 %v4549_v4, %v4281_v35  ;;  %v3515_v35 = vld [vmem:[%s5526_s6 + $0x68] sm:$0xff] }
 0x244   :  { %v1208_v51 = vsel %vm1204_vm4, %v1195_v49, %v1203_v15  ;;  %v1212_v52 = vsel %vm1204_vm4, %v1203_v15, %v1195_v49  ;;  %1122 = vmatpush1.msra.mxu0 %v1066_v44  ;;  %v4569_v15 = vrot.slane %v3530_v10, %v4429_v60 }
 0x245   :  { %v1232_v55 = vmul.f32 %v1219_v40, %v1212_v52  ;;  %v1233_v56 = vmul.f32 %v1223_v41, %v1208_v51  ;;  %3502 = vmatmul.mubr.msk.f32.gmra.mxu1 %vm249_vm0, %v773_v9  ;;  %1397 = vmatprep.subr.mxu0 %v1355_v11  ;;  %v1481_v31 = vpop.permute.xlu1 %1480 }
 0x246   :  { %1021 = vmatprep.mubr.f32.mxu1 %v5546_v1  ;;  %3509 = vmatmul.mubr.msk.f32.vlgmr.msra.gmra.mxu0 %vm249_vm0, %v3505_v19 }
 0x247   :  { %v1191_v62 = vpop.permute.xlu0 %1190  ;;  %1275 = vmatprep.subr.mxu1 %v1233_v56  ;;  %1161 = vmatprep.mubr.f32.mxu0 %v5546_v1 }
 0x248   :  { %v1206_v63 = vsel %vm1204_vm4, %v1191_v62, %v1199_v42  ;;  %v1210_v2 = vsel %vm1204_vm4, %v1199_v42, %v1191_v62  ;;  %1276 = vmatpush1.msra.mxu1 %v1232_v55  ;;  %1398 = vmatpush1.msra.mxu0 %v1354_v20  ;;  %v1348_v42 = vmul.f32 %v4549_v4, %v4269_v33  ;;  %v3508_v33 = vld [vmem:[%s5526_s6 + $0x58] sm:$0xff] }
 0x249   :  { %v1229_v3 = vmul.f32 %v1223_v41, %v1206_v63  ;;  %1277 = vmatprep.subr.mxu1 %v1231_v54  ;;  %v1228_v5 = vmul.f32 %v1219_v40, %v1210_v2  ;;  %3503 = vmatmul.mubr.msk.f32.gmra.mxu1 %vm249_vm0, %v774_v38  ;;  %v1643_v49 = vpop.permute.xlu1 %1642  ;;  %v3517_v2 = vld [vmem:[%s5526_s6 + $0x78] sm:$0xff] }
 0x24a   :  { %1278 = vmatpush1.msra.mxu1 %v1230_v57  ;;  %1315 = vmatprep.mubr.f32.mxu1 %v5546_v1 }
 0x24b   :  { %v1477_v7 = vpop.permute.xlu0 %1476  ;;  %1279 = vmatprep.subr.mxu1 %v1229_v3  ;;  %1399 = vmatprep.subr.mxu0 %v1353_v23 }
 0x24c   :  { %1280 = vmatpush1.msra.mxu1 %v1228_v5  ;;  %v1490_v24 = vsel %vm1486_vm5, %v1477_v7, %v1485_v21  ;;  %v1494_v25 = vsel %vm1486_vm5, %v1485_v21, %v1477_v7  ;;  %3510 = vmatmul.mubr.msk.f32.gmra.mxu0 %vm249_vm0, %v3506_v36 }
 0x24d   :  { %1281 = vmatprep.subr.mxu1 %v1227_v17  ;;  %v1514_v26 = vmul.f32 %v4569_v15, %v1490_v24  ;;  %v1515_v39 = vmul.f32 %v4573_v18, %v1494_v25  ;;  %1167 = vmatprep.mubr.f32.mxu0 %v5546_v1  ;;  %v1479_v52 = vpop.permute.xlu1 %1478 }
 0x24e   :  { %1282 = vmatpush1.msra.mxu1 %v1226_v16  ;;  %1400 = vmatpush1.msra.mxu0 %v1352_v29 }
 0x24f   :  { %v1475_v22 = vpop.permute.xlu0 %1474  ;;  %1557 = vmatprep.subr.mxu1 %v1515_v39  ;;  %3518 = vmatmul.mubr.msk.f32.vlgmr.msra.gmra.mxu1 %vm249_vm0, %v3514_v27 }
 0x250   :  { %1558 = vmatpush1.msra.mxu1 %v1514_v26  ;;  %1321 = vmatprep.mubr.f32.mxu1 %v5546_v1 }
 0x251   :  { %1401 = vmatprep.subr.mxu0 %v1351_v30  ;;  %3511 = vmatmul.mubr.msk.f32.gmra.mxu0 %vm249_vm0, %v3507_v34  ;;  %v1641_v63 = vpop.permute.xlu1 %1640 }
 0x252   :  { %1173 = vmatprep.mubr.f32.mxu0 %v5546_v1  ;;  %1402 = vmatpush1.msra.mxu0 %v1350_v46 }
 0x253   :  { %v1483_v32 = vpop.permute.xlu0 %1482  ;;  %1403 = vmatprep.subr.mxu0 %v1349_v47  ;;  %3519 = vmatmul.mubr.msk.f32.gmra.mxu1 %vm249_vm0, %v3515_v35 }
 0x254   :  { %v1489_v40 = vsel %vm1486_vm5, %v1475_v22, %v1483_v32  ;;  %v1493_v41 = vsel %vm1486_vm5, %v1483_v32, %v1475_v22  ;;  %1404 = vmatpush1.msra.mxu0 %v1348_v42  ;;  %1327 = vmatprep.mubr.f32.mxu1 %v5546_v1  ;;  %v3531_v22 = vld [vmem:[%s5526_s6 + $0xa0] sm:$0xff] }
 0x255   :  { %v1512_v44 = vmul.f32 %v4569_v15, %v1489_v40  ;;  %v1513_v37 = vmul.f32 %v4573_v18, %v1493_v41  ;;  %3512 = vmatmul.mubr.msk.f32.gmra.mxu0 %vm249_vm0, %v3508_v33  ;;  %v1639_v9 = vpop.permute.xlu1 %1638  ;;  %v3548_v40 = vld [vmem:[%s5524_s4 + $0x7] ss:$8 sm:$0x3] }
 0x256   :  { %1437 = vmatprep.mubr.f32.mxu0 %v5546_v1  ;;  %v4722_v34 = vrot.slane %v3548_v40, %v4436_v0 }
 0x257   :  { %v1637_v48 = vpop.permute.xlu0 %1636  ;;  %1559 = vmatprep.subr.mxu1 %v1513_v37  ;;  %3520 = vmatmul.mubr.msk.f32.gmra.mxu1 %vm249_vm0, %v3516_v53  ;;  %v4719_v37 = vrot.slane %v3548_v40, %v4429_v60 }
 0x258   :  { %1560 = vmatpush1.msra.mxu1 %v1512_v44  ;;  %1333 = vmatprep.mubr.f32.mxu1 %v5546_v1 }
 0x259   :  { %3526 = vmatmul.mubr.msk.f32.vlgmr.msra.gmra.mxu0 %vm249_vm0, %v3522_v61  ;;  %v4681_v17 = vpop.permute.xlu1 %685 }
 0x25a   :  { %1443 = vmatprep.mubr.f32.mxu0 %v5546_v1 }
 0x25b   :  { %v1645_v51 = vpop.permute.xlu0 %1644  ;;  %3521 = vmatmul.mubr.msk.f32.gmra.mxu1 %vm249_vm0, %v3517_v2  ;;  %v4741_v2 = vld [vmem:[%s5520_s0 + $0x8] sm:$0xff] }
 0x25c   :  { %v1650_v54 = vsel %vm1646_vm6, %v1637_v48, %v1645_v51  ;;  %v1654_v55 = vsel %vm1646_vm6, %v1645_v51, %v1637_v48  ;;  %1597 = vmatprep.mubr.f32.mxu1 %v5546_v1 }
 0x25d   :  { %v1674_v56 = vmul.f32 %v4635_v13, %v1650_v54  ;;  %v1675_v57 = vmul.f32 %v4638_v50, %v1654_v55 }
 0x25f   :  { %1717 = vmatprep.subr.mxu0 %v1675_v57  ;;  %v1473_v62 = vpop.permute.xlu0 %1472 }
 0x260   :  { %v1488_v3 = vsel %vm1486_vm5, %v1473_v62, %v1481_v31  ;;  %v1492_v5 = vsel %vm1486_vm5, %v1481_v31, %v1473_v62  ;;  %1718 = vmatpush1.msra.mxu0 %v1674_v56  ;;  %v4733_v62 = vld [vmem:[%s5520_s0] sm:$0xff] }
 0x261   :  { %v1510_v6 = vmul.f32 %v4569_v15, %v1488_v3  ;;  %v1511_v7 = vmul.f32 %v4573_v18, %v1492_v5 }
 0x263   :  { %v1635_v8 = vpop.permute.xlu0 %1634  ;;  %1561 = vmatprep.subr.mxu1 %v1511_v7 }
 0x264   :  { %v1649_v10 = vsel %vm1646_vm6, %v1635_v8, %v1643_v49  ;;  %v1653_v11 = vsel %vm1646_vm6, %v1643_v49, %v1635_v8  ;;  %1562 = vmatpush1.msra.mxu1 %v1510_v6 }
 0x265   :  { %v1672_v12 = vmul.f32 %v4635_v13, %v1649_v10  ;;  %v1673_v14 = vmul.f32 %v4638_v50, %v1653_v11  ;;  %v4751_v10 = vld [vmem:[%s5520_s0 + $0x10] sm:$0xff] }
 0x267   :  { %v1471_v16 = vpop.permute.xlu0 %1470  ;;  %1719 = vmatprep.subr.mxu0 %v1673_v14 }
 0x268   :  { %v1487_v38 = vsel %vm1486_vm5, %v1471_v16, %v1479_v52  ;;  %v1491_v19 = vsel %vm1486_vm5, %v1479_v52, %v1471_v16  ;;  %1720 = vmatpush1.msra.mxu0 %v1672_v12  ;;  %v4759_v12 = vld [vmem:[%s5520_s0 + $0x18] sm:$0xff] }
 0x269   :  { %v1508_v20 = vmul.f32 %v4569_v15, %v1487_v38  ;;  %v1509_v21 = vmul.f32 %v4573_v18, %v1491_v19  ;;  %v4698_v15 = vpop.permute.xlu1 %713 }
 0x26b   :  { %v1633_v23 = vpop.permute.xlu0 %1632  ;;  %1563 = vmatprep.subr.mxu1 %v1509_v21 }
 0x26c   :  { %v1648_v24 = vsel %vm1646_vm6, %v1633_v23, %v1641_v63  ;;  %v1652_v25 = vsel %vm1646_vm6, %v1641_v63, %v1633_v23  ;;  %1564 = vmatpush1.msra.mxu1 %v1508_v20 }
 0x26d   :  { %v1670_v26 = vmul.f32 %v4635_v13, %v1648_v24  ;;  %v1671_v39 = vmul.f32 %v4638_v50, %v1652_v25  ;;  %3535 = vmatmul.mubr.msk.f32.vlgmr.msra.gmra.mxu1 %vm249_vm0, %v3531_v22  ;;  %v4710_v31 = vpop.permute.xlu1 %709  ;;  %v3940_v22 = vld [vmem:[%s5520_s0 + $0x20] sm:$0xff]  ;;  %v3941_v24 = vld [vmem:[%s5520_s0 + $0x28] sm:$0xff] }
 0x26e   :  { %1603 = vmatprep.mubr.f32.mxu1 %v5546_v1 }
 0x26f   :  { %v1631_v18 = vpop.permute.xlu0 %1630  ;;  %1721 = vmatprep.subr.mxu0 %v1671_v39 }
 0x270   :  { %v1647_v36 = vsel %vm1646_vm6, %v1631_v18, %v1639_v9  ;;  %v1651_v27 = vsel %vm1646_vm6, %v1639_v9, %v1631_v18  ;;  %1722 = vmatpush1.msra.mxu0 %v1670_v26 }
 0x271   :  { %v1668_v29 = vmul.f32 %v4635_v13, %v1647_v36  ;;  %v1669_v32 = vmul.f32 %v4638_v50, %v1651_v27  ;;  %v1805_v44 = vpop.permute.xlu1 %1804  ;;  %v3942_v27 = vld [vmem:[%s5520_s0 + $0x30] sm:$0xff] }
 0x273   :  { %v4708_v30 = vpop.permute.xlu0 %689  ;;  %1723 = vmatprep.subr.mxu0 %v1669_v32  ;;  %v3943_v32 = vld [vmem:[%s5520_s0 + $0x38] sm:$0xff] }
 0x274   :  { %1724 = vmatpush1.msra.mxu0 %v1668_v29 }
 0x277   :  { %v4715_v41 = vpop.permute.xlu0 %681 }
 0x27b   :  { %v1797_v46 = vpop.permute.xlu0 %1796 }
 0x27c   :  { %v1810_v45 = vsel %vm1806_vm7, %v1797_v46, %v1805_v44  ;;  %v1814_v47 = vsel %vm1806_vm7, %v1805_v44, %v1797_v46  ;;  %v4793_v46 = vld [vmem:[%s5527_s7 + $0x8] sm:$0xff] }
 0x27d   :  { %v1834_v48 = vmul.f32 %v4719_v37, %v1810_v45  ;;  %v1835_v42 = vmul.f32 %v4722_v34, %v1814_v47  ;;  %v4801_v45 = vld [vmem:[%s5527_s7] sm:$0xff]  ;;  %v3523_v47 = vld [vmem:[%s5526_s6 + $0x88] sm:$0xff] }
 0x27e   :  { %3527 = vmatmul.mubr.msk.f32.gmra.mxu0 %vm249_vm0, %v3523_v47 }
 0x27f   :  { %1877 = vmatprep.subr.mxu1 %v1835_v42  ;;  %1449 = vmatprep.mubr.f32.mxu0 %v5546_v1  ;;  %v3533_v42 = vld [vmem:[%s5526_s6 + $0xb0] sm:$0xff] }
 0x280   :  { %1878 = vmatpush1.msra.mxu1 %v1834_v48  ;;  %v3524_v48 = vld [vmem:[%s5526_s6 + $0x90] sm:$0xff] }
 0x282   :  { %3528 = vmatmul.mubr.msk.f32.gmra.mxu0 %vm249_vm0, %v3524_v48 }
 0x283   :  { %1455 = vmatprep.mubr.f32.mxu0 %v5546_v1 }
 0x2d3   :  { %v457_v49 = vpop.f32.mrf.mxu1 }
 0x2d5   :  { %v459_v35 = vpop.f32.mrf.mxu1 }
 0x2d7   :  { %v463_v13 = vpop.f32.mrf.mxu1 }
 0x2d9   :  { %v465_v50 = vpop.f32.mrf.mxu1 }
 0x2db   :  { %v469_v33 = vpop.f32.mrf.mxu1 }
 0x2dd   :  { %v471_v51 = vpop.f32.mrf.mxu1 }
 0x2df   :  { %v475_v52 = vpop.f32.mrf.mxu1 }
 0x2e1   :  { %v477_v53 = vpop.f32.mrf.mxu1 }
 0x2e3   :  { %v554_v54 = vpop.f32.mrf.mxu1 }
 0x2e4   :  { %v577_v55 = vmul.f32 %v554_v54, %v457_v49  ;;  %v3525_v49 = vld [vmem:[%s5526_s6 + $0x98] sm:$0xff] }
 0x2e5   :  { %v556_v56 = vpop.f32.mrf.mxu1  ;;  %3529 = vmatmul.mubr.msk.f32.gmra.mxu0 %vm249_vm0, %v3525_v49 }
 0x2e6   :  { %v578_v57 = vmul.f32 %v556_v56, %v459_v35  ;;  %v4736_v63 = vmul.f32 %v4733_v62, %v577_v55  ;;  %v3534_v35 = vld [vmem:[%s5526_s6 + $0xb8] sm:$0xff]  ;;  %1757 = vmatprep.mubr.f32.mxu0 %v5546_v1 }
 0x2e7   :  { %v560_v61 = vpop.f32.mrf.mxu1 }
 0x2e8   :  { %v4744_v3 = vmul.f32 %v4741_v2, %v578_v57  ;;  %v579_v5 = vmul.f32 %v560_v61, %v463_v13  ;;  %v3540_v13 = vld [vmem:[%s5526_s6 + $0xc0] sm:$0xff] }
 0x2e9   :  { %v562_v6 = vpop.f32.mrf.mxu1  ;;  %3544 = vmatmul.mubr.msk.f32.vlgmr.msra.gmra.mxu0 %vm249_vm0, %v3540_v13  ;;  %v3557_v13 = vld [vmem:[%s5524_s4 + $0x10] ss:$8 sm:$0x3] }
 0x2ea   :  { %v580_v7 = vmul.f32 %v562_v6, %v465_v50  ;;  %v593_v8 = vadd.f32 %v4744_v3, %v4736_v63  ;;  %v4754_v11 = vmul.f32 %v4751_v10, %v579_v5  ;;  %1763 = vmatprep.mubr.f32.mxu0 %v5546_v1  ;;  %v3541_v50 = vld [vmem:[%s5526_s6 + $0xc8] sm:$0xff] }
 0x2eb   :  { %v566_v9 = vpop.f32.mrf.mxu1 }
 0x2ec   :  { %v4762_v14 = vmul.f32 %v4759_v12, %v580_v7  ;;  %v581_v16 = vmul.f32 %v566_v9, %v469_v33  ;;  %594 = vadd.xlane.f32.xlu0 %v593_v8  ;;  %v3542_v33 = vld [vmem:[%s5526_s6 + $0xd0] sm:$0xff] }
 0x2ed   :  { %v568_v38 = vpop.f32.mrf.mxu1  ;;  %3545 = vmatmul.mubr.msk.f32.gmra.mxu0 %vm249_vm0, %v3541_v50 }
 0x2ee   :  { %v582_v19 = vmul.f32 %v568_v38, %v471_v51  ;;  %v596_v20 = vadd.f32 %v4762_v14, %v4754_v11  ;;  %v4769_v23 = vmul.f32 %v3940_v22, %v581_v16  ;;  %1769 = vmatprep.mubr.f32.mxu0 %v5546_v1 }
 0x2ef   :  { %v572_v21 = vpop.f32.mrf.mxu1 }
 0x2f0   :  { %v4774_v25 = vmul.f32 %v3941_v24, %v582_v19  ;;  %v583_v26 = vmul.f32 %v572_v21, %v475_v52  ;;  %597 = vadd.xlane.f32.xlu0 %v596_v20 }
 0x2f1   :  { %v574_v39 = vpop.f32.mrf.mxu1  ;;  %3546 = vmatmul.mubr.msk.f32.gmra.mxu0 %vm249_vm0, %v3542_v33 }
 0x2f2   :  { %v584_v18 = vmul.f32 %v574_v39, %v477_v53  ;;  %v599_v36 = vadd.f32 %v4774_v25, %v4769_v23  ;;  %v4781_v29 = vmul.f32 %v3942_v27, %v583_v26  ;;  %1775 = vmatprep.mubr.f32.mxu0 %v5546_v1 }
 0x2f4   :  { %v4786_v40 = vmul.f32 %v3943_v32, %v584_v18  ;;  %600 = vadd.xlane.f32.xlu1 %v599_v36 }
 0x2f6   :  { %v602_v44 = vadd.f32 %v4786_v40, %v4781_v29 }
 0x2f8   :  { %603 = vadd.xlane.f32.xlu0 %v602_v44 }
 0x305   :  { %705 = vperm.xlu1 %3878, %v4793_v46  }
 0x309   :  { %1802 = vrot.lane.b32.xlu1 %v3941_v24, %s4081_s28 }
 0x30d   :  { %1964 = vrot.lane.b32.xlu1 %v3943_v32, %s4082_s15 }
 0x30e   :  { %677 = vperm.xlu0 %3876, %v4801_v45  }
 0x311   :  { %1792 = vrot.lane.b32.xlu1 %v4751_v10, %s4081_s28 }
 0x312   :  { %1794 = vrot.lane.b32.xlu0 %v3940_v22, %s4081_s28 }
 0x313   :  { %3879 = vset.pattern.permute.xlu0 %v4080_v28  ;;  %v3532_v28 = vld [vmem:[%s5526_s6 + $0xa8] sm:$0xff] }
 0x314   :  { %3536 = vmatmul.mubr.msk.f32.gmra.mxu1 %vm249_vm0, %v3532_v28 }
 0x315   :  { %1800 = vrot.lane.b32.xlu1 %v4759_v12, %s4081_s28  ;;  %1609 = vmatprep.mubr.f32.mxu1 %v5546_v1 }
 0x316   :  { %1956 = vrot.lane.b32.xlu0 %v3942_v27, %s4082_s15 }
 0x318   :  { %3537 = vmatmul.mubr.msk.f32.gmra.mxu1 %vm249_vm0, %v3533_v42 }
 0x319   :  { %1962 = vrot.lane.b32.xlu1 %v3941_v24, %s4082_s15  ;;  %1615 = vmatprep.mubr.f32.mxu1 %v5546_v1 }
 0x31a   :  { %701 = vperm.xlu0 %3879, %v4801_v45  }
 0x31c   :  { %3538 = vmatmul.mubr.msk.f32.gmra.mxu1 %vm249_vm0, %v3534_v35 }
 0x31d   :  { %1917 = vmatprep.mubr.f32.mxu1 %v5546_v1 }
 0x31e   :  { %1954 = vrot.lane.b32.xlu0 %v3940_v22, %s4082_s15 }
 0x375   :  { %v595_v51 = vpop.xlane.xlu0 %594 }
 0x376   :  { %v605_v52 = vmul.f32 0.00390625, %v595_v51 }
 0x378   :  { %v609_v53 = vsub.f32 %v4736_v63, %v605_v52  ;;  %v610_v54 = vsub.f32 %v4744_v3, %v605_v52 }
 0x379   :  { %v598_v55 = vpop.xlane.xlu0 %597 }
 0x37a   :  { %v4862_v56 = vmul.f32 %v4549_v4, %v609_v53  ;;  %v4865_v57 = vmul.f32 %v4540_v58, %v610_v54  ;;  %v606_v61 = vmul.f32 0.00390625, %v598_v55  ;;  %v4927_v55 = vrot.slane %v3557_v13, %v4429_v60 }
 0x37c   :  { %v611_v5 = vsub.f32 %v4754_v11, %v606_v61  ;;  %v612_v6 = vsub.f32 %v4762_v14, %v606_v61  ;;  %v636_v7 = vmul.f32 %v4862_v56, %v4862_v56  ;;  %v637_v63 = vmul.f32 %v4865_v57, %v4865_v57 }
 0x37d   :  { %v601_v8 = vpop.xlane.xlu1 %600  ;;  %v4930_v61 = vrot.slane %v3557_v13, %v4436_v0 }
 0x37e   :  { %v4874_v3 = vmul.f32 %v4549_v4, %v611_v5  ;;  %v4877_v9 = vmul.f32 %v4540_v58, %v612_v6  ;;  %v607_v16 = vmul.f32 0.00390625, %v601_v8  ;;  %v644_v38 = vadd.f32 %v637_v63, %v636_v7 }
 0x380   :  { %v613_v19 = vsub.f32 %v4769_v23, %v607_v16  ;;  %v614_v11 = vsub.f32 %v4774_v25, %v607_v16  ;;  %645 = vadd.xlane.f32.xlu1 %v644_v38  ;;  %v638_v14 = vmul.f32 %v4874_v3, %v4874_v3  ;;  %v639_v20 = vmul.f32 %v4877_v9, %v4877_v9 }
 0x381   :  { %v4885_v21 = vpop.permute.xlu1 %705  ;;  %v604_v22 = vpop.xlane.xlu0 %603 }
 0x382   :  { %v4888_v24 = vmul.f32 %v4549_v4, %v613_v19  ;;  %v4891_v26 = vmul.f32 %v4540_v58, %v614_v11  ;;  %v608_v39 = vmul.f32 0.00390625, %v604_v22  ;;  %v647_v23 = vadd.f32 %v639_v20, %v638_v14 }
 0x384   :  { %v615_v25 = vsub.f32 %v4781_v29, %v608_v39  ;;  %v616_v18 = vsub.f32 %v4786_v40, %v608_v39  ;;  %648 = vadd.xlane.f32.xlu0 %v647_v23  ;;  %v640_v36 = vmul.f32 %v4888_v24, %v4888_v24  ;;  %v641_v27 = vmul.f32 %v4891_v26, %v4891_v26  ;;  %v3543_v29 = vld [vmem:[%s5526_s6 + $0xd8] sm:$0xff] }
 0x385   :  { %v1803_v32 = vpop.permute.xlu1 %1802  ;;  %3547 = vmatmul.mubr.msk.f32.gmra.mxu0 %vm249_vm0, %v3543_v29 }
 0x386   :  { %v4900_v44 = vmul.f32 %v4549_v4, %v615_v25  ;;  %v4903_v47 = vmul.f32 %v4540_v58, %v616_v18  ;;  %v650_v28 = vadd.f32 %v641_v27, %v640_v36  ;;  %2077 = vmatprep.mubr.f32.mxu0 %v5546_v1  ;;  %v4083_v18 = vmov 1  }
 0x387   :  { %3880 = vset.pattern.permute.xlu1 %v4083_v18  ;;  %3881 = vset.pattern.permute.xlu0 %v4083_v18 }
 0x388   :  { %651 = vadd.xlane.f32.xlu1 %v650_v28  ;;  %v642_v40 = vmul.f32 %v4900_v44, %v4900_v44  ;;  %v643_v48 = vmul.f32 %v4903_v47, %v4903_v47 }
 0x389   :  { %v4913_v42 = vpop.permute.xlu0 %677  ;;  %v1965_v49 = vpop.permute.xlu1 %1964 }
 0x38a   :  { %v653_v35 = vadd.f32 %v643_v48, %v642_v40 }
 0x38c   :  { %654 = vadd.xlane.f32.xlu0 %v653_v35 }
 0x38d   :  { %v1795_v50 = vpop.permute.xlu0 %1794  ;;  %v1793_v33 = vpop.permute.xlu1 %1792 }
 0x38e   :  { %v1809_v51 = vsel %vm1806_vm7, %v1795_v50, %v1803_v32  ;;  %v1813_v52 = vsel %vm1806_vm7, %v1803_v32, %v1795_v50 }
 0x38f   :  { %v1832_v53 = vmul.f32 %v4719_v37, %v1809_v51  ;;  %v1833_v54 = vmul.f32 %v4722_v34, %v1813_v52 }
 0x391   :  { %1879 = vmatprep.subr.mxu1 %v1833_v54  ;;  %v1957_v5 = vpop.permute.xlu0 %1956  ;;  %v1801_v6 = vpop.permute.xlu1 %1800  ;;  %v3549_v54 = vld [vmem:[%s5526_s6 + $0xe0] sm:$0xff] }
 0x392   :  { %v1970_v7 = vsel %vm1966_vm8, %v1957_v5, %v1965_v49  ;;  %v1974_v63 = vsel %vm1966_vm8, %v1965_v49, %v1957_v5  ;;  %1880 = vmatpush1.msra.mxu1 %v1832_v53  ;;  %v1808_v8 = vsel %vm1806_vm7, %v1793_v33, %v1801_v6  ;;  %v1812_v60 = vsel %vm1806_vm7, %v1801_v6, %v1793_v33 }
 0x393   :  { %v1994_v16 = vmul.f32 %v4927_v55, %v1970_v7  ;;  %v1995_v0 = vmul.f32 %v4930_v61, %v1974_v63  ;;  %v1830_v38 = vmul.f32 %v4719_v37, %v1808_v8  ;;  %v1831_v19 = vmul.f32 %v4722_v34, %v1812_v60 }
 0x395   :  { %2037 = vmatprep.subr.mxu0 %v1995_v0  ;;  %1881 = vmatprep.subr.mxu1 %v1831_v19  ;;  %v4944_v11 = vpop.permute.xlu0 %701  ;;  %v1963_v14 = vpop.permute.xlu1 %1962 }
 0x396   :  { %2038 = vmatpush1.msra.mxu0 %v1994_v16  ;;  %1882 = vmatpush1.msra.mxu1 %v1830_v38 }
 0x399   :  { %1798 = vrot.lane.b32.xlu1 %v4741_v2, %s4081_s28  ;;  %v1955_v20 = vpop.permute.xlu0 %1954 }
 0x39a   :  { %v1969_v22 = vsel %vm1966_vm8, %v1955_v20, %v1963_v14  ;;  %v1973_v39 = vsel %vm1966_vm8, %v1963_v14, %v1955_v20 }
 0x39b   :  { %v1992_v23 = vmul.f32 %v4927_v55, %v1969_v22  ;;  %v1993_v25 = vmul.f32 %v4930_v61, %v1973_v39  ;;  %v3551_v39 = vld [vmem:[%s5526_s6 + $0xf0] sm:$0xff] }
 0x39d   :  { %1960 = vrot.lane.b32.xlu1 %v4759_v12, %s4082_s15  ;;  %2039 = vmatprep.subr.mxu0 %v1993_v25 }
 0x39e   :  { %2040 = vmatpush1.msra.mxu0 %v1992_v23 }
 0x3a1   :  { %1958 = vrot.lane.b32.xlu1 %v4741_v2, %s4082_s15 }
 0x3a2   :  { %1790 = vrot.lane.b32.xlu0 %v4733_v62, %s4081_s28 }
 0x3a6   :  { %1952 = vrot.lane.b32.xlu0 %v4751_v10, %s4082_s15 }
 0x3aa   :  { %1950 = vrot.lane.b32.xlu0 %v4733_v62, %s4082_s15 }
 0x409   :  { %v646_v36 = vpop.xlane.xlu1 %645 }
 0x40a   :  { %v656_v32 = vmul.f32 0.00390625, %v646_v36 }
 0x40c   :  { %v660_v2 = vadd.f32 1e-05, %v656_v32 }
 0x40d   :  { %v649_v27 = vpop.xlane.xlu0 %648 }
 0x40e   :  { %v657_v12 = vmul.f32 0.00390625, %v649_v27 }
 0x410   :  { %v661_v28 = vadd.f32 1e-05, %v657_v12 }
 0x411   :  { %v652_v29 = vpop.xlane.xlu1 %651 }
 0x412   :  { %v658_v40 = vmul.f32 0.00390625, %v652_v29  ;;  %3900 = vrsqrt.f32 %v661_v28 }
 0x414   :  { %v662_v48 = vadd.f32 1e-05, %v658_v40 }
 0x415   :  { %v655_v49 = vpop.xlane.xlu0 %654  ;;  %v1799_v35 = vpop.permute.xlu1 %1798 }
 0x416   :  { %3902 = vrsqrt.f32 %v662_v48  ;;  %v659_v10 = vmul.f32 0.00390625, %v655_v49 }
 0x417   :  { %3904 = vrsqrt.f32 %v660_v2 }
 0x418   :  { %v663_v13 = vadd.f32 1e-05, %v659_v10 }
 0x419   :  { %v1791_v62 = vpop.permute.xlu0 %1790  ;;  %v1961_v50 = vpop.permute.xlu1 %1960 }
 0x41a   :  { %3906 = vrsqrt.f32 %v663_v13  ;;  %v1807_v33 = vsel %vm1806_vm7, %v1791_v62, %v1799_v35  ;;  %v1811_v51 = vsel %vm1806_vm7, %v1799_v35, %v1791_v62 }
 0x41b   :  { %v1828_v52 = vmul.f32 %v4719_v37, %v1807_v33  ;;  %v1829_v53 = vmul.f32 %v4722_v34, %v1811_v51  ;;  %v3550_v34 = vld [vmem:[%s5526_s6 + $0xe8] sm:$0xff] }
 0x41d   :  { %1883 = vmatprep.subr.mxu1 %v1829_v53  ;;  %v1953_v5 = vpop.permute.xlu0 %1952  ;;  %v1959_v37 = vpop.permute.xlu1 %1958 }
 0x41e   :  { %v1968_v6 = vsel %vm1966_vm8, %v1953_v5, %v1961_v50  ;;  %v1972_v7 = vsel %vm1966_vm8, %v1961_v50, %v1953_v5  ;;  %1884 = vmatpush1.msra.mxu1 %v1828_v52 }
 0x41f   :  { %v1990_v63 = vmul.f32 %v4927_v55, %v1968_v6  ;;  %v1991_v8 = vmul.f32 %v4930_v61, %v1972_v7  ;;  %3553 = vmatmul.mubr.msk.f32.vlgmr.msra.gmra.mxu1 %vm249_vm0, %v3549_v54  ;;  %3718 = vmatprep.subr.mxu1 %v5546_v1  ;;  %v3901_v16 = vpop.eup %3900  ;;  %v3946_v6 = vld [vmem:[%s5527_s7 + $0x18] sm:$0xff]  ;;  %v5092_v7 = vpop.f32.mrf.mxu1 }
 0x420   :  { %1923 = vmatprep.mubr.f32.mxu1 %v5546_v1 }
 0x421   :  { %v1951_v60 = vpop.permute.xlu0 %1950  ;;  %2041 = vmatprep.subr.mxu0 %v1991_v8 }
 0x422   :  { %v1967_v0 = vsel %vm1966_vm8, %v1951_v60, %v1959_v37  ;;  %v1971_v38 = vsel %vm1966_vm8, %v1959_v37, %v1951_v60  ;;  %2042 = vmatpush1.msra.mxu0 %v1990_v63 }
 0x423   :  { %v3903_v19 = vpop.eup %3902  ;;  %v1988_v14 = vmul.f32 %v4927_v55, %v1967_v0  ;;  %v1989_v20 = vmul.f32 %v4930_v61, %v1971_v38  ;;  %3554 = vmatmul.mubr.msk.f32.gmra.mxu1 %vm249_vm0, %v3550_v34  ;;  %v670_v55 = vmul.f32 %v3901_v16, %v4874_v3  ;;  %v671_v61 = vmul.f32 %v3901_v16, %v4877_v9  ;;  %v3552_v3 = vld [vmem:[%s5526_s6 + $0xf8] sm:$0xff]  ;;  %v3559_v9 = vld [vmem:[%s5526_s6 + $0x108] sm:$0xff] }
 0x424   :  { %v3905_v22 = vpop.eup %3904  ;;  %1929 = vmatprep.mubr.f32.mxu1 %v5546_v1  ;;  %v672_v23 = vmul.f32 %v3903_v19, %v4888_v24  ;;  %v673_v25 = vmul.f32 %v3903_v19, %v4891_v26 }
 0x425   :  { %2043 = vmatprep.subr.mxu0 %v1989_v20  ;;  %v668_v12 = vmul.f32 %v3905_v22, %v4862_v56  ;;  %v694_v32 = vmul.f32 %v4715_v41, %v670_v55  ;;  %v695_v28 = vmul.f32 %v4715_v41, %v671_v61  ;;  %v669_v29 = vmul.f32 %v3905_v22, %v4865_v57  ;;  %v3560_v41 = vld [vmem:[%s5526_s6 + $0x110] sm:$0xff] }
 0x426   :  { %2044 = vmatpush1.msra.mxu0 %v1988_v14  ;;  %v696_v18 = vmul.f32 %v4681_v17, %v672_v23  ;;  %v697_v36 = vmul.f32 %v4681_v17, %v673_v25 }
 0x427   :  { %v3907_v27 = vpop.eup %3906  ;;  %3555 = vmatmul.mubr.msk.f32.gmra.mxu1 %vm249_vm0, %v3551_v39  ;;  %3562 = vmatmul.mubr.msk.f32.vlgmr.msra.gmra.mxu0 %vm249_vm0, %v3558_v59  ;;  %v692_v48 = vmul.f32 %v4913_v42, %v668_v12  ;;  %v5048_v35 = vadd.f32 %v4885_v21, %v694_v32  ;;  %v693_v10 = vmul.f32 %v4913_v42, %v669_v29 }
 0x428   :  { %1935 = vmatprep.mubr.f32.mxu1 %v5546_v1  ;;  %2083 = vmatprep.mubr.f32.mxu0 %v5546_v1  ;;  %v5017_v17 = vadd.f32 %v4710_v31, %v696_v18  ;;  %v5020_v24 = vadd.f32 %v4710_v31, %v697_v36  ;;  %v674_v56 = vmul.f32 %v3907_v27, %v4900_v44 }
 0x429   :  { %v675_v26 = vmul.f32 %v3907_v27, %v4903_v47  ;;  %3740 = vmatprep.subr.mxu0 %v5546_v1  ;;  %5552 = vst [vmem:[#allocation19_spill] sm:$0xff] %v5048_v35  ;;  %v2141_v42 = vmul.f32 %v5048_v35, %v4549_v4  ;;  %v5071_v51 = vadd.f32 %v4944_v11, %v693_v10 }
 0x42a   :  { %5548 = vst [vmem:[#allocation15_spill] sm:$0xff] %v5017_v17  ;;  %5549 = vst [vmem:[#allocation16_spill] sm:$0xff] %v5020_v24  ;;  %v2143_v40 = vmul.f32 %v5017_v17, %v4549_v4  ;;  %v2144_v2 = vmul.f32 %v5020_v24, %v4540_v58  ;;  %v698_v31 = vmul.f32 %v4708_v30, %v674_v56  ;;  %v5240_v24 = vld [vmem:[#allocation8 + $0x18] sm:$0xff] }
 0x42b   :  { %3556 = vmatmul.mubr.msk.f32.gmra.mxu1 %vm249_vm0, %v3552_v3  ;;  %3563 = vmatmul.mubr.msk.f32.gmra.mxu0 %vm249_vm0, %v3559_v9  ;;  %v699_v44 = vmul.f32 %v4708_v30, %v675_v26  ;;  %v5051_v30 = vadd.f32 %v4885_v21, %v695_v28  ;;  %v5064_v21 = vadd.f32 %v4944_v11, %v692_v48  ;;  %v3947_v11 = vld [vmem:[%s5527_s7 + $0x10] sm:$0xff] }
 0x42c   :  { %v2153_v47 = vadd.f32 %v2144_v2, %v2143_v40  ;;  %2089 = vmatprep.mubr.f32.mxu0 %v5546_v1  ;;  %v5041_v57 = vadd.f32 %v4698_v15, %v698_v31  ;;  %5555 = vst [vmem:[#allocation22_spill] sm:$0xff] %v5071_v51  ;;  %v2140_v54 = vmul.f32 %v5071_v51, %v4540_v58  ;;  %5561 = vst [vmem:[#allocation28_spill] sm:$0xff] %v5240_v24 }
 0x42d   :  { %v5045_v49 = vadd.f32 %v4698_v15, %v699_v44  ;;  %5553 = vst [vmem:[#allocation20_spill] sm:$0xff] %v5051_v30  ;;  %v3561_v15 = vld [vmem:[%s5526_s6 + $0x118] sm:$0xff]  ;;  %5554 = vst [vmem:[#allocation21_spill] sm:$0xff] %v5064_v21  ;;  %v2142_v33 = vmul.f32 %v5051_v30, %v4540_v58  ;;  %v2139_v53 = vmul.f32 %v5064_v21, %v4549_v4  ;;  %3726 = vmatprep.mubr.msk.f32.mxu1 %vm4084_vm9, %v5546_v1  ;;  %s3460_s6 = sshll.u32 %s4085_s12, 4  ;;  %s3461_s6 = int_to_ptr.vmem [resolvable:$true] %s3460_s6 }
 0x42e   :  { %5550 = vst [vmem:[#allocation17_spill] sm:$0xff] %v5041_v57  ;;  %2154 = vadd.xlane.f32.xlu1 %v2153_v47  ;;  %v2145_v13 = vmul.f32 %v5041_v57, %v4549_v4  ;;  %s4036_s16 = scalar_lea.vmem %s3461_s6, 1024  ;;  %p4041_p7 = scmp.lt.s32.totalorder %s3461_s6, %s3461_s6 }
 0x42f   :  { %5551 = vst [vmem:[#allocation18_spill] sm:$0xff] %v5045_v49  ;;  %3564 = vmatmul.mubr.msk.f32.gmra.mxu0 %vm249_vm0, %v3560_v41  ;;  %v2146_v62 = vmul.f32 %v5045_v49, %v4540_v58  ;;  %v2150_v52 = vadd.f32 %v2142_v33, %v2141_v42  ;;  %v2147_v5 = vadd.f32 %v2140_v54, %v2139_v53  ;;  %p4037_p6 = scmp.ne.s32.totalorder %s3461_s6, %s4036_s16  ;;  %p4042_p8 = scmp.lt.s32.totalorder %s4036_s16, %s4036_s16 }
 0x430   :  { %2095 = vmatprep.mubr.f32.mxu0 %v5546_v1 }
 0x431   :  { %v2156_v50 = vadd.f32 %v2146_v62, %v2145_v13  ;;  %p4043_p9 = por %p4042_p8, %p4041_p7 }
 0x433   :  { %2157 = vadd.xlane.f32.xlu0 %v2156_v50  ;;  %3565 = vmatmul.mubr.msk.f32.gmra.mxu0 %vm249_vm0, %v3561_v15  ;;  %p4044_p10 = pnand %p4043_p9, %p4037_p6 }
 0x434   :  { %3748 = vmatprep.mubr.msk.f32.mxu0 %vm4084_vm9, %v5546_v1 }
 0x437   :  { %2151 = vadd.xlane.f32.xlu0 %v2150_v52 }
 0x43b   :  { %2148 = vadd.xlane.f32.xlu0 %v2147_v5  ;;  %v5196_v5 = vld [vmem:[#allocation8] sm:$0xff] }
 0x43f   :  { %2123 = vperm.xlu1 %3880, %v3946_v6   ;;  %v5200_v6 = vld [vmem:[#allocation8 + $0x10] sm:$0xff] }
 0x443   :  { %2115 = vperm.xlu1 %3880, %v4793_v46   ;;  %v5094_v46 = vpop.f32.mrf.mxu1 }
 0x445   :  { %v5098_v63 = vpop.f32.mrf.mxu1 }
 0x447   :  { %2111 = vperm.xlu1 %3880, %v4801_v45   ;;  %v5096_v45 = vpop.f32.mrf.mxu0  ;;  %v5102_v37 = vpop.f32.mrf.mxu1 }
 0x449   :  { %v5100_v8 = vpop.f32.mrf.mxu0  ;;  %v5106_v60 = vpop.f32.mrf.mxu1 }
 0x44b   :  { %3882 = vset.pattern.permute.xlu1 %v4072_v43  ;;  %v5104_v34 = vpop.f32.mrf.mxu0  ;;  %v5110_v0 = vpop.f32.mrf.mxu1 }
 0x44d   :  { %v5108_v16 = vpop.f32.mrf.mxu0  ;;  %v5114_v38 = vpop.f32.mrf.mxu1 }
 0x44f   :  { %v5118_v14 = vpop.f32.mrf.mxu1 }
 0x451   :  { %2119 = vperm.xlu0 %3881, %v3947_v11   ;;  %v5122_v22 = vpop.f32.mrf.mxu1 }
 0x452   :  { %v1018_v17 = vadd.f32 %v5122_v22, %v5092_v7  ;;  %v1012_v22 = vadd.f32 %v5114_v38, %v5104_v34  ;;  %v1006_v34 = vadd.f32 %v5106_v60, %v5096_v45 }
 0x453   :  { %v5126_v59 = vpop.f32.mrf.mxu1 }
 0x455   :  { %3883 = vset.pattern.permute.xlu0 %v4072_v43  ;;  %v5112_v43 = vpop.f32.mrf.mxu0  ;;  %v5130_v25 = vpop.f32.mrf.mxu1 }
 0x456   :  { %v1024_v7 = vadd.f32 %v5130_v25, %v5098_v63 }
 0x457   :  { %v5116_v19 = vpop.f32.mrf.mxu0  ;;  %v5134_v61 = vpop.f32.mrf.mxu1 }
 0x459   :  { %v5120_v20 = vpop.f32.mrf.mxu0  ;;  %v5138_v36 = vpop.f32.mrf.mxu1 }
 0x45b   :  { %v5124_v39 = vpop.f32.mrf.mxu0  ;;  %v5142_v12 = vpop.f32.mrf.mxu1 }
 0x45d   :  { %v5128_v23 = vpop.f32.mrf.mxu0  ;;  %v5146_v9 = vpop.f32.mrf.mxu1 }
 0x45f   :  { %v5132_v55 = vpop.f32.mrf.mxu0  ;;  %v5150_v26 = vpop.f32.mrf.mxu1 }
 0x461   :  { %v5136_v18 = vpop.f32.mrf.mxu0  ;;  %v5154_v28 = vpop.f32.mrf.mxu1 }
 0x463   :  { %v5140_v27 = vpop.f32.mrf.mxu0  ;;  %v5158_v40 = vpop.f32.mrf.mxu1 }
 0x465   :  { %v5144_v3 = vpop.f32.mrf.mxu0  ;;  %v5162_v31 = vpop.f32.mrf.mxu1 }
 0x467   :  { %v5148_v56 = vpop.f32.mrf.mxu0  ;;  %v5166_v48 = vpop.f32.mrf.mxu1 }
 0x469   :  { %v5152_v32 = vpop.f32.mrf.mxu0  ;;  %v5178_v50 = vpop.f32.mrf.mxu1 }
 0x46b   :  { %v5156_v29 = vpop.f32.mrf.mxu0  ;;  %v5192_v53 = vpop.f32.mrf.mxu1 }
 0x46d   :  { %v5160_v2 = vpop.f32.mrf.mxu0 }
 0x46f   :  { %v5164_v41 = vpop.f32.mrf.mxu0 }
 0x471   :  { %v5176_v15 = vpop.f32.mrf.mxu0 }
 0x473   :  { %v5190_v52 = vpop.f32.mrf.mxu0 }
 0x475   :  { %v5205_v11 = vpop.f32.mrf.mxu0 }
 0x4b7   :  { %v2155_v44 = vpop.xlane.xlu1 %2154 }
 0x4b8   :  { %v5170_v13 = vmul.f32 0.00390625, %v2155_v44  ;;  %v5207_v44 = vpop.f32.mrf.mxu1 }
 0x4ba   :  { %5557 = vst [vmem:[#allocation24_spill] sm:$0xff] %v5170_v13 }
 0x4bc   :  { %v2158_v47 = vpop.xlane.xlu0 %2157 }
 0x4bd   :  { %v5168_v10 = vmul.f32 0.00390625, %v2158_v47  ;;  %v5217_v47 = vpop.f32.mrf.mxu0 }
 0x4bf   :  { %5556 = vst [vmem:[#allocation23_spill] sm:$0xff] %v5168_v10  ;;  %3719 = vmatpush3.msra.mxu1 %v5168_v10  ;;  %3741 = vmatpush3.msra.mxu0 %v5168_v10  ;;  %v5229_v51 = vpop.f32.mrf.mxu0 }
 0x4c0   :  { %3720 = vmatprep.subr.mxu1 %v5546_v1  ;;  %3742 = vmatprep.subr.mxu0 %v5546_v1  ;;  %v2152_v62 = vpop.xlane.xlu0 %2151 }
 0x4c1   :  { %v5180_v42 = vmul.f32 0.00390625, %v2152_v62  ;;  %3721 = vmatpush3.msra.mxu1 %v5170_v13  ;;  %3743 = vmatpush3.msra.mxu0 %v5170_v13  ;;  %v5219_v62 = vpop.f32.mrf.mxu1  ;;  %v5237_v35 = vpop.f32.mrf.mxu0 }
 0x4c2   :  { %3722 = vmatprep.subr.mxu1 %v5546_v1  ;;  %3744 = vmatprep.subr.mxu0 %v5546_v1 }
 0x4c3   :  { %5558 = vst [vmem:[#allocation25_spill] sm:$0xff] %v5180_v42  ;;  %3723 = vmatpush3.msra.mxu1 %v5180_v42  ;;  %3745 = vmatpush3.msra.mxu0 %v5180_v42  ;;  %v1611_v21 = vpop.f32.mrf.mxu1  ;;  %v1771_v49 = vpop.f32.mrf.mxu0 }
 0x4c4   :  { %v2149_v33 = vpop.xlane.xlu0 %2148  ;;  %3724 = vmatprep.subr.mxu1 %v5546_v1  ;;  %3746 = vmatprep.subr.mxu0 %v5546_v1 }
 0x4c5   :  { %v5194_v54 = vmul.f32 0.00390625, %v2149_v33  ;;  %v5222_v33 = vld [vmem:[#allocation8 + $0x8] sm:$0xff]  ;;  %v1613_v30 = vpop.f32.mrf.mxu1 }
 0x4c6   :  { %5560 = vst [vmem:[#allocation27_spill] sm:$0xff] %v5222_v33 }
 0x4c7   :  { %5559 = vst [vmem:[#allocation26_spill] sm:$0xff] %v5194_v54  ;;  %3725 = vmatpush3.msra.mxu1 %v5194_v54  ;;  %3747 = vmatpush3.msra.mxu0 %v5194_v54  ;;  %v1617_v57 = vpop.f32.mrf.mxu1 }
 0x4c8   :  { %3729 = vmatprep.subr.mxu1 %v5546_v1  ;;  %3727 = vmatmul.mubr.msk.f32.vlgmr.msra.gmra.mxu1 %vm249_vm0, %v5196_v5 }
 0x4c9   :  { %3730 = vmatpush3.msra.mxu1 %v5168_v10  ;;  %3737 = vmatprep.mubr.msk.f32.mxu1 %vm4084_vm9, %v5546_v1 }
 0x4ca   :  { %3731 = vmatprep.subr.mxu1 %v5546_v1  ;;  %3749 = vmatmul.mubr.msk.f32.vlgmr.msra.gmra.mxu0 %vm249_vm0, %v5200_v6 }
 0x4cb   :  { %3732 = vmatpush3.msra.mxu1 %v5170_v13 }
 0x4cc   :  { %3733 = vmatprep.subr.mxu1 %v5546_v1 }
 0x4cd   :  { %3734 = vmatpush3.msra.mxu1 %v5180_v42 }
 0x4ce   :  { %3735 = vmatprep.subr.mxu1 %v5546_v1 }
 0x4cf   :  { %3736 = vmatpush3.msra.mxu1 %v5194_v54 }
 0x4d0   :  { %3738 = vmatmul.mubr.msk.f32.vlgmr.msra.gmra.mxu1 %vm249_vm0, %v5222_v33  ;;  %3751 = vmatprep.subr.mxu1 %v5546_v1  ;;  %v1619_v33 = vpop.f32.mrf.mxu1 }
 0x4d1   :  { %3752 = vmatpush3.msra.mxu1 %v5168_v10  ;;  %3759 = vmatprep.mubr.msk.f32.mxu1 %vm4084_vm9, %v5546_v1  ;;  %v1026_v10 = vadd.f32 %v5134_v61, %v5102_v37  ;;  %v1182_v37 = vadd.f32 %v5120_v20, %v1012_v22 }
 0x4d2   :  { %3753 = vmatprep.subr.mxu1 %v5546_v1 }
 0x4d3   :  { %3754 = vmatpush3.msra.mxu1 %v5170_v13  ;;  %v1014_v13 = vadd.f32 %v5118_v14, %v5108_v16  ;;  %v1186_v16 = vadd.f32 %v5136_v18, %v1024_v7  ;;  %v1187_v38 = vadd.f32 %v5140_v27, %v1026_v10  ;;  %v1180_v18 = vadd.f32 %v5112_v43, %v1006_v34 }
 0x4d4   :  { %3755 = vmatprep.subr.mxu1 %v5546_v1  ;;  %v1342_v45 = vadd.f32 %v5146_v9, %v1182_v37 }
 0x4d5   :  { %3756 = vmatpush3.msra.mxu1 %v5180_v42  ;;  %v1020_v42 = vadd.f32 %v5126_v59, %v5094_v46  ;;  %v1008_v46 = vadd.f32 %v5110_v0, %v5100_v8  ;;  %v1346_v61 = vadd.f32 %v5162_v31, %v1186_v16  ;;  %v1347_v60 = vadd.f32 %v5166_v48, %v1187_v38 }
 0x4d6   :  { %3757 = vmatprep.subr.mxu1 %v5546_v1  ;;  %v1340_v31 = vadd.f32 %v5138_v36, %v1180_v18  ;;  %v1464_v43 = vadd.f32 %v5152_v32, %v1342_v45 }
 0x4d7   :  { %3758 = vmatpush3.msra.mxu1 %v5194_v54  ;;  %v1184_v54 = vadd.f32 %v5128_v23, %v1018_v17  ;;  %v1183_v17 = vadd.f32 %v5124_v39, %v1014_v13  ;;  %v1181_v8 = vadd.f32 %v5116_v19, %v1008_v46  ;;  %v1469_v9 = vadd.f32 %v5190_v52, %v1347_v60 }
 0x4d8   :  { %3760 = vmatmul.mubr.msk.f32.vlgmr.msra.gmra.mxu1 %vm249_vm0, %v5240_v24  ;;  %3770 = vmatprep.subr.mxu1 %v5546_v1  ;;  %v1773_v24 = vpop.f32.mrf.mxu0 }
 0x4d9   :  { %3778 = vmatprep.mubr.msk.f32.mxu1 %vm4084_vm9, %v5546_v1  ;;  %v1185_v1 = vadd.f32 %v5132_v55, %v1020_v42  ;;  %v1344_v63 = vadd.f32 %v5154_v28, %v1184_v54  ;;  %v1343_v39 = vadd.f32 %v5150_v26, %v1183_v17  ;;  %v2124_v17 = vpop.permute.xlu1 %2123 }
 0x4da   :  { %v1777_v14 = vpop.f32.mrf.mxu0 }
 0x4db   :  { %v1345_v25 = vadd.f32 %v5158_v40, %v1185_v1  ;;  %v1466_v55 = vadd.f32 %v5160_v2, %v1344_v63  ;;  %v1341_v1 = vadd.f32 %v5142_v12, %v1181_v8  ;;  %v1465_v26 = vadd.f32 %v5156_v29, %v1343_v39  ;;  %v2120_v63 = vpop.permute.xlu0 %2119 }
 0x4dc   :  { %v1779_v20 = vpop.f32.mrf.mxu0  ;;  %v1468_v2 = vadd.f32 %v5176_v15, %v1346_v61  ;;  %v1462_v29 = vadd.f32 %v5144_v3, %v1340_v31  ;;  %v1629_v15 = vadd.f32 %v1619_v33, %v1469_v9 }
 0x4dd   :  { %v1467_v28 = vadd.f32 %v5164_v41, %v1345_v25  ;;  %v1626_v10 = vadd.f32 %v1611_v21, %v1466_v55  ;;  %v1463_v41 = vadd.f32 %v5148_v56, %v1341_v1  ;;  %v1625_v12 = vadd.f32 %v5219_v62, %v1465_v26  ;;  %v2116_v45 = vpop.permute.xlu1 %2115 }
 0x4de   :  { %v1628_v22 = vadd.f32 %v1617_v57, %v1468_v2  ;;  %v1624_v21 = vadd.f32 %v5207_v44, %v1464_v43  ;;  %v1622_v57 = vadd.f32 %v5178_v50, %v1462_v29  ;;  %v1789_v44 = vadd.f32 %v1779_v20, %v1629_v15 }
 0x4df   :  { %v5265_v59 = vpop.f32.mrf.mxu1  ;;  %v1627_v42 = vadd.f32 %v1613_v30, %v1467_v28  ;;  %v1786_v7 = vadd.f32 %v1771_v49, %v1626_v10  ;;  %v1623_v16 = vadd.f32 %v5192_v53, %v1463_v41  ;;  %v1785_v56 = vadd.f32 %v5237_v35, %v1625_v12 }
 0x4e0   :  { %v1788_v34 = vadd.f32 %v1777_v14, %v1628_v22  ;;  %v1784_v3 = vadd.f32 %v5229_v51, %v1624_v21  ;;  %v1782_v50 = vadd.f32 %v5205_v11, %v1622_v57  ;;  %v5335_v22 = vld [vmem:[%s5530_s10] sm:$0xff] }
 0x4e1   :  { %v1921_v23 = vpop.f32.mrf.mxu1  ;;  %v1787_v32 = vadd.f32 %v1773_v24, %v1627_v42  ;;  %v1783_v53 = vadd.f32 %v5217_v47, %v1623_v16  ;;  %v2112_v9 = vpop.permute.xlu1 %2111  ;;  %3764 = vmatprep.mubr.msk.f32.mxu0 %vm2489_vm10, %v5335_v22 }
 0x4e3   :  { %v1925_v0 = vpop.f32.mrf.mxu1  ;;  %v1943_v51 = vadd.f32 %v1921_v23, %v1783_v53 }
 0x4e4   :  { %v1944_v39 = vadd.f32 %v1925_v0, %v1784_v3  ;;  %v1942_v0 = vadd.f32 %v5265_v59, %v1782_v50 }
 0x4e5   :  { %v1927_v27 = vpop.f32.mrf.mxu1 }
 0x4e6   :  { %v1945_v38 = vadd.f32 %v1927_v27, %v1785_v56 }
 0x4e7   :  { %v1931_v19 = vpop.f32.mrf.mxu1  ;;  %v2079_v40 = vpop.f32.mrf.mxu0 }
 0x4e8   :  { %v1946_v52 = vadd.f32 %v1931_v19, %v1786_v7  ;;  %v2102_v23 = vadd.f32 %v2079_v40, %v1942_v0 }
 0x4e9   :  { %v1933_v48 = vpop.f32.mrf.mxu1  ;;  %v2081_v13 = vpop.f32.mrf.mxu0 }
 0x4ea   :  { %v1947_v62 = vadd.f32 %v1933_v48, %v1787_v32  ;;  %v2103_v19 = vadd.f32 %v2081_v13, %v1943_v51  ;;  %v5324_v42 = vadd.f32 %v2112_v9, %v2102_v23 }
 0x4eb   :  { %v2085_v54 = vpop.f32.mrf.mxu0  ;;  %v1937_v36 = vpop.f32.mrf.mxu1 }
 0x4ec   :  { %v1948_v24 = vadd.f32 %v1937_v36, %v1788_v34  ;;  %v2104_v60 = vadd.f32 %v2085_v54, %v1944_v39  ;;  %v5320_v48 = vadd.f32 %v2112_v9, %v2103_v19  ;;  %v2163_v12 = vmul.f32 %v5324_v42, %v4549_v4 }
 0x4ed   :  { %v2087_v46 = vpop.f32.mrf.mxu0  ;;  %v1939_v33 = vpop.f32.mrf.mxu1 }
 0x4ee   :  { %v1949_v35 = vadd.f32 %v1939_v33, %v1789_v44  ;;  %v2105_v14 = vadd.f32 %v2087_v46, %v1945_v38  ;;  %v5314_v10 = vadd.f32 %v2116_v45, %v2104_v60  ;;  %v2164_v41 = vmul.f32 %v5320_v48, %v4540_v58  ;;  %v5374_v33 = vld [vmem:[%s5530_s10 + $0x10] sm:$0xff]  ;;  %v5564_v38 = vld [vmem:[#allocation28_spill] sm:$0xff] }
 0x4ef   :  { %v2091_v30 = vpop.f32.mrf.mxu0  ;;  %v5566_v60 = vld [vmem:[#allocation24_spill] sm:$0xff] }
 0x4f0   :  { %v2106_v49 = vadd.f32 %v2091_v30, %v1946_v52  ;;  %v5310_v26 = vadd.f32 %v2116_v45, %v2105_v14  ;;  %v2165_v40 = vmul.f32 %v5314_v10, %v4549_v4  ;;  %v2171_v7 = vadd.f32 %v2164_v41, %v2163_v12 }
 0x4f1   :  { %v2093_v37 = vpop.f32.mrf.mxu0 }
 0x4f2   :  { %v2107_v25 = vadd.f32 %v2093_v37, %v1947_v62  ;;  %v5297_v8 = vadd.f32 %v2120_v63, %v2106_v49  ;;  %v2166_v13 = vmul.f32 %v5310_v26, %v4540_v58  ;;  %v5389_v37 = vld [vmem:[%s5530_s10 + $0x18] sm:$0xff] }
 0x4f3   :  { %v2097_v55 = vpop.f32.mrf.mxu0 }
 0x4f4   :  { %v5300_v61 = vadd.f32 %v2120_v63, %v2107_v25  ;;  %v2108_v18 = vadd.f32 %v2097_v55, %v1948_v24  ;;  %v2167_v1 = vmul.f32 %v5297_v8, %v4549_v4  ;;  %v2174_v54 = vadd.f32 %v2166_v13, %v2165_v40 }
 0x4f5   :  { %v2099_v20 = vpop.f32.mrf.mxu0 }
 0x4f6   :  { %v5303_v27 = vadd.f32 %v2124_v17, %v2108_v18  ;;  %v2109_v28 = vadd.f32 %v2099_v20, %v1949_v35  ;;  %v2168_v47 = vmul.f32 %v5300_v61, %v4540_v58  ;;  %v5565_v18 = vld [vmem:[#allocation23_spill] sm:$0xff] }
 0x4f8   :  { %v5312_v2 = vadd.f32 %v2124_v17, %v2109_v28  ;;  %v2177_v11 = vadd.f32 %v2168_v47, %v2167_v1  ;;  %v2169_v31 = vmul.f32 %v5303_v27, %v4549_v4  ;;  %v5562_v17 = vmov 0.0   ;;  %v5567_v1 = vld [vmem:[#allocation25_spill] sm:$0xff] }
 0x4fa   :  { %2178 = vadd.xlane.f32.xlu0 %v2177_v11  ;;  %v2170_v43 = vmul.f32 %v5312_v2, %v4540_v58 }
 0x4fc   :  { %v2180_v59 = vadd.f32 %v2170_v43, %v2169_v31 }
 0x4fe   :  { %2181 = vadd.xlane.f32.xlu1 %v2180_v59 }
 0x502   :  { %2175 = vadd.xlane.f32.xlu1 %v2174_v54 }
 0x506   :  { %2172 = vadd.xlane.f32.xlu1 %v2171_v7 }
 0x583   :  { %v2179_v29 = vpop.xlane.xlu0 %2178 }
 0x584   :  { %v5341_v36 = vmul.f32 0.00390625, %v2179_v29 }
 0x587   :  { %v2182_v21 = vpop.xlane.xlu1 %2181 }
 0x588   :  { %v5339_v15 = vmul.f32 0.00390625, %v2182_v21  ;;  %v2257_v58 = vpop.f32.mrf.mxu1 }
 0x58a   :  { %3771 = vmatpush3.msra.mxu1 %v5339_v15  ;;  %v3728_v4 = vpop.f32.mrf.mxu1  ;;  %v2408_v46 = vpop.f32.mrf.mxu0 }
 0x58b   :  { %v2176_v32 = vpop.xlane.xlu1 %2175  ;;  %3772 = vmatprep.subr.mxu1 %v5562_v17 }
 0x58c   :  { %v5345_v52 = vmul.f32 0.00390625, %v2176_v32  ;;  %3773 = vmatpush3.msra.mxu1 %v5341_v36  ;;  %v3750_v16 = vpop.f32.mrf.mxu0 }
 0x58d   :  { %3774 = vmatprep.subr.mxu1 %v5562_v17  ;;  %v5568_v16 = vld [vmem:[#allocation26_spill] sm:$0xff] }
 0x58e   :  { %3775 = vmatpush3.msra.mxu1 %v5345_v52 }
 0x58f   :  { %v2173_v30 = vpop.xlane.xlu1 %2172  ;;  %3776 = vmatprep.subr.mxu1 %v5562_v17 }
 0x590   :  { %v5351_v63 = vmul.f32 0.00390625, %v2173_v30  ;;  %v2332_v56 = vpop.f32.mrf.mxu1 }
 0x591   :  { %v2336_v62 = vmax.f32 %v2257_v58, %v2332_v56 }
 0x592   :  { %3777 = vmatpush3.msra.mxu1 %v5351_v63  ;;  %v3739_v34 = vpop.f32.mrf.mxu1 }
 0x593   :  { %3792 = vmatprep.subr.mxu1 %v5562_v17  ;;  %3779 = vmatmul.mubr.msk.f32.vlgmr.msra.gmra.mxu1 %vm249_vm0, %v5196_v5  ;;  %v2412_v49 = vmax.f32 %v2336_v62, %v2408_v46  ;;  %v5369_v5 = vld [vmem:[%s5530_s10 + $0x8] sm:$0xff] }
 0x594   :  { %3793 = vmatpush3.msra.mxu1 %v5339_v15  ;;  %3800 = vmatprep.mubr.msk.f32.mxu1 %vm4084_vm9, %v5562_v17 }
 0x595   :  { %3794 = vmatprep.subr.mxu1 %v5562_v17 }
 0x596   :  { %3795 = vmatpush3.msra.mxu1 %v5341_v36 }
 0x597   :  { %3796 = vmatprep.subr.mxu1 %v5562_v17 }
 0x598   :  { %v2484_v57 = vpop.f32.mrf.mxu1  ;;  %3797 = vmatpush3.msra.mxu1 %v5345_v52 }
 0x599   :  { %v2488_v3 = vmax.f32 %v2412_v49, %v2484_v57  ;;  %3798 = vmatprep.subr.mxu1 %v5562_v17 }
 0x59a   :  { %v3761_v44 = vpop.f32.mrf.mxu1  ;;  %3799 = vmatpush3.msra.mxu1 %v5351_v63 }
 0x59b   :  { %3762 = vmatprep.subr.mxu0 %v2488_v3  ;;  %3801 = vmatmul.mubr.msk.f32.vlgmr.msra.gmra.mxu1 %vm249_vm0, %v5200_v6  ;;  %v5563_v6 = vld [vmem:[#allocation27_spill] sm:$0xff] }
 0x59c   :  { %3763 = vmatpush3.msra.mxu0 %v2488_v3  ;;  %3816 = vmatprep.mubr.msk.f32.mxu1 %vm2489_vm10, %v5335_v22 }
 0x59d   :  { %3765 = vmatmul.mubr.msk.f32.vlgmr.msra.gmra.mxu0 %vm2489_vm10, %v5369_v5  ;;  %3781 = vmatprep.subr.mxu0 %v5562_v17 }
 0x59e   :  { %3782 = vmatpush3.msra.mxu0 %v5339_v15  ;;  %3767 = vmatprep.mubr.msk.f32.mxu0 %vm2489_vm10, %v5374_v33 }
 0x59f   :  { %3783 = vmatprep.subr.mxu0 %v5562_v17 }
 0x5a0   :  { %3784 = vmatpush3.msra.mxu0 %v5341_v36 }
 0x5a1   :  { %3768 = vmatmul.mubr.msk.f32.gmra.mxu0 %vm2489_vm10, %v5389_v37  ;;  %3785 = vmatprep.subr.mxu0 %v5562_v17 }
 0x5a2   :  { %3786 = vmatpush3.msra.mxu0 %v5345_v52  ;;  %3789 = vmatprep.mubr.msk.f32.mxu0 %vm4084_vm9, %v5562_v17 }
 0x5a3   :  { %3787 = vmatprep.subr.mxu0 %v5562_v17 }
 0x5a4   :  { %3788 = vmatpush3.msra.mxu0 %v5351_v63 }
 0x5a5   :  { %3803 = vmatprep.subr.mxu0 %v5562_v17  ;;  %3790 = vmatmul.mubr.msk.f32.vlgmr.msra.gmra.mxu0 %vm249_vm0, %v5563_v6 }
 0x5a6   :  { %3804 = vmatpush3.msra.mxu0 %v5339_v15  ;;  %3811 = vmatprep.mubr.msk.f32.mxu0 %vm4084_vm9, %v5562_v17 }
 0x5a7   :  { %3805 = vmatprep.subr.mxu0 %v5562_v17 }
 0x5a8   :  { %3806 = vmatpush3.msra.mxu0 %v5341_v36 }
 0x5a9   :  { %3807 = vmatprep.subr.mxu0 %v5562_v17 }
 0x5aa   :  { %3808 = vmatpush3.msra.mxu0 %v5345_v52 }
 0x5ab   :  { %3809 = vmatprep.subr.mxu0 %v5562_v17 }
 0x5ac   :  { %3810 = vmatpush3.msra.mxu0 %v5351_v63 }
 0x5ad   :  { %3812 = vmatmul.mubr.msk.f32.vlgmr.msra.gmra.mxu0 %vm249_vm0, %v5564_v38 }
 0x5ae   :  { %3074 = vmatprep.mubr.f32.mxu0 %v5562_v17 }
 0x653   :  { %v2665_v24 = vpop.f32.mrf.mxu1 }
 0x655   :  { %v3780_v25 = vpop.f32.mrf.mxu1 }
 0x65b   :  { %v2806_v53 = vpop.f32.mrf.mxu1 }
 0x65d   :  { %v3766_v39 = vpop.f32.mrf.mxu0  ;;  %v3802_v55 = vpop.f32.mrf.mxu1 }
 0x65e   :  { %v2588_v47 = vsub.f32 %v5567_v1, %v3766_v39  ;;  %v5569_v55 = vld [vmem:[#allocation17_spill] sm:$0xff]  ;;  %v5574_v1 = vld [vmem:[#allocation19_spill] sm:$0xff] }
 0x65f   :  { %v2568_v35 = vpop.f32.mrf.mxu0 }
 0x660   :  { %v2593_v23 = vmul.f32 1.442695, %v2588_v47 }
 0x661   :  { %v3769_v14 = vpop.f32.mrf.mxu0 }
 0x662   :  { %v2590_v50 = vsub.f32 %v5565_v18, %v3769_v14  ;;  %v5570_v14 = vld [vmem:[#allocation18_spill] sm:$0xff] }
 0x663   :  { %v2578_v51 = vpop.f32.mrf.mxu0 }
 0x664   :  { %v2597_v45 = vmul.f32 1.442695, %v2590_v50  ;;  %v2589_v20 = vsub.f32 %v5566_v60, %v2578_v51  ;;  %v2134_v50 = vld [vmem:[%s5529_s9] sm:$0xff] }
 0x665   :  { %v2735_v28 = vpop.f32.mrf.mxu0 }
 0x666   :  { %3908 = vpow2.f32 %v2597_v45  ;;  %v2595_v0 = vmul.f32 1.442695, %v2589_v20  ;;  %v2739_v11 = vmax.f32 %v2665_v24, %v2735_v28  ;;  %v5571_v45 = vld [vmem:[#allocation15_spill] sm:$0xff]  ;;  %v5572_v20 = vld [vmem:[#allocation16_spill] sm:$0xff] }
 0x667   :  { %v3791_v19 = vpop.f32.mrf.mxu0 }
 0x668   :  { %3910 = vpow2.f32 %v2595_v0  ;;  %v2810_v31 = vmax.f32 %v2739_v11, %v2806_v53  ;;  %v5575_v19 = vld [vmem:[#allocation21_spill] sm:$0xff] }
 0x669   :  { %3912 = vpow2.f32 %v2593_v23  ;;  %v5576_v23 = vld [vmem:[#allocation22_spill] sm:$0xff] }
 0x66d   :  { %v2877_v43 = vpop.f32.mrf.mxu0 }
 0x66e   :  { %v2881_v9 = vmax.f32 %v2810_v31, %v2877_v43 }
 0x66f   :  { %v3813_v59 = vpop.f32.mrf.mxu0 }
 0x670   :  { %3814 = vmatprep.subr.mxu1 %v2881_v9 }
 0x671   :  { %3815 = vmatpush3.msra.mxu1 %v2881_v9 }
 0x672   :  { %3817 = vmatmul.mubr.msk.f32.vlgmr.msra.gmra.mxu1 %vm2489_vm10, %v5369_v5 }
 0x673   :  { %v5421_v13 = vpop.eup %3908  ;;  %3819 = vmatprep.mubr.msk.f32.mxu1 %vm2489_vm10, %v5374_v33 }
 0x674   :  { %2996 = vperm.xlu1 %3882, %v5421_v13  }
 0x675   :  { %v5428_v40 = vpop.eup %3910 }
 0x676   :  { %3820 = vmatmul.mubr.msk.f32.gmra.mxu1 %vm2489_vm10, %v5389_v37  ;;  %v5432_v41 = vpop.eup %3912 }
 0x677   :  { %3173 = vmatprep.mubr.f32.mxu1 %v5562_v17 }
 0x678   :  { %2991 = vperm.xlu1 %3882, %v5428_v40  }
 0x67c   :  { %2986 = vperm.xlu1 %3882, %v5432_v41  }
 0x6ef   :  { %v2997_v54 = vpop.permute.xlu1 %2996 }
 0x6f0   :  { %v3005_v12 = vmul.f32 %v2997_v54, %v5303_v27  ;;  %v3006_v7 = vmul.f32 %v2997_v54, %v5312_v2  ;;  %v2587_v27 = vsub.f32 %v5568_v16, %v2568_v35 }
 0x6f2   :  { %3034 = vmatprep.subr.mxu0 %v3006_v7  ;;  %v2591_v62 = vmul.f32 1.442695, %v2587_v27 }
 0x6f3   :  { %v2992_v29 = vpop.permute.xlu1 %2991  ;;  %3035 = vmatpush1.msra.mxu0 %v3005_v12 }
 0x6f4   :  { %v3003_v21 = vmul.f32 %v2992_v29, %v5297_v8  ;;  %v3004_v58 = vmul.f32 %v2992_v29, %v5300_v61 }
 0x6f6   :  { %3036 = vmatprep.subr.mxu0 %v3004_v58 }
 0x6f7   :  { %v2987_v4 = vpop.permute.xlu1 %2986  ;;  %3037 = vmatpush1.msra.mxu0 %v3003_v21 }
 0x6f8   :  { %v3001_v46 = vmul.f32 %v2987_v4, %v5314_v10  ;;  %v3002_v32 = vmul.f32 %v2987_v4, %v5310_v26 }
 0x6fa   :  { %3038 = vmatprep.subr.mxu0 %v3002_v32 }
 0x6fb   :  { %3039 = vmatpush1.msra.mxu0 %v3001_v46 }
 0x732   :  { %v3818_v30 = vpop.f32.mrf.mxu1 }
 0x733   :  { %v2968_v2 = vsub.f32 %v5345_v52, %v3818_v30 }
 0x734   :  { %v2948_v56 = vpop.f32.mrf.mxu1 }
 0x735   :  { %v2973_v34 = vmul.f32 1.442695, %v2968_v2  ;;  %v2967_v26 = vsub.f32 %v5351_v63, %v2948_v56 }
 0x736   :  { %v3821_v8 = vpop.f32.mrf.mxu1 }
 0x737   :  { %3914 = vpow2.f32 %v2973_v34  ;;  %v2970_v61 = vsub.f32 %v5339_v15, %v3821_v8  ;;  %v2971_v44 = vmul.f32 1.442695, %v2967_v26 }
 0x738   :  { %v2958_v49 = vpop.f32.mrf.mxu1  ;;  %3916 = vpow2.f32 %v2591_v62 }
 0x739   :  { %v2977_v57 = vmul.f32 1.442695, %v2970_v61  ;;  %v2969_v10 = vsub.f32 %v5341_v36, %v2958_v49 }
 0x73b   :  { %3918 = vpow2.f32 %v2977_v57  ;;  %v2975_v3 = vmul.f32 1.442695, %v2969_v10 }
 0x73d   :  { %3920 = vpow2.f32 %v2975_v3 }
 0x73e   :  { %3922 = vpow2.f32 %v2971_v44 }
 0x744   :  { %v3915_v52 = vpop.eup %3914 }
 0x745   :  { %3088 = vperm.xlu1 %3882, %v3915_v52   ;;  %v3917_v6 = vpop.eup %3916 }
 0x748   :  { %v3919_v38 = vpop.eup %3918 }
 0x749   :  { %2981 = vperm.xlu1 %3882, %v3917_v6   ;;  %3098 = vperm.xlu0 %3883, %v3919_v38  }
 0x74a   :  { %v3921_v24 = vpop.eup %3920 }
 0x74b   :  { %v3923_v15 = vpop.eup %3922 }
 0x74d   :  { %3093 = vperm.xlu1 %3882, %v3921_v24  }
 0x751   :  { %3083 = vperm.xlu1 %3882, %v3923_v15  }
 0x7c0   :  { %v3089_v25 = vpop.permute.xlu1 %3088 }
 0x7c1   :  { %v3103_v47 = vmul.f32 %v3089_v25, %v5574_v1 }
 0x7c4   :  { %v2982_v36 = vpop.permute.xlu1 %2981  ;;  %v3099_v53 = vpop.permute.xlu0 %3098 }
 0x7c5   :  { %v2999_v63 = vmul.f32 %v2982_v36, %v5324_v42  ;;  %v3000_v39 = vmul.f32 %v2982_v36, %v5320_v48  ;;  %v3107_v35 = vmul.f32 %v3099_v53, %v5569_v55  ;;  %v3108_v18 = vmul.f32 %v3099_v53, %v5570_v14  ;;  %v5573_v48 = vld [vmem:[#allocation20_spill] sm:$0xff]  ;;  %v3954_v55 = vld [vmem:[%s5520_s0 + $0x30] sm:$0xff] }
 0x7c6   :  { %v3104_v42 = vmul.f32 %v3089_v25, %v5573_v48  ;;  %v3953_v53 = vld [vmem:[%s5520_s0 + $0x28] sm:$0xff] }
 0x7c7   :  { %3040 = vmatprep.subr.mxu0 %v3000_v39  ;;  %3133 = vmatprep.subr.mxu1 %v3108_v18  ;;  %v3955_v18 = vld [vmem:[%s5520_s0 + $0x38] sm:$0xff] }
 0x7c8   :  { %3041 = vmatpush1.msra.mxu0 %v2999_v63  ;;  %3134 = vmatpush1.msra.mxu1 %v3107_v35  ;;  %v3094_v51 = vpop.permute.xlu1 %3093 }
 0x7c9   :  { %v3105_v60 = vmul.f32 %v3094_v51, %v5571_v45  ;;  %v3106_v28 = vmul.f32 %v3094_v51, %v5572_v20  ;;  %3822 = vmatprep.subr.mxu0 %v5562_v17  ;;  %3582 = vmatmul.mubr.msk.f32.vlgmr.msra.gmra.mxu0 %vm249_vm0, %v2134_v50 }
 0x7ca   :  { %3823 = vmatpush3.msra.mxu0 %v5421_v13  ;;  %3830 = vmatprep.mubr.msk.f32.mxu0 %vm4084_vm9, %v5562_v17 }
 0x7cb   :  { %3135 = vmatprep.subr.mxu1 %v3106_v28  ;;  %3824 = vmatprep.subr.mxu0 %v5562_v17 }
 0x7cc   :  { %3136 = vmatpush1.msra.mxu1 %v3105_v60  ;;  %3825 = vmatpush3.msra.mxu0 %v5428_v40  ;;  %v3084_v0 = vpop.permute.xlu1 %3083 }
 0x7cd   :  { %v3101_v11 = vmul.f32 %v3084_v0, %v5575_v19  ;;  %v3102_v31 = vmul.f32 %v3084_v0, %v5576_v23  ;;  %3137 = vmatprep.subr.mxu1 %v3104_v42  ;;  %3826 = vmatprep.subr.mxu0 %v5562_v17 }
 0x7ce   :  { %3138 = vmatpush1.msra.mxu1 %v3103_v47  ;;  %3827 = vmatpush3.msra.mxu0 %v5432_v41 }
 0x7cf   :  { %3139 = vmatprep.subr.mxu1 %v3102_v31  ;;  %3828 = vmatprep.subr.mxu0 %v5562_v17 }
 0x7d0   :  { %3140 = vmatpush1.msra.mxu1 %v3101_v11  ;;  %3829 = vmatpush3.msra.mxu0 %v3917_v6  ;;  %v3951_v6 = vld [vmem:[%s5520_s0 + $0x18] sm:$0xff] }
 0x7d1   :  { %3831 = vmatmul.mubr.msk.f32.vlgmr.msra.gmra.mxu0 %vm249_vm0, %v2134_v50  ;;  %3833 = vmatprep.subr.mxu1 %v5562_v17 }
 0x7d2   :  { %3583 = vmatmul.mubr.msk.f32.vlgmr.msra.gmra.mxu1 %vm249_vm0, %v2134_v50  ;;  %3414 = vmatprep.mubr.f32.mxu0 %v5562_v17 }
 0x7d3   :  { %3834 = vmatpush3.msra.mxu1 %v3919_v38  ;;  %3841 = vmatprep.mubr.msk.f32.mxu1 %vm4084_vm9, %v5562_v17 }
 0x7d4   :  { %3835 = vmatprep.subr.mxu1 %v5562_v17 }
 0x7d5   :  { %3836 = vmatpush3.msra.mxu1 %v3921_v24 }
 0x7d6   :  { %3837 = vmatprep.subr.mxu1 %v5562_v17 }
 0x7d7   :  { %3838 = vmatpush3.msra.mxu1 %v3915_v52 }
 0x7d8   :  { %3839 = vmatprep.subr.mxu1 %v5562_v17 }
 0x7d9   :  { %3840 = vmatpush3.msra.mxu1 %v3923_v15  ;;  %v3952_v15 = vld [vmem:[%s5520_s0 + $0x20] sm:$0xff] }
 0x7da   :  { %3842 = vmatmul.mubr.msk.f32.vlgmr.msra.gmra.mxu1 %vm249_vm0, %v2134_v50 }
 0x889   :  { %v3076_v43 = vpop.f32.mrf.mxu0 }
 0x88b   :  { %v3078_v9 = vpop.f32.mrf.mxu0 }
 0x891   :  { %v3246_v59 = vpop.f32.mrf.mxu0 }
 0x892   :  { %3322 = vperm.xlu1 %3882, %v3246_v59   ;;  %v3175_v40 = vpop.f32.mrf.mxu1 }
 0x893   :  { %v3832_v13 = vpop.f32.mrf.mxu0 }
 0x894   :  { %v3177_v41 = vpop.f32.mrf.mxu1 }
 0x89a   :  { %v3316_v54 = vpop.f32.mrf.mxu1 }
 0x89b   :  { %3330 = vperm.xlu1 %3882, %v3316_v54  }
 0x89c   :  { %v3843_v12 = vpop.f32.mrf.mxu1 }
 0x90d   :  { %v3323_v7 = vpop.permute.xlu1 %3322 }
 0x90e   :  { %3924 = vrcp.f32 %v3323_v7 }
 0x916   :  { %v3331_v29 = vpop.permute.xlu1 %3330 }
 0x917   :  { %3926 = vrcp.f32 %v3331_v29 }
 0x91b   :  { %v3925_v21 = vpop.eup %3924 }
 0x91c   :  { %v3326_v4 = vmul.f32 %v3925_v21, %v3076_v43  ;;  %v3327_v46 = vmul.f32 %v3925_v21, %v3078_v9 }
 0x924   :  { %v3927_v58 = vpop.eup %3926 }
 0x925   :  { %v3334_v32 = vmul.f32 %v3927_v58, %v3175_v40  ;;  %v3335_v16 = vmul.f32 %v3927_v58, %v3177_v41 }
 0x927   :  { %v3336_v27 = vadd.f32 %v3334_v32, %v3326_v4  ;;  %v3337_v30 = vadd.f32 %v3335_v16, %v3327_v46 }
 0x929   :  { %v3586_v2 = vmul.f32 -1.442695, %v3336_v27  ;;  %v3587_v56 = vmul.f32 -1.442695, %v3337_v30 }
 0x92b   :  { %3928 = vpow2.f32 %v3586_v2 }
 0x92c   :  { %3930 = vpow2.f32 %v3587_v56 }
 0x938   :  { %v3929_v34 = vpop.eup %3928 }
 0x939   :  { %v3931_v62 = vpop.eup %3930  ;;  %v3344_v8 = vadd.f32 1.0, %v3929_v34 }
 0x93a   :  { %v3345_v61 = vadd.f32 1.0, %v3931_v62 }
 0x93b   :  { %3932 = vrcp.f32 %v3344_v8 }
 0x93c   :  { %3934 = vrcp.f32 %v3345_v61 }
 0x948   :  { %v3933_v49 = vpop.eup %3932 }
 0x949   :  { %v3935_v57 = vpop.eup %3934 }
 0x94a   :  { %3380 = vmatprep.subr.mxu0 %v3935_v57 }
 0x94b   :  { %3381 = vmatpush1.msra.mxu0 %v3933_v49 }
 0x94c   :  { %3588 = vmatmul.mubr.msk.f32.vlgmr.msra.gmra.mxu0 %vm2489_vm10, %v5335_v22  ;;  %v3948_v22 = vld [vmem:[%s5520_s0] sm:$0xff] }
 0x94d   :  { %3420 = vmatprep.mubr.f32.mxu0 %v5562_v17 }
 0x950   :  { %3589 = vmatmul.mubr.msk.f32.gmra.mxu0 %vm2489_vm10, %v5369_v5  ;;  %v3949_v5 = vld [vmem:[%s5520_s0 + $0x8] sm:$0xff] }
 0x951   :  { %3426 = vmatprep.mubr.f32.mxu0 %v5562_v17 }
 0x954   :  { %3590 = vmatmul.mubr.msk.f32.gmra.mxu0 %vm2489_vm10, %v5374_v33 }
 0x955   :  { %3432 = vmatprep.mubr.f32.mxu0 %v5562_v17  ;;  %v3950_v17 = vld [vmem:[%s5520_s0 + $0x10] sm:$0xff] }
 0x958   :  { %3591 = vmatmul.mubr.msk.f32.gmra.mxu0 %vm2489_vm10, %v5389_v37 }
 0xa0c   :  { %v3416_v10 = vpop.f32.mrf.mxu0 }
 0xa0d   :  { %v3439_v26 = vmul.f32 %v3948_v22, %v3416_v10 }
 0xa0e   :  { %v3418_v3 = vpop.f32.mrf.mxu0 }
 0xa0f   :  { %3447 = vst [vmem:[#allocation10] sm:$0xff] %v3439_v26  ;;  %v3440_v44 = vmul.f32 %v3949_v5, %v3418_v3 }
 0xa10   :  { %v3422_v52 = vpop.f32.mrf.mxu0 }
 0xa11   :  { %3448 = vst [vmem:[#allocation10 + $0x8] sm:$0xff] %v3440_v44  ;;  %v3441_v33 = vmul.f32 %v3950_v17, %v3422_v52 }
 0xa12   :  { %v3424_v37 = vpop.f32.mrf.mxu0 }
 0xa13   :  { %3449 = vst [vmem:[#allocation10 + $0x10] sm:$0xff] %v3441_v33  ;;  %v3442_v38 = vmul.f32 %v3951_v6, %v3424_v37 }
 0xa14   :  { %v3428_v24 = vpop.f32.mrf.mxu0 }
 0xa15   :  { %3450 = vst [vmem:[#allocation10 + $0x18] sm:$0xff] %v3442_v38  ;;  %v3443_v25 = vmul.f32 %v3952_v15, %v3428_v24 }
 0xa16   :  { %v3430_v36 = vpop.f32.mrf.mxu0 }
 0xa17   :  { %3451 = vst [vmem:[#allocation10 + $0x20] sm:$0xff] %v3443_v25  ;;  %v3444_v63 = vmul.f32 %v3953_v53, %v3430_v36 }
 0xa18   :  { %v3434_v39 = vpop.f32.mrf.mxu0 }
 0xa19   :  { %3452 = vst [vmem:[#allocation10 + $0x28] sm:$0xff] %v3444_v63  ;;  %v3445_v35 = vmul.f32 %v3954_v55, %v3434_v39 }
 0xa1a   :  { %v3436_v14 = vpop.f32.mrf.mxu0 }
 0xa1b   :  { %3453 = vst [vmem:[#allocation10 + $0x30] sm:$0xff] %v3445_v35  ;;  %v3446_v50 = vmul.f32 %v3955_v18, %v3436_v14 }
 0xa1d   :  { %3454 = vst [vmem:[#allocation10 + $0x38] sm:$0xff] %v3446_v50 }
 0xa1e   :  { %4047 = shalt.err (!%p4044_p10)
}
 0xa1f   :  { %3466 = dma.vmem_to_hbm [thread:$0]  %s3461_s6, 1024, %s5531_s11, [#allocation4], %s4066_s22, %s4066_s22, %s4067_s23  }
 0xa20   :  { %4062 = dma.done.wait [#allocation4], 1024  }
 0xa21   :  { %4063 = vsyncadd [#allocation4], 4294966272 }
 0xa22   :  { %3470 = vsyncpa [#allocation3], 1 }
 0xa23   :  { %3471 = vsyncpa [#allocation6], 1 }
 0xa24   :  { %3472 = vsyncpa [#allocation9], 1 }
 0xa25   :  { %3473 = vsyncpa [#allocation4], 1 }

</bundles_post_ra>
